<compile_context>
chip_gen: v7x
topology: tpu7x:2x2x1
jax: 0.10.0
libtpu: 0.0.40
codegen_flags: <defaults>
</compile_context>

<pallas_src>
import jax
import jax.numpy as jnp
from jax.experimental import pallas as pl
from jax.experimental.pallas import tpu as pltpu


def _round_up(n: int, m: int) -> int:
    return ((n + m - 1) // m) * m


def subneuron_kernel(x_ref, w_ref, b_ref, o_ref):
    """x_ref: VMEM (tb, D); w_ref: VMEM (D, T); b_ref: VMEM (1, T); o_ref: VMEM (tb, T)."""
    x = x_ref[...]          # single full-block read (no per-row slicing of the ref)
    w = w_ref[...]
    D = x.shape[1]

    # Exact f32 contraction over the tiny D axis, unrolled on the VPU; the bias
    # is folded into the first multiply-add.
    z = x[:, 0:1] * w[0:1, :] + b_ref[...]
    for d in range(1, D):
        z = z + x[:, d:d + 1] * w[d:d + 1, :]

    # sigmoid(z) = 1 / (1 + exp(-z)): exp lands on the EUP.  pl.reciprocal with
    # approx=True would pin the divide on the EUP fast path too; kept exact
    # (approx=False) to preserve the 1e-5 parity check in __main__.
    o_ref[...] = pl.reciprocal(1.0 + jnp.exp(-z), approx=False)   # single full-tile store


def subneuron_forward(x, w, b, *, tb=8192):
    """SubNeuron forward: sigmoid(x @ w.T + b).

    x: [B, D] f32 (natural layout), w: [T, D] f32 (PyTorch Linear weight layout),
    b: [T] f32.  Returns [B, T] f32.  No wrapper-side transposes, pads or copies
    of x / y.
    """
    B, D = x.shape
    T = w.shape[0]

    # Keep the grid at >= 2 steps so the "parallel" axis can feed both of v7x's
    # TensorCores; also cap at B so tiny inputs still form one legal
    # (full-array) block.  tb stays a multiple of 8 (sublane tiling) unless it
    # equals B exactly.
    tb = min(tb, _round_up(pl.cdiv(B, 2), 8), B)
    grid = (pl.cdiv(B, tb),)

    # Tiny parameter reshuffles (15 + 3 floats), done once outside the grid.
    wt = w.T                  # (D, T): kernel contracts without an in-kernel transpose
    b2 = b.reshape(1, T)

    return pl.pallas_call(
        subneuron_kernel,
        out_shape=jax.ShapeDtypeStruct((B, T), jnp.float32),
        grid_spec=pltpu.PrefetchScalarGridSpec(
            num_scalar_prefetch=0,
            grid=grid,
            in_specs=[
                # x: natural-layout (tb, D) batch tiles, double-buffered by Pallas.
                pl.BlockSpec((tb, D), lambda i: (i, 0)),
                # w, b: grid-invariant VMEM blocks -- DMAed once, kept resident.
                pl.BlockSpec((D, T), lambda i: (0, 0)),
                pl.BlockSpec((1, T), lambda i: (0, 0)),
            ],
            out_specs=pl.BlockSpec((tb, T), lambda i: (i, 0)),
        ),
        compiler_params=pltpu.CompilerParams(
            dimension_semantics=("parallel",),
            # (tb,5) and (tb,3) f32 blocks are both lane-padded to 128 lanes ->
            # 512*tb B each; double-buffered ~2048*tb B (~16.8 MiB at tb=8192).
            vmem_limit_bytes=32 * 1024 * 1024,
        ),
    )(x, wt, b2)


if __name__ == "__main__":
    n_dims, n_targets = 5, 3
    batch = 1000  # small; not a multiple of the tile -> exercises a partial final block

    key = jax.random.PRNGKey(0)
    kx, kw, kb = jax.random.split(key, 3)

    # Deterministic init mimicking nn.Linear's uniform(-1/sqrt(D), 1/sqrt(D)).
    bound = 1.0 / float(n_dims) ** 0.5
    w = jax.random.uniform(kw, (n_targets, n_dims), jnp.float32, -bound, bound)
    b = jax.random.uniform(kb, (n_targets,), jnp.float32, -bound, bound)
    x = jax.random.normal(kx, (batch, n_dims), jnp.float32)

    out = jax.block_until_ready(subneuron_forward(x, w, b))

    # Reference in plain JAX (exact-precision matmul so both sides are f32-accurate).
    z_ref = jnp.dot(x, w.T, precision=jax.lax.Precision.HIGHEST) + b
    ref = jax.nn.sigmoid(z_ref)
    assert out.shape == (batch, n_targets)
    assert jnp.allclose(out, ref, atol=1e-5, rtol=1e-5)

    print("KERNEL_OK")
</pallas_src>

<mosaic_0001>
module attributes {stable_mosaic.version = 11 : i64} {
  func.func @subneuron_kernel(%arg0: i32, %arg1: memref<504x5xf32, #tpu.memory_space<vmem>>, %arg2: memref<5x3xf32, #tpu.memory_space<vmem>>, %arg3: memref<1x3xf32, #tpu.memory_space<vmem>>, %arg4: memref<504x3xf32, #tpu.memory_space<vmem>>) attributes {dimension_semantics = [#tpu.dimension_semantics<parallel>], iteration_bounds = array<i64: 2>, scalar_prefetch = 0 : i64, scratch_operands = 0 : i64, tpu.core_type = #tpu.core_type<tc>, window_params = [{transform_indices = @transform_0, window_bounds = array<i64: 504, 5>}, {pipeline_mode = #tpu.pipeline_mode<synchronous>, transform_indices = @transform_1, window_bounds = array<i64: 5, 3>}, {pipeline_mode = #tpu.pipeline_mode<synchronous>, transform_indices = @transform_2, window_bounds = array<i64: 1, 3>}, {transform_indices = @transform_3, window_bounds = array<i64: 504, 3>}]} {
    %c0 = arith.constant 0 : index
    %c0_0 = arith.constant 0 : index
    %0 = vector.load %arg1[%c0, %c0_0] : memref<504x5xf32, #tpu.memory_space<vmem>>, vector<504x5xf32>
    %c0_1 = arith.constant 0 : index
    %c0_2 = arith.constant 0 : index
    %1 = vector.load %arg2[%c0_1, %c0_2] : memref<5x3xf32, #tpu.memory_space<vmem>>, vector<5x3xf32>
    %2 = vector.extract_strided_slice %0 {offsets = [0, 0], sizes = [504, 1], strides = [1, 1]} : vector<504x5xf32> to vector<504x1xf32>
    %3 = vector.extract_strided_slice %1 {offsets = [0, 0], sizes = [1, 3], strides = [1, 1]} : vector<5x3xf32> to vector<1x3xf32>
    %4 = vector.broadcast %2 : vector<504x1xf32> to vector<504x3xf32>
    %5 = vector.broadcast %3 : vector<1x3xf32> to vector<504x3xf32>
    %6 = arith.mulf %4, %5 : vector<504x3xf32>
    %c0_3 = arith.constant 0 : index
    %c0_4 = arith.constant 0 : index
    %7 = vector.load %arg3[%c0_3, %c0_4] : memref<1x3xf32, #tpu.memory_space<vmem>>, vector<1x3xf32>
    %8 = vector.broadcast %7 : vector<1x3xf32> to vector<504x3xf32>
    %9 = arith.addf %6, %8 : vector<504x3xf32>
    %10 = vector.extract_strided_slice %0 {offsets = [0, 1], sizes = [504, 1], strides = [1, 1]} : vector<504x5xf32> to vector<504x1xf32>
    %11 = vector.extract_strided_slice %1 {offsets = [1, 0], sizes = [1, 3], strides = [1, 1]} : vector<5x3xf32> to vector<1x3xf32>
    %12 = vector.broadcast %10 : vector<504x1xf32> to vector<504x3xf32>
    %13 = vector.broadcast %11 : vector<1x3xf32> to vector<504x3xf32>
    %14 = arith.mulf %12, %13 : vector<504x3xf32>
    %15 = arith.addf %9, %14 : vector<504x3xf32>
    %16 = vector.extract_strided_slice %0 {offsets = [0, 2], sizes = [504, 1], strides = [1, 1]} : vector<504x5xf32> to vector<504x1xf32>
    %17 = vector.extract_strided_slice %1 {offsets = [2, 0], sizes = [1, 3], strides = [1, 1]} : vector<5x3xf32> to vector<1x3xf32>
    %18 = vector.broadcast %16 : vector<504x1xf32> to vector<504x3xf32>
    %19 = vector.broadcast %17 : vector<1x3xf32> to vector<504x3xf32>
    %20 = arith.mulf %18, %19 : vector<504x3xf32>
    %21 = arith.addf %15, %20 : vector<504x3xf32>
    %22 = vector.extract_strided_slice %0 {offsets = [0, 3], sizes = [504, 1], strides = [1, 1]} : vector<504x5xf32> to vector<504x1xf32>
    %23 = vector.extract_strided_slice %1 {offsets = [3, 0], sizes = [1, 3], strides = [1, 1]} : vector<5x3xf32> to vector<1x3xf32>
    %24 = vector.broadcast %22 : vector<504x1xf32> to vector<504x3xf32>
    %25 = vector.broadcast %23 : vector<1x3xf32> to vector<504x3xf32>
    %26 = arith.mulf %24, %25 : vector<504x3xf32>
    %27 = arith.addf %21, %26 : vector<504x3xf32>
    %28 = vector.extract_strided_slice %0 {offsets = [0, 4], sizes = [504, 1], strides = [1, 1]} : vector<504x5xf32> to vector<504x1xf32>
    %29 = vector.extract_strided_slice %1 {offsets = [4, 0], sizes = [1, 3], strides = [1, 1]} : vector<5x3xf32> to vector<1x3xf32>
    %30 = vector.broadcast %28 : vector<504x1xf32> to vector<504x3xf32>
    %31 = vector.broadcast %29 : vector<1x3xf32> to vector<504x3xf32>
    %32 = arith.mulf %30, %31 : vector<504x3xf32>
    %33 = arith.addf %27, %32 : vector<504x3xf32>
    %cst = arith.constant 0.000000e+00 : f32
    %34 = vector.broadcast %cst : f32 to vector<504x3xf32>
    %35 = arith.subf %34, %33 : vector<504x3xf32>
    %36 = math.exp %35 : vector<504x3xf32>
    %cst_5 = arith.constant 1.000000e+00 : f32
    %37 = vector.broadcast %cst_5 : f32 to vector<504x3xf32>
    %38 = arith.addf %37, %36 : vector<504x3xf32>
    %39 = tpu.reciprocal %38 : vector<504x3xf32> -> vector<504x3xf32>
    %c0_6 = arith.constant 0 : index
    %c0_7 = arith.constant 0 : index
    %40 = vector.load %arg4[%c0_6, %c0_7] : memref<504x3xf32, #tpu.memory_space<vmem>>, vector<504x3xf32>
    tpu.vector_store %arg4[%c0_6, %c0_7], %39 {strides = array<i32>} : memref<504x3xf32, #tpu.memory_space<vmem>>, vector<504x3xf32>,
    return
  }
  func.func @transform_0(%arg0: i32) -> (i32, i32) {
    %c0_i32 = arith.constant 0 : i32
    %c0_i32_0 = arith.constant 0 : i32
    return %arg0, %c0_i32 : i32, i32
  }
  func.func @transform_1(%arg0: i32) -> (i32, i32) {
    %c0_i32 = arith.constant 0 : i32
    %c0_i32_0 = arith.constant 0 : i32
    %c0_i32_1 = arith.constant 0 : i32
    return %c0_i32, %c0_i32_0 : i32, i32
  }
  func.func @transform_2(%arg0: i32) -> (i32, i32) {
    %c0_i32 = arith.constant 0 : i32
    %c0_i32_0 = arith.constant 0 : i32
    %c0_i32_1 = arith.constant 0 : i32
    return %c0_i32, %c0_i32_0 : i32, i32
  }
  func.func @transform_3(%arg0: i32) -> (i32, i32) {
    %c0_i32 = arith.constant 0 : i32
    %c0_i32_0 = arith.constant 0 : i32
    return %arg0, %c0_i32 : i32, i32
  }
}

</mosaic_0001>

<bundles_post_ra>
// kernel: tpu_custom_call.1
= control target key start
LH: loop header
LB: loop body
LE: loop exit
PB: predicated region body
PF: predicated region fallthrough
CT: control target
= control target key end

     0   :  { %s3632_s12 = smov 0   ;;  %s3634_s13 = smov 0   ;;  %s6392_s0 = inlined_call_operand.vmem [shape: f32[1000,5], index: 0, kind: input, shape index: {}]   ;;  %s6393_s1 = inlined_call_operand.vmem [shape: f32[5,3], index: 1, kind: input, shape index: {}]   ;;  %s6394_s2 = inlined_call_operand.vmem [shape: f32[1,3], index: 2, kind: input, shape index: {}]   ;;  %s6395_s3 = inlined_call_operand.vmem [shape: f32[1000,3], index: 3, kind: output, shape index: {}]  }
   0x1   :  { %s3636_s14 = smov 0  }
   0x2 LB: > { %s3645_s15 = sadd.s32 4294967295, %s3573_s14   ;;  %s3647_s16 = sadd.s32 1, %s3573_s14   ;;  %s3573_s14 = sphi %s3636_s14, %s7091_s14   ;;  %s3569_s13 = sphi %s3634_s13, %s7090_s13   ;;  %s3565_s12 = sphi %s3632_s12, %s7089_s12  }
   0x3   : > { %s85_s17 = ssub.s32 %s3573_s14, %s3647_s16  ;;  %s88_s18 = sadd.s32 1, %s3569_s13 }
   0x4   : > { %p86_p0 = scmp.eq.s32.totalorder %s85_s17, 0  ;;  %p98_p1 = scmp.ne.s32.totalorder %s3569_s13, %s3565_s12 }
   0x5   : > { %p99_p2 = scmp.eq.s32.totalorder %s3645_s15, 1  ;;  %p3083_p3 = scmp.ge.s32.totalorder %s3573_s14, 1 }
   0x6   : > { %s3655_s19 = scalar_select %p86_p0, %s3569_s13, %s88_s18  }
   0x7   : > { %p3657_p4 = por %p99_p2, %p98_p1  ;;  %p146_p5 = scmp.lt.s32.totalorder %s3573_s14, 3 }
   0x9   : > { %p147_p6 = pnand %p3083_p3, %p146_p5 }
   0xb   : > { %150 = sbr.rel (%p147_p6) target bundleno = 922 (0x39a), region = 32 }
  0x12   : > { %s3662_s21 = smul.u32 63, %s3645_s15  ;;  %v3607_v0 = vmov 0   ;;  %vm2551_vm0 = vcmask 23552   ;;  %s170_s4 = sand.u32 1, %s3565_s12  }
  0x13   : > { %3195 = vset.pattern.permute.xlu1 %v3607_v0  ;;  %3194 = vset.pattern.permute.xlu0 %v3607_v0  ;;  %v3608_v0 = vmov 1   ;;  %s5832_s5 = smul.u32 504, %s170_s4 }
  0x14   : > { %p178_p7 = scmp.lt.s32.totalorder %s3662_s21, 124  ;;  %s2623_s7 = ssub.s32 (%p3657_p4), 125, %s3662_s21 }
  0x15   : > { %s5854_s6 = scalar_lea.vmem [#allocation2], %s5832_s5   ;;  %s3098_s8 = smul.u32 (%p3657_p4), 504, %s3645_s15 }
  0x16   : > { %s179_s22 = scalar_select %p178_p7, %s3662_s21, 124 }
  0x17   : > { %p2624_p8 = scmp.lt.s32.totalorder (%p3657_p4), %s2623_s7, 63  ;;  %s6200_s11 = scalar_lea.vmem (%p3657_p4), %s6395_s3, %s3098_s8  }
  0x18   : > { %s3084_s23 = sshll.u32 %s179_s22, 3 }
  0x19   : > { %s3669_s26 = scalar_lea.vmem %s6392_s0, %s3084_s23 }
  0x1a   : > { %v3672_v1 = vld [vmem:[%s3669_s26 + $0x10] sm:$0xff]  ;;  %v3675_v2 = vld [vmem:[%s3669_s26] sm:$0xff]  ;;  %v3680_v3 = vld [vmem:[%s3669_s26 + $0x18] sm:$0xff] }
  0x1b   : > { %6424 = vst [vmem:[#allocation3_spill] sm:$0xff] %v3675_v2  ;;  %268 = vperm.xlu1 %3195, %v3672_v1   ;;  %258 = vperm.xlu0 %3194, %v3675_v2   ;;  %v3683_v4 = vld [vmem:[%s3669_s26 + $0x8] sm:$0xff]  ;;  %v3691_v6 = vld [vmem:[%s3669_s26 + $0x20] sm:$0xff]  ;;  %v3696_v7 = vld [vmem:[%s3669_s26 + $0x38] sm:$0xff] }
  0x1c   : > { %v3688_v5 = vld [vmem:[%s3669_s26 + $0x28] sm:$0xff]  ;;  %v3699_v8 = vld [vmem:[%s3669_s26 + $0x30] sm:$0xff]  ;;  %v3707_v10 = vld [vmem:[%s3669_s26 + $0x40] sm:$0xff] }
  0x1d   : > { %v3704_v9 = vld [vmem:[%s3669_s26 + $0x48] sm:$0xff]  ;;  %v3712_v11 = vld [vmem:[%s3669_s26 + $0x58] sm:$0xff]  ;;  %v3715_v12 = vld [vmem:[%s3669_s26 + $0x50] sm:$0xff] }
  0x1e   : > { %v3720_v13 = vld [vmem:[%s3669_s26 + $0x68] sm:$0xff]  ;;  %v3723_v14 = vld [vmem:[%s3669_s26 + $0x60] sm:$0xff]  ;;  %v3728_v15 = vld [vmem:[%s3669_s26 + $0x78] sm:$0xff] }
  0x1f   : > { %273 = vperm.xlu1 %3195, %v3680_v3   ;;  %263 = vperm.xlu0 %3194, %v3683_v4   ;;  %v3731_v16 = vld [vmem:[%s3669_s26 + $0x70] sm:$0xff]  ;;  %v3736_v17 = vld [vmem:[%s3669_s26 + $0x88] sm:$0xff]  ;;  %v3739_v18 = vld [vmem:[%s3669_s26 + $0x80] sm:$0xff] }
  0x20   : > { %v3744_v19 = vld [vmem:[%s3669_s26 + $0x98] sm:$0xff]  ;;  %v3747_v20 = vld [vmem:[%s3669_s26 + $0x90] sm:$0xff]  ;;  %v3752_v21 = vld [vmem:[%s3669_s26 + $0xa8] sm:$0xff] }
  0x21   : > { %v3755_v22 = vld [vmem:[%s3669_s26 + $0xa0] sm:$0xff]  ;;  %v3760_v23 = vld [vmem:[%s3669_s26 + $0xb8] sm:$0xff]  ;;  %v3763_v24 = vld [vmem:[%s3669_s26 + $0xb0] sm:$0xff] }
  0x22   : > { %v3768_v25 = vld [vmem:[%s3669_s26 + $0xc8] sm:$0xff]  ;;  %v3771_v26 = vld [vmem:[%s3669_s26 + $0xc0] sm:$0xff]  ;;  %v3776_v27 = vld [vmem:[%s3669_s26 + $0xd8] sm:$0xff] }
  0x23   : > { %283 = vperm.xlu1 %3195, %v3688_v5   ;;  %278 = vperm.xlu0 %3194, %v3691_v6   ;;  %v3779_v28 = vld [vmem:[%s3669_s26 + $0xd0] sm:$0xff]  ;;  %v3784_v29 = vld [vmem:[%s3669_s26 + $0xe8] sm:$0xff]  ;;  %v3787_v30 = vld [vmem:[%s3669_s26 + $0xe0] sm:$0xff] }
  0x24   : > { %v3792_v31 = vld [vmem:[%s3669_s26 + $0xf8] sm:$0xff]  ;;  %v3795_v32 = vld [vmem:[%s3669_s26 + $0xf0] sm:$0xff]  ;;  %v3800_v33 = vld [vmem:[%s3669_s26 + $0x108] sm:$0xff] }
  0x25   : > { %v3803_v34 = vld [vmem:[%s3669_s26 + $0x100] sm:$0xff]  ;;  %v3808_v35 = vld [vmem:[%s3669_s26 + $0x118] sm:$0xff]  ;;  %v3811_v36 = vld [vmem:[%s3669_s26 + $0x110] sm:$0xff] }
  0x26   : > { %v3816_v37 = vld [vmem:[%s3669_s26 + $0x128] sm:$0xff]  ;;  %v3819_v38 = vld [vmem:[%s3669_s26 + $0x120] sm:$0xff]  ;;  %v3824_v39 = vld [vmem:[%s3669_s26 + $0x138] sm:$0xff] }
  0x27   : > { %293 = vperm.xlu1 %3195, %v3696_v7   ;;  %288 = vperm.xlu0 %3194, %v3699_v8   ;;  %v3827_v40 = vld [vmem:[%s3669_s26 + $0x130] sm:$0xff]  ;;  %v3832_v41 = vld [vmem:[%s3669_s26 + $0x148] sm:$0xff]  ;;  %v3835_v42 = vld [vmem:[%s3669_s26 + $0x140] sm:$0xff] }
  0x28   : > { %v3840_v43 = vld [vmem:[%s3669_s26 + $0x158] sm:$0xff]  ;;  %v3843_v44 = vld [vmem:[%s3669_s26 + $0x150] sm:$0xff]  ;;  %v3848_v45 = vld [vmem:[%s3669_s26 + $0x168] sm:$0xff] }
  0x29   : > { %v3851_v46 = vld [vmem:[%s3669_s26 + $0x160] sm:$0xff]  ;;  %v3856_v47 = vld [vmem:[%s3669_s26 + $0x178] sm:$0xff]  ;;  %v3859_v48 = vld [vmem:[%s3669_s26 + $0x170] sm:$0xff] }
  0x2a   : > { %6425 = vst [vmem:[#allocation4_spill] sm:$0xff] %v3856_v47  ;;  %v3864_v49 = vld [vmem:[%s3669_s26 + $0x188] sm:$0xff]  ;;  %v3867_v50 = vld [vmem:[%s3669_s26 + $0x180] sm:$0xff]  ;;  %v3872_v51 = vld [vmem:[%s3669_s26 + $0x198] sm:$0xff] }
  0x2b   : > { %303 = vperm.xlu1 %3195, %v3704_v9   ;;  %298 = vperm.xlu0 %3194, %v3707_v10   ;;  %6426 = vst [vmem:[#allocation5_spill] sm:$0xff] %v3864_v49  ;;  %6427 = vst [vmem:[#allocation6_spill] sm:$0xff] %v3872_v51  ;;  %v3875_v52 = vld [vmem:[%s3669_s26 + $0x190] sm:$0xff]  ;;  %v3880_v53 = vld [vmem:[%s3669_s26 + $0x1a8] sm:$0xff] }
  0x2c   : > { %6428 = vst [vmem:[#allocation7_spill] sm:$0xff] %v3880_v53  ;;  %v3883_v54 = vld [vmem:[%s3669_s26 + $0x1a0] sm:$0xff]  ;;  %v3888_v55 = vld [vmem:[%s3669_s26 + $0x1b8] sm:$0xff]  ;;  %v3891_v56 = vld [vmem:[%s3669_s26 + $0x1b0] sm:$0xff] }
  0x2d   : > { %6429 = vst [vmem:[#allocation8_spill] sm:$0xff] %v3883_v54  ;;  %6430 = vst [vmem:[#allocation9_spill] sm:$0xff] %v3888_v55  ;;  %v3896_v57 = vld [vmem:[%s3669_s26 + $0x1c8] sm:$0xff]  ;;  %v3899_v58 = vld [vmem:[%s3669_s26 + $0x1c0] sm:$0xff] }
  0x2e   : > { %6431 = vst [vmem:[#allocation10_spill] sm:$0xff] %v3891_v56  ;;  %6432 = vst [vmem:[#allocation11_spill] sm:$0xff] %v3896_v57  ;;  %v3904_v59 = vld [vmem:[%s3669_s26 + $0x1d8] sm:$0xff]  ;;  %v3907_v60 = vld [vmem:[%s3669_s26 + $0x1d0] sm:$0xff] }
  0x2f   : > { %313 = vperm.xlu1 %3195, %v3712_v11   ;;  %308 = vperm.xlu0 %3194, %v3715_v12   ;;  %6433 = vst [vmem:[#allocation12_spill] sm:$0xff] %v3899_v58  ;;  %6434 = vst [vmem:[#allocation13_spill] sm:$0xff] %v3904_v59  ;;  %v3912_v61 = vld [vmem:[%s3669_s26 + $0x1e8] sm:$0xff]  ;;  %v3915_v62 = vld [vmem:[%s3669_s26 + $0x1e0] sm:$0xff] }
  0x30   : > { %6435 = vst [vmem:[#allocation14_spill] sm:$0xff] %v3907_v60  ;;  %6436 = vst [vmem:[#allocation15_spill] sm:$0xff] %v3912_v61  ;;  %v3920_v63 = vld [vmem:[%s3669_s26 + $0x1f0] sm:$0xff] }
  0x31   : > { %6437 = vst [vmem:[#allocation16_spill] sm:$0xff] %v3915_v62  ;;  %6438 = vst [vmem:[#allocation17_spill] sm:$0xff] %v3920_v63 }
  0x33   : > { %323 = vperm.xlu1 %3195, %v3720_v13   ;;  %318 = vperm.xlu0 %3194, %v3723_v14  }
  0x37   : > { %333 = vperm.xlu1 %3195, %v3728_v15   ;;  %328 = vperm.xlu0 %3194, %v3731_v16  }
  0x3b   : > { %343 = vperm.xlu1 %3195, %v3736_v17   ;;  %338 = vperm.xlu0 %3194, %v3739_v18  }
  0x3f   : > { %353 = vperm.xlu1 %3195, %v3744_v19   ;;  %348 = vperm.xlu0 %3194, %v3747_v20  }
  0x43   : > { %363 = vperm.xlu1 %3195, %v3752_v21   ;;  %358 = vperm.xlu0 %3194, %v3755_v22  }
  0x47   : > { %373 = vperm.xlu1 %3195, %v3760_v23   ;;  %368 = vperm.xlu0 %3194, %v3763_v24  }
  0x4b   : > { %383 = vperm.xlu1 %3195, %v3768_v25   ;;  %378 = vperm.xlu0 %3194, %v3771_v26  }
  0x4f   : > { %393 = vperm.xlu1 %3195, %v3776_v27   ;;  %388 = vperm.xlu0 %3194, %v3779_v28  }
  0x53   : > { %403 = vperm.xlu1 %3195, %v3784_v29   ;;  %398 = vperm.xlu0 %3194, %v3787_v30  }
  0x57   : > { %413 = vperm.xlu1 %3195, %v3792_v31   ;;  %408 = vperm.xlu0 %3194, %v3795_v32  }
  0x5b   : > { %423 = vperm.xlu1 %3195, %v3800_v33   ;;  %418 = vperm.xlu0 %3194, %v3803_v34  }
  0x5f   : > { %433 = vperm.xlu1 %3195, %v3808_v35   ;;  %428 = vperm.xlu0 %3194, %v3811_v36  }
  0x63   : > { %443 = vperm.xlu1 %3195, %v3816_v37   ;;  %438 = vperm.xlu0 %3194, %v3819_v38  }
  0x67   : > { %453 = vperm.xlu1 %3195, %v3824_v39   ;;  %448 = vperm.xlu0 %3194, %v3827_v40  }
  0x6b   : > { %463 = vperm.xlu1 %3195, %v3832_v41   ;;  %458 = vperm.xlu0 %3194, %v3835_v42  }
  0x6f   : > { %473 = vperm.xlu1 %3195, %v3840_v43   ;;  %468 = vperm.xlu0 %3194, %v3843_v44  }
  0x73   : > { %483 = vperm.xlu1 %3195, %v3848_v45   ;;  %478 = vperm.xlu0 %3194, %v3851_v46  }
  0x77   : > { %493 = vperm.xlu1 %3195, %v3856_v47   ;;  %488 = vperm.xlu0 %3194, %v3859_v48  }
  0x7b   : > { %503 = vperm.xlu1 %3195, %v3864_v49   ;;  %498 = vperm.xlu0 %3194, %v3867_v50  }
  0x7f   : > { %513 = vperm.xlu1 %3195, %v3872_v51   ;;  %508 = vperm.xlu0 %3194, %v3875_v52  }
  0x83   : > { %523 = vperm.xlu1 %3195, %v3880_v53   ;;  %518 = vperm.xlu0 %3194, %v3883_v54  }
  0x87   : > { %533 = vperm.xlu1 %3195, %v3888_v55   ;;  %528 = vperm.xlu0 %3194, %v3891_v56  }
  0x8b   : > { %543 = vperm.xlu1 %3195, %v3896_v57   ;;  %538 = vperm.xlu0 %3194, %v3899_v58  }
  0x8f   : > { %553 = vperm.xlu1 %3195, %v3904_v59   ;;  %548 = vperm.xlu0 %3194, %v3907_v60  }
  0x93   : > { %563 = vperm.xlu1 %3195, %v3912_v61   ;;  %558 = vperm.xlu0 %3194, %v3915_v62  }
  0x97   : > { %3196 = vset.pattern.permute.xlu1 %v3608_v0  ;;  %568 = vperm.xlu0 %3194, %v3920_v63  }
  0x98   : > { %709 = vperm.xlu1 %3196, %v3675_v2  }
  0x9a   : > { %v3924_v57 = vpop.permute.xlu1 %268  ;;  %v3926_v59 = vpop.permute.xlu0 %258 }
  0x9b   : > { %6439 = vst [vmem:[#allocation18_spill] sm:$0xff] %v3924_v57  ;;  %6440 = vst [vmem:[#allocation19_spill] sm:$0xff] %v3926_v59  ;;  %3197 = vset.pattern.permute.xlu0 %v3608_v0  ;;  %v6497_v57 = vld [vmem:[#allocation11_spill] sm:$0xff] }
  0x9c   : > { %717 = vperm.xlu1 %3196, %v3672_v1   ;;  %713 = vperm.xlu0 %3197, %v3683_v4  }
  0x9e   : > { %v3930_v61 = vpop.permute.xlu1 %273  ;;  %v3932_v62 = vpop.permute.xlu0 %263 }
  0x9f   : > { %6441 = vst [vmem:[#allocation20_spill] sm:$0xff] %v3930_v61  ;;  %6442 = vst [vmem:[#allocation21_spill] sm:$0xff] %v3932_v62 }
  0xa0   : > { %721 = vperm.xlu1 %3196, %v3680_v3   ;;  %725 = vperm.xlu0 %3197, %v3691_v6  }
  0xa2   : > { %v3936_v63 = vpop.permute.xlu1 %283  ;;  %v3938_v2 = vpop.permute.xlu0 %278 }
  0xa3   : > { %6443 = vst [vmem:[#allocation22_spill] sm:$0xff] %v3936_v63  ;;  %6444 = vst [vmem:[#allocation23_spill] sm:$0xff] %v3938_v2 }
  0xa4   : > { %729 = vperm.xlu1 %3196, %v3688_v5   ;;  %733 = vperm.xlu0 %3197, %v3699_v8  }
  0xa6   : > { %v3942_v0 = vpop.permute.xlu1 %293  ;;  %v3944_v59 = vpop.permute.xlu0 %288 }
  0xa7   : > { %6445 = vst [vmem:[#allocation24_spill] sm:$0xff] %v3942_v0  ;;  %6446 = vst [vmem:[#allocation25_spill] sm:$0xff] %v3944_v59 }
  0xa8   : > { %737 = vperm.xlu1 %3196, %v3696_v7   ;;  %741 = vperm.xlu0 %3197, %v3707_v10  }
  0xaa   : > { %v3948_v62 = vpop.permute.xlu1 %303  ;;  %v3950_v61 = vpop.permute.xlu0 %298 }
  0xab   : > { %6447 = vst [vmem:[#allocation26_spill] sm:$0xff] %v3948_v62  ;;  %6448 = vst [vmem:[#allocation27_spill] sm:$0xff] %v3950_v61 }
  0xac   : > { %745 = vperm.xlu1 %3196, %v3704_v9   ;;  %749 = vperm.xlu0 %3197, %v3715_v12  }
  0xae   : > { %v3954_v2 = vpop.permute.xlu1 %313  ;;  %v3956_v63 = vpop.permute.xlu0 %308 }
  0xaf   : > { %6449 = vst [vmem:[#allocation28_spill] sm:$0xff] %v3954_v2  ;;  %6450 = vst [vmem:[#allocation29_spill] sm:$0xff] %v3956_v63 }
  0xb0   : > { %753 = vperm.xlu1 %3196, %v3712_v11   ;;  %757 = vperm.xlu0 %3197, %v3723_v14  }
  0xb2   : > { %v3960_v59 = vpop.permute.xlu1 %323  ;;  %v3962_v0 = vpop.permute.xlu0 %318 }
  0xb3   : > { %6451 = vst [vmem:[#allocation30_spill] sm:$0xff] %v3960_v59  ;;  %6452 = vst [vmem:[#allocation31_spill] sm:$0xff] %v3962_v0 }
  0xb4   : > { %761 = vperm.xlu1 %3196, %v3720_v13   ;;  %765 = vperm.xlu0 %3197, %v3731_v16  }
  0xb6   : > { %v3966_v61 = vpop.permute.xlu1 %333  ;;  %v3968_v62 = vpop.permute.xlu0 %328 }
  0xb7   : > { %6453 = vst [vmem:[#allocation32_spill] sm:$0xff] %v3966_v61  ;;  %6454 = vst [vmem:[#allocation33_spill] sm:$0xff] %v3968_v62 }
  0xb8   : > { %769 = vperm.xlu1 %3196, %v3728_v15   ;;  %773 = vperm.xlu0 %3197, %v3739_v18  }
  0xba   : > { %v3972_v63 = vpop.permute.xlu1 %343  ;;  %v3974_v2 = vpop.permute.xlu0 %338 }
  0xbb   : > { %6455 = vst [vmem:[#allocation34_spill] sm:$0xff] %v3972_v63  ;;  %6456 = vst [vmem:[#allocation35_spill] sm:$0xff] %v3974_v2 }
  0xbc   : > { %777 = vperm.xlu1 %3196, %v3736_v17   ;;  %781 = vperm.xlu0 %3197, %v3747_v20  }
  0xbe   : > { %v3978_v0 = vpop.permute.xlu1 %353  ;;  %v3980_v59 = vpop.permute.xlu0 %348 }
  0xbf   : > { %6457 = vst [vmem:[#allocation36_spill] sm:$0xff] %v3978_v0  ;;  %6458 = vst [vmem:[#allocation37_spill] sm:$0xff] %v3980_v59 }
  0xc0   : > { %785 = vperm.xlu1 %3196, %v3744_v19   ;;  %789 = vperm.xlu0 %3197, %v3755_v22  }
  0xc2   : > { %v3984_v62 = vpop.permute.xlu1 %363  ;;  %v3986_v61 = vpop.permute.xlu0 %358 }
  0xc3   : > { %6459 = vst [vmem:[#allocation38_spill] sm:$0xff] %v3984_v62  ;;  %6460 = vst [vmem:[#allocation39_spill] sm:$0xff] %v3986_v61 }
  0xc4   : > { %793 = vperm.xlu1 %3196, %v3752_v21   ;;  %797 = vperm.xlu0 %3197, %v3763_v24  }
  0xc6   : > { %v3990_v2 = vpop.permute.xlu1 %373  ;;  %v3992_v63 = vpop.permute.xlu0 %368 }
  0xc7   : > { %6461 = vst [vmem:[#allocation40_spill] sm:$0xff] %v3990_v2  ;;  %6462 = vst [vmem:[#allocation41_spill] sm:$0xff] %v3992_v63 }
  0xc8   : > { %801 = vperm.xlu1 %3196, %v3760_v23   ;;  %805 = vperm.xlu0 %3197, %v3771_v26  }
  0xca   : > { %v3996_v59 = vpop.permute.xlu1 %383  ;;  %v3998_v0 = vpop.permute.xlu0 %378 }
  0xcb   : > { %6463 = vst [vmem:[#allocation42_spill] sm:$0xff] %v3996_v59  ;;  %6464 = vst [vmem:[#allocation43_spill] sm:$0xff] %v3998_v0 }
  0xcc   : > { %809 = vperm.xlu1 %3196, %v3768_v25   ;;  %813 = vperm.xlu0 %3197, %v3779_v28  }
  0xce   : > { %v4002_v61 = vpop.permute.xlu1 %393  ;;  %v4004_v62 = vpop.permute.xlu0 %388 }
  0xcf   : > { %6465 = vst [vmem:[#allocation44_spill] sm:$0xff] %v4002_v61  ;;  %6466 = vst [vmem:[#allocation45_spill] sm:$0xff] %v4004_v62 }
  0xd0   : > { %817 = vperm.xlu1 %3196, %v3776_v27   ;;  %821 = vperm.xlu0 %3197, %v3787_v30  }
  0xd2   : > { %v4008_v63 = vpop.permute.xlu1 %403  ;;  %v4010_v2 = vpop.permute.xlu0 %398 }
  0xd3   : > { %6467 = vst [vmem:[#allocation46_spill] sm:$0xff] %v4008_v63  ;;  %6468 = vst [vmem:[#allocation47_spill] sm:$0xff] %v4010_v2 }
  0xd4   : > { %825 = vperm.xlu1 %3196, %v3784_v29   ;;  %829 = vperm.xlu0 %3197, %v3795_v32  }
  0xd6   : > { %v4014_v0 = vpop.permute.xlu1 %413  ;;  %v4016_v59 = vpop.permute.xlu0 %408 }
  0xd7   : > { %6469 = vst [vmem:[#allocation48_spill] sm:$0xff] %v4014_v0  ;;  %6470 = vst [vmem:[#allocation49_spill] sm:$0xff] %v4016_v59 }
  0xd8   : > { %833 = vperm.xlu1 %3196, %v3792_v31   ;;  %837 = vperm.xlu0 %3197, %v3803_v34  }
  0xda   : > { %v4020_v62 = vpop.permute.xlu1 %423  ;;  %v4022_v61 = vpop.permute.xlu0 %418 }
  0xdb   : > { %6471 = vst [vmem:[#allocation50_spill] sm:$0xff] %v4020_v62  ;;  %6472 = vst [vmem:[#allocation51_spill] sm:$0xff] %v4022_v61 }
  0xdc   : > { %841 = vperm.xlu1 %3196, %v3800_v33   ;;  %845 = vperm.xlu0 %3197, %v3811_v36  }
  0xde   : > { %v4026_v2 = vpop.permute.xlu1 %433  ;;  %v4028_v63 = vpop.permute.xlu0 %428 }
  0xdf   : > { %6473 = vst [vmem:[#allocation52_spill] sm:$0xff] %v4026_v2  ;;  %6474 = vst [vmem:[#allocation53_spill] sm:$0xff] %v4028_v63 }
  0xe0   : > { %849 = vperm.xlu1 %3196, %v3808_v35   ;;  %853 = vperm.xlu0 %3197, %v3819_v38  }
  0xe2   : > { %v4032_v59 = vpop.permute.xlu1 %443  ;;  %v4034_v0 = vpop.permute.xlu0 %438 }
  0xe3   : > { %6475 = vst [vmem:[#allocation54_spill] sm:$0xff] %v4032_v59  ;;  %6476 = vst [vmem:[#allocation55_spill] sm:$0xff] %v4034_v0 }
  0xe4   : > { %857 = vperm.xlu1 %3196, %v3816_v37   ;;  %861 = vperm.xlu0 %3197, %v3827_v40  }
  0xe6   : > { %v4038_v61 = vpop.permute.xlu1 %453  ;;  %v4040_v62 = vpop.permute.xlu0 %448 }
  0xe7   : > { %6477 = vst [vmem:[#allocation56_spill] sm:$0xff] %v4038_v61  ;;  %6478 = vst [vmem:[#allocation57_spill] sm:$0xff] %v4040_v62 }
  0xe8   : > { %865 = vperm.xlu1 %3196, %v3824_v39   ;;  %869 = vperm.xlu0 %3197, %v3835_v42  }
  0xea   : > { %v4044_v63 = vpop.permute.xlu1 %463  ;;  %v4046_v2 = vpop.permute.xlu0 %458 }
  0xeb   : > { %6479 = vst [vmem:[#allocation58_spill] sm:$0xff] %v4044_v63  ;;  %6480 = vst [vmem:[#allocation59_spill] sm:$0xff] %v4046_v2 }
  0xec   : > { %873 = vperm.xlu1 %3196, %v3832_v41   ;;  %877 = vperm.xlu0 %3197, %v3843_v44  }
  0xee   : > { %v4050_v0 = vpop.permute.xlu1 %473  ;;  %v4052_v59 = vpop.permute.xlu0 %468 }
  0xef   : > { %6481 = vst [vmem:[#allocation60_spill] sm:$0xff] %v4050_v0  ;;  %6482 = vst [vmem:[#allocation61_spill] sm:$0xff] %v4052_v59 }
  0xf0   : > { %881 = vperm.xlu1 %3196, %v3840_v43   ;;  %885 = vperm.xlu0 %3197, %v3851_v46  }
  0xf2   : > { %v4056_v62 = vpop.permute.xlu1 %483  ;;  %v4058_v61 = vpop.permute.xlu0 %478 }
  0xf3   : > { %6483 = vst [vmem:[#allocation62_spill] sm:$0xff] %v4056_v62  ;;  %6484 = vst [vmem:[#allocation63_spill] sm:$0xff] %v4058_v61 }
  0xf4   : > { %889 = vperm.xlu1 %3196, %v3848_v45   ;;  %893 = vperm.xlu0 %3197, %v3859_v48  }
  0xf6   : > { %v4062_v2 = vpop.permute.xlu1 %493  ;;  %v4064_v63 = vpop.permute.xlu0 %488 }
  0xf7   : > { %6485 = vst [vmem:[#allocation64_spill] sm:$0xff] %v4062_v2  ;;  %6486 = vst [vmem:[#allocation65_spill] sm:$0xff] %v4064_v63 }
  0xf8   : > { %897 = vperm.xlu1 %3196, %v3856_v47   ;;  %901 = vperm.xlu0 %3197, %v3867_v50  }
  0xfa   : > { %v4068_v59 = vpop.permute.xlu1 %503  ;;  %v4070_v0 = vpop.permute.xlu0 %498 }
  0xfb   : > { %6487 = vst [vmem:[#allocation66_spill] sm:$0xff] %v4068_v59  ;;  %6488 = vst [vmem:[#allocation67_spill] sm:$0xff] %v4070_v0 }
  0xfc   : > { %905 = vperm.xlu1 %3196, %v3864_v49   ;;  %909 = vperm.xlu0 %3197, %v3875_v52  }
  0xfe   : > { %v4074_v61 = vpop.permute.xlu1 %513  ;;  %v4076_v62 = vpop.permute.xlu0 %508 }
  0xff   : > { %6489 = vst [vmem:[#allocation68_spill] sm:$0xff] %v4074_v61  ;;  %6490 = vst [vmem:[#allocation69_spill] sm:$0xff] %v4076_v62 }
 0x100   : > { %913 = vperm.xlu1 %3196, %v3872_v51   ;;  %917 = vperm.xlu0 %3197, %v3883_v54  }
 0x102   : > { %v4080_v63 = vpop.permute.xlu1 %523  ;;  %v4082_v2 = vpop.permute.xlu0 %518 }
 0x103   : > { %6491 = vst [vmem:[#allocation70_spill] sm:$0xff] %v4080_v63  ;;  %6492 = vst [vmem:[#allocation71_spill] sm:$0xff] %v4082_v2 }
 0x104   : > { %921 = vperm.xlu1 %3196, %v3880_v53   ;;  %925 = vperm.xlu0 %3197, %v3891_v56   ;;  %v6500_v53 = vld [vmem:[#allocation13_spill] sm:$0xff] }
 0x106   : > { %v4086_v0 = vpop.permute.xlu1 %533  ;;  %v4088_v59 = vpop.permute.xlu0 %528 }
 0x107   : > { %6493 = vst [vmem:[#allocation72_spill] sm:$0xff] %v4086_v0  ;;  %6494 = vst [vmem:[#allocation73_spill] sm:$0xff] %v4088_v59  ;;  %v6501_v0 = vld [vmem:[#allocation16_spill] sm:$0xff] }
 0x108   : > { %929 = vperm.xlu1 %3196, %v3888_v55   ;;  %933 = vperm.xlu0 %3197, %v3899_v58   ;;  %v6504_v58 = vld [vmem:[#allocation15_spill] sm:$0xff] }
 0x10a   : > { %v4092_v62 = vpop.permute.xlu1 %543  ;;  %v4094_v61 = vpop.permute.xlu0 %538 }
 0x10b   : > { %6495 = vst [vmem:[#allocation74_spill] sm:$0xff] %v4092_v62  ;;  %6496 = vst [vmem:[#allocation75_spill] sm:$0xff] %v4094_v61  ;;  %v6505_v62 = vld [vmem:[#allocation17_spill] sm:$0xff] }
 0x10c   : > { %937 = vperm.xlu1 %3196, %v6497_v57   ;;  %941 = vperm.xlu0 %3197, %v3907_v60   ;;  %v3609_v60 = vmov 2  }
 0x10e   : > { %v4098_v2 = vpop.permute.xlu1 %553  ;;  %v4100_v63 = vpop.permute.xlu0 %548 }
 0x10f   : > { %6498 = vst [vmem:[#allocation76_spill] sm:$0xff] %v4098_v2  ;;  %6499 = vst [vmem:[#allocation77_spill] sm:$0xff] %v4100_v63  ;;  %v6508_v63 = vld [vmem:[#allocation3_spill] sm:$0xff] }
 0x110   : > { %945 = vperm.xlu1 %3196, %v6500_v53   ;;  %949 = vperm.xlu0 %3197, %v6501_v0  }
 0x112   : > { %v4104_v59 = vpop.permute.xlu1 %563  ;;  %v4106_v55 = vpop.permute.xlu0 %558 }
 0x113   : > { %6502 = vst [vmem:[#allocation13_spill] sm:$0xff] %v4104_v59  ;;  %6503 = vst [vmem:[#allocation16_spill] sm:$0xff] %v4106_v55 }
 0x114   : > { %953 = vperm.xlu1 %3196, %v6504_v58   ;;  %957 = vperm.xlu0 %3197, %v6505_v62  }
 0x116   : > { %v4110_v61 = vpop.permute.xlu0 %568 }
 0x117   : > { %6506 = vst [vmem:[#allocation15_spill] sm:$0xff] %v4110_v61  ;;  %v4112_v57 = vpop.permute.xlu1 %709 }
 0x118   : > { %6507 = vst [vmem:[#allocation17_spill] sm:$0xff] %v4112_v57  ;;  %3198 = vset.pattern.permute.xlu1 %v3609_v60  ;;  %3199 = vset.pattern.permute.xlu0 %v3609_v60 }
 0x119   : > { %1091 = vperm.xlu1 %3198, %v6508_v63   ;;  %1095 = vperm.xlu0 %3199, %v3683_v4  }
 0x11b   : > { %v4116_v2 = vpop.permute.xlu1 %717  ;;  %v4118_v59 = vpop.permute.xlu0 %713 }
 0x11c   : > { %6509 = vst [vmem:[#allocation3_spill] sm:$0xff] %v4116_v2  ;;  %6510 = vst [vmem:[#allocation78_spill] sm:$0xff] %v4118_v59 }
 0x11d   : > { %1099 = vperm.xlu1 %3198, %v3672_v1   ;;  %1107 = vperm.xlu0 %3199, %v3691_v6  }
 0x11f   : > { %v4122_v55 = vpop.permute.xlu1 %721  ;;  %v4124_v61 = vpop.permute.xlu0 %725 }
 0x120   : > { %6511 = vst [vmem:[#allocation79_spill] sm:$0xff] %v4122_v55  ;;  %6512 = vst [vmem:[#allocation80_spill] sm:$0xff] %v4124_v61 }
 0x121   : > { %1103 = vperm.xlu1 %3198, %v3680_v3   ;;  %1115 = vperm.xlu0 %3199, %v3699_v8  }
 0x123   : > { %v4128_v60 = vpop.permute.xlu1 %729  ;;  %v4130_v57 = vpop.permute.xlu0 %733 }
 0x124   : > { %6513 = vst [vmem:[#allocation81_spill] sm:$0xff] %v4128_v60  ;;  %6514 = vst [vmem:[#allocation82_spill] sm:$0xff] %v4130_v57 }
 0x125   : > { %1111 = vperm.xlu1 %3198, %v3688_v5   ;;  %1123 = vperm.xlu0 %3199, %v3707_v10  }
 0x127   : > { %v4134_v59 = vpop.permute.xlu1 %737  ;;  %v4136_v2 = vpop.permute.xlu0 %741 }
 0x128   : > { %6515 = vst [vmem:[#allocation83_spill] sm:$0xff] %v4134_v59  ;;  %6516 = vst [vmem:[#allocation84_spill] sm:$0xff] %v4136_v2 }
 0x129   : > { %1119 = vperm.xlu1 %3198, %v3696_v7   ;;  %1131 = vperm.xlu0 %3199, %v3715_v12  }
 0x12b   : > { %v4140_v61 = vpop.permute.xlu1 %745  ;;  %v4142_v55 = vpop.permute.xlu0 %749 }
 0x12c   : > { %6517 = vst [vmem:[#allocation85_spill] sm:$0xff] %v4140_v61  ;;  %6518 = vst [vmem:[#allocation86_spill] sm:$0xff] %v4142_v55 }
 0x12d   : > { %1127 = vperm.xlu1 %3198, %v3704_v9   ;;  %1139 = vperm.xlu0 %3199, %v3723_v14  }
 0x12f   : > { %v4146_v57 = vpop.permute.xlu1 %753  ;;  %v4148_v60 = vpop.permute.xlu0 %757 }
 0x130   : > { %6519 = vst [vmem:[#allocation87_spill] sm:$0xff] %v4146_v57  ;;  %6520 = vst [vmem:[#allocation88_spill] sm:$0xff] %v4148_v60 }
 0x131   : > { %1135 = vperm.xlu1 %3198, %v3712_v11   ;;  %1147 = vperm.xlu0 %3199, %v3731_v16  }
 0x133   : > { %v4152_v2 = vpop.permute.xlu1 %761  ;;  %v4154_v59 = vpop.permute.xlu0 %765 }
 0x134   : > { %6521 = vst [vmem:[#allocation89_spill] sm:$0xff] %v4152_v2  ;;  %6522 = vst [vmem:[#allocation90_spill] sm:$0xff] %v4154_v59 }
 0x135   : > { %1143 = vperm.xlu1 %3198, %v3720_v13   ;;  %1155 = vperm.xlu0 %3199, %v3739_v18  }
 0x137   : > { %v4158_v55 = vpop.permute.xlu1 %769  ;;  %v4160_v61 = vpop.permute.xlu0 %773 }
 0x138   : > { %6523 = vst [vmem:[#allocation91_spill] sm:$0xff] %v4158_v55  ;;  %6524 = vst [vmem:[#allocation92_spill] sm:$0xff] %v4160_v61 }
 0x139   : > { %1151 = vperm.xlu1 %3198, %v3728_v15   ;;  %1163 = vperm.xlu0 %3199, %v3747_v20  }
 0x13b   : > { %v4164_v60 = vpop.permute.xlu1 %777  ;;  %v4166_v57 = vpop.permute.xlu0 %781 }
 0x13c   : > { %6525 = vst [vmem:[#allocation93_spill] sm:$0xff] %v4164_v60  ;;  %6526 = vst [vmem:[#allocation94_spill] sm:$0xff] %v4166_v57 }
 0x13d   : > { %1159 = vperm.xlu1 %3198, %v3736_v17   ;;  %1171 = vperm.xlu0 %3199, %v3755_v22  }
 0x13f   : > { %v4170_v59 = vpop.permute.xlu1 %785  ;;  %v4172_v2 = vpop.permute.xlu0 %789 }
 0x140   : > { %6527 = vst [vmem:[#allocation95_spill] sm:$0xff] %v4170_v59  ;;  %6528 = vst [vmem:[#allocation96_spill] sm:$0xff] %v4172_v2 }
 0x141   : > { %1167 = vperm.xlu1 %3198, %v3744_v19   ;;  %1179 = vperm.xlu0 %3199, %v3763_v24  }
 0x143   : > { %v4176_v61 = vpop.permute.xlu1 %793  ;;  %v4178_v55 = vpop.permute.xlu0 %797 }
 0x144   : > { %6529 = vst [vmem:[#allocation97_spill] sm:$0xff] %v4176_v61  ;;  %6530 = vst [vmem:[#allocation98_spill] sm:$0xff] %v4178_v55 }
 0x145   : > { %1175 = vperm.xlu1 %3198, %v3752_v21   ;;  %1187 = vperm.xlu0 %3199, %v3771_v26  }
 0x147   : > { %v4182_v57 = vpop.permute.xlu1 %801  ;;  %v4184_v60 = vpop.permute.xlu0 %805 }
 0x148   : > { %6531 = vst [vmem:[#allocation99_spill] sm:$0xff] %v4182_v57  ;;  %6532 = vst [vmem:[#allocation100_spill] sm:$0xff] %v4184_v60 }
 0x149   : > { %1183 = vperm.xlu1 %3198, %v3760_v23   ;;  %1195 = vperm.xlu0 %3199, %v3779_v28  }
 0x14b   : > { %v4188_v2 = vpop.permute.xlu1 %809  ;;  %v4190_v59 = vpop.permute.xlu0 %813 }
 0x14c   : > { %6533 = vst [vmem:[#allocation101_spill] sm:$0xff] %v4188_v2  ;;  %6534 = vst [vmem:[#allocation102_spill] sm:$0xff] %v4190_v59 }
 0x14d   : > { %1191 = vperm.xlu1 %3198, %v3768_v25   ;;  %1203 = vperm.xlu0 %3199, %v3787_v30  }
 0x14f   : > { %v4194_v55 = vpop.permute.xlu1 %817  ;;  %v4196_v61 = vpop.permute.xlu0 %821 }
 0x150   : > { %6535 = vst [vmem:[#allocation103_spill] sm:$0xff] %v4194_v55  ;;  %6536 = vst [vmem:[#allocation104_spill] sm:$0xff] %v4196_v61 }
 0x151   : > { %1199 = vperm.xlu1 %3198, %v3776_v27   ;;  %1211 = vperm.xlu0 %3199, %v3795_v32  }
 0x153   : > { %v4200_v60 = vpop.permute.xlu1 %825  ;;  %v4202_v57 = vpop.permute.xlu0 %829 }
 0x154   : > { %6537 = vst [vmem:[#allocation105_spill] sm:$0xff] %v4200_v60  ;;  %6538 = vst [vmem:[#allocation106_spill] sm:$0xff] %v4202_v57 }
 0x155   : > { %1207 = vperm.xlu1 %3198, %v3784_v29   ;;  %1219 = vperm.xlu0 %3199, %v3803_v34  }
 0x157   : > { %v4206_v59 = vpop.permute.xlu1 %833  ;;  %v4208_v2 = vpop.permute.xlu0 %837 }
 0x158   : > { %6539 = vst [vmem:[#allocation107_spill] sm:$0xff] %v4206_v59  ;;  %6540 = vst [vmem:[#allocation108_spill] sm:$0xff] %v4208_v2 }
 0x159   : > { %1215 = vperm.xlu1 %3198, %v3792_v31   ;;  %1227 = vperm.xlu0 %3199, %v3811_v36  }
 0x15b   : > { %v4212_v61 = vpop.permute.xlu1 %841  ;;  %v4214_v55 = vpop.permute.xlu0 %845 }
 0x15c   : > { %6541 = vst [vmem:[#allocation109_spill] sm:$0xff] %v4212_v61  ;;  %6542 = vst [vmem:[#allocation110_spill] sm:$0xff] %v4214_v55 }
 0x15d   : > { %1223 = vperm.xlu1 %3198, %v3800_v33   ;;  %1235 = vperm.xlu0 %3199, %v3819_v38  }
 0x15f   : > { %v4218_v57 = vpop.permute.xlu1 %849  ;;  %v4220_v60 = vpop.permute.xlu0 %853 }
 0x160   : > { %6543 = vst [vmem:[#allocation111_spill] sm:$0xff] %v4218_v57  ;;  %6544 = vst [vmem:[#allocation112_spill] sm:$0xff] %v4220_v60 }
 0x161   : > { %1231 = vperm.xlu1 %3198, %v3808_v35   ;;  %1243 = vperm.xlu0 %3199, %v3827_v40  }
 0x163   : > { %v4224_v2 = vpop.permute.xlu1 %857  ;;  %v4226_v59 = vpop.permute.xlu0 %861 }
 0x164   : > { %6545 = vst [vmem:[#allocation113_spill] sm:$0xff] %v4224_v2  ;;  %6546 = vst [vmem:[#allocation114_spill] sm:$0xff] %v4226_v59 }
 0x165   : > { %1239 = vperm.xlu1 %3198, %v3816_v37   ;;  %1251 = vperm.xlu0 %3199, %v3835_v42  }
 0x167   : > { %v4230_v55 = vpop.permute.xlu1 %865  ;;  %v4232_v61 = vpop.permute.xlu0 %869 }
 0x168   : > { %6547 = vst [vmem:[#allocation115_spill] sm:$0xff] %v4230_v55  ;;  %6548 = vst [vmem:[#allocation116_spill] sm:$0xff] %v4232_v61 }
 0x169   : > { %1247 = vperm.xlu1 %3198, %v3824_v39   ;;  %1259 = vperm.xlu0 %3199, %v3843_v44  }
 0x16b   : > { %v4236_v60 = vpop.permute.xlu1 %873  ;;  %v4238_v57 = vpop.permute.xlu0 %877 }
 0x16c   : > { %6549 = vst [vmem:[#allocation117_spill] sm:$0xff] %v4236_v60  ;;  %6550 = vst [vmem:[#allocation118_spill] sm:$0xff] %v4238_v57 }
 0x16d   : > { %1255 = vperm.xlu1 %3198, %v3832_v41   ;;  %1267 = vperm.xlu0 %3199, %v3851_v46  }
 0x16f   : > { %v4242_v59 = vpop.permute.xlu1 %881  ;;  %v4244_v2 = vpop.permute.xlu0 %885 }
 0x170   : > { %6551 = vst [vmem:[#allocation119_spill] sm:$0xff] %v4242_v59  ;;  %6552 = vst [vmem:[#allocation120_spill] sm:$0xff] %v4244_v2 }
 0x171   : > { %1263 = vperm.xlu1 %3198, %v3840_v43   ;;  %1275 = vperm.xlu0 %3199, %v3859_v48  }
 0x173   : > { %v4248_v61 = vpop.permute.xlu1 %889  ;;  %v4250_v55 = vpop.permute.xlu0 %893 }
 0x174   : > { %6553 = vst [vmem:[#allocation121_spill] sm:$0xff] %v4248_v61  ;;  %6554 = vst [vmem:[#allocation122_spill] sm:$0xff] %v4250_v55 }
 0x175   : > { %1271 = vperm.xlu1 %3198, %v3848_v45   ;;  %1283 = vperm.xlu0 %3199, %v3867_v50  }
 0x177   : > { %v4254_v57 = vpop.permute.xlu1 %897  ;;  %v4256_v60 = vpop.permute.xlu0 %901 }
 0x178   : > { %6555 = vst [vmem:[#allocation123_spill] sm:$0xff] %v4254_v57  ;;  %6556 = vst [vmem:[#allocation124_spill] sm:$0xff] %v4256_v60 }
 0x179   : > { %1279 = vperm.xlu1 %3198, %v3856_v47   ;;  %1291 = vperm.xlu0 %3199, %v3875_v52   ;;  %v6563_v47 = vld [vmem:[#allocation7_spill] sm:$0xff] }
 0x17b   : > { %v4260_v2 = vpop.permute.xlu1 %905  ;;  %v4262_v59 = vpop.permute.xlu0 %909 }
 0x17c   : > { %6557 = vst [vmem:[#allocation125_spill] sm:$0xff] %v4260_v2  ;;  %6558 = vst [vmem:[#allocation126_spill] sm:$0xff] %v4262_v59  ;;  %v6564_v2 = vld [vmem:[#allocation12_spill] sm:$0xff] }
 0x17d   : > { %1287 = vperm.xlu1 %3198, %v3864_v49   ;;  %1299 = vperm.xlu0 %3199, %v3883_v54   ;;  %v6567_v54 = vld [vmem:[#allocation9_spill] sm:$0xff] }
 0x17f   : > { %v4266_v55 = vpop.permute.xlu1 %913  ;;  %v4268_v61 = vpop.permute.xlu0 %917 }
 0x180   : > { %6559 = vst [vmem:[#allocation127_spill] sm:$0xff] %v4266_v55  ;;  %6560 = vst [vmem:[#allocation128_spill] sm:$0xff] %v4268_v61  ;;  %v6568_v55 = vld [vmem:[#allocation14_spill] sm:$0xff] }
 0x181   : > { %1295 = vperm.xlu1 %3198, %v3872_v51   ;;  %1307 = vperm.xlu0 %3199, %v3891_v56   ;;  %v6571_v56 = vld [vmem:[#allocation11_spill] sm:$0xff] }
 0x183   : > { %v4272_v60 = vpop.permute.xlu1 %921  ;;  %v4274_v57 = vpop.permute.xlu0 %925 }
 0x184   : > { %6561 = vst [vmem:[#allocation129_spill] sm:$0xff] %v4272_v60  ;;  %6562 = vst [vmem:[#allocation130_spill] sm:$0xff] %v4274_v57 }
 0x185   : > { %1303 = vperm.xlu1 %3198, %v6563_v47   ;;  %1315 = vperm.xlu0 %3199, %v6564_v2  }
 0x187   : > { %v4278_v59 = vpop.permute.xlu1 %929  ;;  %v4280_v49 = vpop.permute.xlu0 %933 }
 0x188   : > { %6565 = vst [vmem:[#allocation7_spill] sm:$0xff] %v4278_v59  ;;  %6566 = vst [vmem:[#allocation12_spill] sm:$0xff] %v4280_v49 }
 0x189   : > { %1311 = vperm.xlu1 %3198, %v6567_v54   ;;  %1323 = vperm.xlu0 %3199, %v6568_v55  }
 0x18b   : > { %v4284_v61 = vpop.permute.xlu1 %937  ;;  %v4286_v51 = vpop.permute.xlu0 %941 }
 0x18c   : > { %6569 = vst [vmem:[#allocation9_spill] sm:$0xff] %v4284_v61  ;;  %6570 = vst [vmem:[#allocation14_spill] sm:$0xff] %v4286_v51  ;;  %v3610_v61 = vmov 3  }
 0x18d   : > { %1319 = vperm.xlu1 %3198, %v6571_v56   ;;  %1331 = vperm.xlu0 %3199, %v6501_v0  }
 0x18f   : > { %v4290_v57 = vpop.permute.xlu1 %945  ;;  %v4292_v60 = vpop.permute.xlu0 %949 }
 0x190   : > { %6572 = vst [vmem:[#allocation131_spill] sm:$0xff] %v4290_v57  ;;  %6573 = vst [vmem:[#allocation132_spill] sm:$0xff] %v4292_v60 }
 0x191   : > { %1327 = vperm.xlu1 %3198, %v6500_v53   ;;  %1339 = vperm.xlu0 %3199, %v6505_v62  }
 0x193   : > { %v4296_v49 = vpop.permute.xlu1 %953  ;;  %v4298_v59 = vpop.permute.xlu0 %957 }
 0x194   : > { %6574 = vst [vmem:[#allocation133_spill] sm:$0xff] %v4296_v49  ;;  %6575 = vst [vmem:[#allocation134_spill] sm:$0xff] %v4298_v59 }
 0x195   : > { %1335 = vperm.xlu1 %3198, %v6504_v58   ;;  %3201 = vset.pattern.permute.xlu0 %v3610_v61 }
 0x196   : > { %1477 = vperm.xlu0 %3201, %v3683_v4  }
 0x198   : > { %v4302_v51 = vpop.permute.xlu1 %1091  ;;  %v4304_v56 = vpop.permute.xlu0 %1095 }
 0x199   : > { %6576 = vst [vmem:[#allocation135_spill] sm:$0xff] %v4302_v51  ;;  %6577 = vst [vmem:[#allocation136_spill] sm:$0xff] %v4304_v56  ;;  %3200 = vset.pattern.permute.xlu1 %v3610_v61  ;;  %v6721_v56 = vld [vmem:[#allocation68_spill] sm:$0xff]  ;;  %v6722_v51 = vld [vmem:[#allocation69_spill] sm:$0xff] }
 0x19a   : > { %1473 = vperm.xlu1 %3200, %v6508_v63   ;;  %1489 = vperm.xlu0 %3201, %v3691_v6  }
 0x19c   : > { %v4308_v60 = vpop.permute.xlu1 %1099  ;;  %v4310_v49 = vpop.permute.xlu0 %1107 }
 0x19d   : > { %6578 = vst [vmem:[#allocation137_spill] sm:$0xff] %v4308_v60  ;;  %6579 = vst [vmem:[#allocation138_spill] sm:$0xff] %v4310_v49 }
 0x19e   : > { %1481 = vperm.xlu1 %3200, %v3672_v1   ;;  %1497 = vperm.xlu0 %3201, %v3699_v8  }
 0x1a0   : > { %v4314_v59 = vpop.permute.xlu1 %1103  ;;  %v4316_v57 = vpop.permute.xlu0 %1115 }
 0x1a1   : > { %6580 = vst [vmem:[#allocation139_spill] sm:$0xff] %v4314_v59  ;;  %6581 = vst [vmem:[#allocation140_spill] sm:$0xff] %v4316_v57 }
 0x1a2   : > { %1485 = vperm.xlu1 %3200, %v3680_v3   ;;  %1505 = vperm.xlu0 %3201, %v3707_v10  }
 0x1a4   : > { %v4320_v61 = vpop.permute.xlu1 %1111  ;;  %v4322_v63 = vpop.permute.xlu0 %1123 }
 0x1a5   : > { %6582 = vst [vmem:[#allocation141_spill] sm:$0xff] %v4320_v61  ;;  %6583 = vst [vmem:[#allocation142_spill] sm:$0xff] %v4322_v63  ;;  %v6716_v61 = vld [vmem:[#allocation66_spill] sm:$0xff] }
 0x1a6   : > { %1493 = vperm.xlu1 %3200, %v3688_v5   ;;  %1513 = vperm.xlu0 %3201, %v3715_v12  }
 0x1a8   : > { %v4326_v49 = vpop.permute.xlu1 %1119  ;;  %v4328_v1 = vpop.permute.xlu0 %1131 }
 0x1a9   : > { %6584 = vst [vmem:[#allocation143_spill] sm:$0xff] %v4326_v49  ;;  %6585 = vst [vmem:[#allocation144_spill] sm:$0xff] %v4328_v1  ;;  %v3473_v1 = vld [vmem:[%s3669_s26 + $0xc0] sm:$0xff]  ;;  %v6713_v49 = vld [vmem:[#allocation64_spill] sm:$0xff] }
 0x1aa   : > { %1501 = vperm.xlu1 %3200, %v3696_v7   ;;  %1521 = vperm.xlu0 %3201, %v3723_v14  }
 0x1ac   : > { %v4332_v57 = vpop.permute.xlu1 %1127  ;;  %v4334_v3 = vpop.permute.xlu0 %1139 }
 0x1ad   : > { %6586 = vst [vmem:[#allocation145_spill] sm:$0xff] %v4332_v57  ;;  %6587 = vst [vmem:[#allocation146_spill] sm:$0xff] %v4334_v3  ;;  %v6711_v57 = vld [vmem:[#allocation62_spill] sm:$0xff] }
 0x1ae   : > { %1509 = vperm.xlu1 %3200, %v3704_v9   ;;  %1529 = vperm.xlu0 %3201, %v3731_v16  }
 0x1b0   : > { %v4338_v63 = vpop.permute.xlu1 %1135  ;;  %v4340_v5 = vpop.permute.xlu0 %1147 }
 0x1b1   : > { %6588 = vst [vmem:[#allocation147_spill] sm:$0xff] %v4338_v63  ;;  %6589 = vst [vmem:[#allocation148_spill] sm:$0xff] %v4340_v5 }
 0x1b2   : > { %1517 = vperm.xlu1 %3200, %v3712_v11   ;;  %1537 = vperm.xlu0 %3201, %v3739_v18  }
 0x1b4   : > { %v4344_v12 = vpop.permute.xlu1 %1143  ;;  %v4346_v7 = vpop.permute.xlu0 %1155 }
 0x1b5   : > { %6590 = vst [vmem:[#allocation149_spill] sm:$0xff] %v4344_v12  ;;  %6591 = vst [vmem:[#allocation150_spill] sm:$0xff] %v4346_v7  ;;  %v6704_v7 = vld [vmem:[#allocation57_spill] sm:$0xff]  ;;  %v6706_v12 = vld [vmem:[#allocation59_spill] sm:$0xff] }
 0x1b6   : > { %1525 = vperm.xlu1 %3200, %v3720_v13   ;;  %1545 = vperm.xlu0 %3201, %v3747_v20  }
 0x1b8   : > { %v4350_v14 = vpop.permute.xlu1 %1151  ;;  %v4352_v9 = vpop.permute.xlu0 %1163 }
 0x1b9   : > { %6592 = vst [vmem:[#allocation151_spill] sm:$0xff] %v4350_v14  ;;  %6593 = vst [vmem:[#allocation152_spill] sm:$0xff] %v4352_v9  ;;  %v3471_v14 = vld [vmem:[%s3669_s26 + $0xb0] sm:$0xff] }
 0x1ba   : > { %1533 = vperm.xlu1 %3200, %v3728_v15   ;;  %1553 = vperm.xlu0 %3201, %v3755_v22  }
 0x1bc   : > { %v4356_v16 = vpop.permute.xlu1 %1159  ;;  %v4358_v11 = vpop.permute.xlu0 %1171 }
 0x1bd   : > { %6594 = vst [vmem:[#allocation153_spill] sm:$0xff] %v4356_v16  ;;  %6595 = vst [vmem:[#allocation154_spill] sm:$0xff] %v4358_v11  ;;  %v6700_v11 = vld [vmem:[#allocation53_spill] sm:$0xff]  ;;  %v6701_v16 = vld [vmem:[#allocation54_spill] sm:$0xff] }
 0x1be   : > { %1541 = vperm.xlu1 %3200, %v3736_v17   ;;  %1561 = vperm.xlu0 %3201, %v3763_v24  }
 0x1c0   : > { %v4362_v18 = vpop.permute.xlu1 %1167  ;;  %v4364_v13 = vpop.permute.xlu0 %1179 }
 0x1c1   : > { %6596 = vst [vmem:[#allocation155_spill] sm:$0xff] %v4362_v18  ;;  %6597 = vst [vmem:[#allocation156_spill] sm:$0xff] %v4364_v13 }
 0x1c2   : > { %1549 = vperm.xlu1 %3200, %v3744_v19   ;;  %1569 = vperm.xlu0 %3201, %v3771_v26  }
 0x1c4   : > { %v4368_v20 = vpop.permute.xlu1 %1175  ;;  %v4370_v15 = vpop.permute.xlu0 %1187 }
 0x1c5   : > { %6598 = vst [vmem:[#allocation157_spill] sm:$0xff] %v4368_v20  ;;  %6599 = vst [vmem:[#allocation158_spill] sm:$0xff] %v4370_v15  ;;  %v6694_v15 = vld [vmem:[#allocation49_spill] sm:$0xff]  ;;  %v6696_v20 = vld [vmem:[#allocation51_spill] sm:$0xff] }
 0x1c6   : > { %1557 = vperm.xlu1 %3200, %v3752_v21   ;;  %1577 = vperm.xlu0 %3201, %v3779_v28  }
 0x1c8   : > { %v4374_v22 = vpop.permute.xlu1 %1183  ;;  %v4376_v17 = vpop.permute.xlu0 %1195 }
 0x1c9   : > { %6600 = vst [vmem:[#allocation159_spill] sm:$0xff] %v4374_v22  ;;  %6601 = vst [vmem:[#allocation160_spill] sm:$0xff] %v4376_v17  ;;  %v6692_v17 = vld [vmem:[#allocation47_spill] sm:$0xff]  ;;  %v3469_v22 = vld [vmem:[%s3669_s26 + $0xa0] sm:$0xff] }
 0x1ca   : > { %1565 = vperm.xlu1 %3200, %v3760_v23   ;;  %1585 = vperm.xlu0 %3201, %v3787_v30  }
 0x1cc   : > { %v4380_v24 = vpop.permute.xlu1 %1191  ;;  %v4382_v19 = vpop.permute.xlu0 %1203 }
 0x1cd   : > { %6602 = vst [vmem:[#allocation161_spill] sm:$0xff] %v4380_v24  ;;  %6603 = vst [vmem:[#allocation162_spill] sm:$0xff] %v4382_v19 }
 0x1ce   : > { %1573 = vperm.xlu1 %3200, %v3768_v25   ;;  %1593 = vperm.xlu0 %3201, %v3795_v32  }
 0x1d0   : > { %v4386_v26 = vpop.permute.xlu1 %1199  ;;  %v4388_v21 = vpop.permute.xlu0 %1211 }
 0x1d1   : > { %6604 = vst [vmem:[#allocation163_spill] sm:$0xff] %v4386_v26  ;;  %6605 = vst [vmem:[#allocation164_spill] sm:$0xff] %v4388_v21  ;;  %v6687_v21 = vld [vmem:[#allocation44_spill] sm:$0xff] }
 0x1d2   : > { %1581 = vperm.xlu1 %3200, %v3776_v27   ;;  %1601 = vperm.xlu0 %3201, %v3803_v34  }
 0x1d4   : > { %v4392_v28 = vpop.permute.xlu1 %1207  ;;  %v4394_v23 = vpop.permute.xlu0 %1219 }
 0x1d5   : > { %6606 = vst [vmem:[#allocation165_spill] sm:$0xff] %v4392_v28  ;;  %6607 = vst [vmem:[#allocation166_spill] sm:$0xff] %v4394_v23  ;;  %v3467_v23 = vld [vmem:[%s3669_s26 + $0x90] sm:$0xff]  ;;  %v6685_v28 = vld [vmem:[#allocation42_spill] sm:$0xff] }
 0x1d6   : > { %1589 = vperm.xlu1 %3200, %v3784_v29   ;;  %1609 = vperm.xlu0 %3201, %v3811_v36  }
 0x1d8   : > { %v4398_v30 = vpop.permute.xlu1 %1215  ;;  %v4400_v25 = vpop.permute.xlu0 %1227 }
 0x1d9   : > { %6608 = vst [vmem:[#allocation167_spill] sm:$0xff] %v4398_v30  ;;  %6609 = vst [vmem:[#allocation168_spill] sm:$0xff] %v4400_v25  ;;  %v6682_v25 = vld [vmem:[#allocation39_spill] sm:$0xff] }
 0x1da   : > { %1597 = vperm.xlu1 %3200, %v3792_v31   ;;  %1617 = vperm.xlu0 %3201, %v3819_v38  }
 0x1dc   : > { %v4404_v32 = vpop.permute.xlu1 %1223  ;;  %v4406_v27 = vpop.permute.xlu0 %1235 }
 0x1dd   : > { %6610 = vst [vmem:[#allocation169_spill] sm:$0xff] %v4404_v32  ;;  %6611 = vst [vmem:[#allocation170_spill] sm:$0xff] %v4406_v27  ;;  %v6681_v32 = vld [vmem:[#allocation38_spill] sm:$0xff] }
 0x1de   : > { %1605 = vperm.xlu1 %3200, %v3800_v33   ;;  %1625 = vperm.xlu0 %3201, %v3827_v40  }
 0x1e0   : > { %v4410_v34 = vpop.permute.xlu1 %1231  ;;  %v4412_v29 = vpop.permute.xlu0 %1243 }
 0x1e1   : > { %6612 = vst [vmem:[#allocation171_spill] sm:$0xff] %v4410_v34  ;;  %6613 = vst [vmem:[#allocation172_spill] sm:$0xff] %v4412_v29  ;;  %v6677_v29 = vld [vmem:[#allocation36_spill] sm:$0xff] }
 0x1e2   : > { %1613 = vperm.xlu1 %3200, %v3808_v35   ;;  %1633 = vperm.xlu0 %3201, %v3835_v42  }
 0x1e4   : > { %v4416_v36 = vpop.permute.xlu1 %1239  ;;  %v4418_v31 = vpop.permute.xlu0 %1251 }
 0x1e5   : > { %6614 = vst [vmem:[#allocation173_spill] sm:$0xff] %v4416_v36  ;;  %6615 = vst [vmem:[#allocation174_spill] sm:$0xff] %v4418_v31  ;;  %v3465_v31 = vld [vmem:[%s3669_s26 + $0x80] sm:$0xff]  ;;  %v6675_v36 = vld [vmem:[#allocation34_spill] sm:$0xff] }
 0x1e6   : > { %1621 = vperm.xlu1 %3200, %v3816_v37   ;;  %1641 = vperm.xlu0 %3201, %v3843_v44  }
 0x1e8   : > { %v4422_v38 = vpop.permute.xlu1 %1247  ;;  %v4424_v33 = vpop.permute.xlu0 %1259 }
 0x1e9   : > { %6616 = vst [vmem:[#allocation175_spill] sm:$0xff] %v4422_v38  ;;  %6617 = vst [vmem:[#allocation176_spill] sm:$0xff] %v4424_v33  ;;  %v6673_v38 = vld [vmem:[#allocation32_spill] sm:$0xff] }
 0x1ea   : > { %1629 = vperm.xlu1 %3200, %v3824_v39   ;;  %1649 = vperm.xlu0 %3201, %v3851_v46  }
 0x1ec   : > { %v4428_v40 = vpop.permute.xlu1 %1255  ;;  %v4430_v35 = vpop.permute.xlu0 %1267 }
 0x1ed   : > { %6618 = vst [vmem:[#allocation177_spill] sm:$0xff] %v4428_v40  ;;  %6619 = vst [vmem:[#allocation178_spill] sm:$0xff] %v4430_v35 }
 0x1ee   : > { %1637 = vperm.xlu1 %3200, %v3832_v41   ;;  %1657 = vperm.xlu0 %3201, %v3859_v48   ;;  %v6626_v48 = vld [vmem:[#allocation4_spill] sm:$0xff] }
 0x1f0   : > { %v4434_v42 = vpop.permute.xlu1 %1263  ;;  %v4436_v37 = vpop.permute.xlu0 %1275 }
 0x1f1   : > { %6620 = vst [vmem:[#allocation179_spill] sm:$0xff] %v4434_v42  ;;  %6621 = vst [vmem:[#allocation180_spill] sm:$0xff] %v4436_v37  ;;  %v6627_v42 = vld [vmem:[#allocation8_spill] sm:$0xff] }
 0x1f2   : > { %1645 = vperm.xlu1 %3200, %v3840_v43   ;;  %1665 = vperm.xlu0 %3201, %v3867_v50   ;;  %v6630_v50 = vld [vmem:[#allocation5_spill] sm:$0xff] }
 0x1f4   : > { %v4440_v44 = vpop.permute.xlu1 %1271  ;;  %v4442_v39 = vpop.permute.xlu0 %1283 }
 0x1f5   : > { %6622 = vst [vmem:[#allocation181_spill] sm:$0xff] %v4440_v44  ;;  %6623 = vst [vmem:[#allocation182_spill] sm:$0xff] %v4442_v39  ;;  %v6631_v44 = vld [vmem:[#allocation10_spill] sm:$0xff] }
 0x1f6   : > { %1653 = vperm.xlu1 %3200, %v3848_v45   ;;  %1673 = vperm.xlu0 %3201, %v3875_v52   ;;  %v6634_v52 = vld [vmem:[#allocation6_spill] sm:$0xff] }
 0x1f8   : > { %v4446_v46 = vpop.permute.xlu1 %1279  ;;  %v4448_v41 = vpop.permute.xlu0 %1291 }
 0x1f9   : > { %6624 = vst [vmem:[#allocation183_spill] sm:$0xff] %v4446_v46  ;;  %6625 = vst [vmem:[#allocation184_spill] sm:$0xff] %v4448_v41  ;;  %v6668_v46 = vld [vmem:[#allocation29_spill] sm:$0xff] }
 0x1fa   : > { %1661 = vperm.xlu1 %3200, %v6626_v48   ;;  %1681 = vperm.xlu0 %3201, %v6627_v42  }
 0x1fc   : > { %v4452_v37 = vpop.permute.xlu1 %1287  ;;  %v4454_v43 = vpop.permute.xlu0 %1299 }
 0x1fd   : > { %6628 = vst [vmem:[#allocation4_spill] sm:$0xff] %v4452_v37  ;;  %6629 = vst [vmem:[#allocation8_spill] sm:$0xff] %v4454_v43  ;;  %v6666_v37 = vld [vmem:[#allocation27_spill] sm:$0xff] }
 0x1fe   : > { %1669 = vperm.xlu1 %3200, %v6630_v50   ;;  %1689 = vperm.xlu0 %3201, %v6631_v44  }
 0x200   : > { %v4458_v39 = vpop.permute.xlu1 %1295  ;;  %v4460_v45 = vpop.permute.xlu0 %1307 }
 0x201   : > { %6632 = vst [vmem:[#allocation5_spill] sm:$0xff] %v4458_v39  ;;  %6633 = vst [vmem:[#allocation10_spill] sm:$0xff] %v4460_v45  ;;  %v6664_v39 = vld [vmem:[#allocation25_spill] sm:$0xff] }
 0x202   : > { %1677 = vperm.xlu1 %3200, %v6634_v52   ;;  %1697 = vperm.xlu0 %3201, %v6564_v2   ;;  %v6641_v2 = vld [vmem:[#allocation11_spill] sm:$0xff] }
 0x204   : > { %v4464_v41 = vpop.permute.xlu1 %1303  ;;  %v4466_v48 = vpop.permute.xlu0 %1315 }
 0x205   : > { %6635 = vst [vmem:[#allocation6_spill] sm:$0xff] %v4464_v41  ;;  %6636 = vst [vmem:[#allocation185_spill] sm:$0xff] %v4466_v48  ;;  %v6662_v48 = vld [vmem:[#allocation23_spill] sm:$0xff]  ;;  %v6663_v41 = vld [vmem:[#allocation24_spill] sm:$0xff] }
 0x206   : > { %1685 = vperm.xlu1 %3200, %v6563_v47   ;;  %1705 = vperm.xlu0 %3201, %v6568_v55  }
 0x208   : > { %v4470_v42 = vpop.permute.xlu1 %1311  ;;  %v4472_v50 = vpop.permute.xlu0 %1323 }
 0x209   : > { %6637 = vst [vmem:[#allocation186_spill] sm:$0xff] %v4470_v42  ;;  %6638 = vst [vmem:[#allocation187_spill] sm:$0xff] %v4472_v50  ;;  %v3611_v50 = vmov 4   ;;  %v6661_v42 = vld [vmem:[#allocation22_spill] sm:$0xff] }
 0x20a   : > { %1693 = vperm.xlu1 %3200, %v6567_v54   ;;  %1713 = vperm.xlu0 %3201, %v6501_v0  }
 0x20c   : > { %v4476_v44 = vpop.permute.xlu1 %1319  ;;  %v4478_v52 = vpop.permute.xlu0 %1331 }
 0x20d   : > { %6639 = vst [vmem:[#allocation188_spill] sm:$0xff] %v4476_v44  ;;  %6640 = vst [vmem:[#allocation189_spill] sm:$0xff] %v4478_v52  ;;  %v6658_v52 = vld [vmem:[#allocation21_spill] sm:$0xff] }
 0x20e   : > { %1701 = vperm.xlu1 %3200, %v6641_v2   ;;  %1721 = vperm.xlu0 %3201, %v6505_v62   ;;  %v571_v62 = vlaneseq }
 0x210   : > { %v4482_v47 = vpop.permute.xlu1 %1327  ;;  %v4484_v55 = vpop.permute.xlu0 %1339 }
 0x211   : > { %6642 = vst [vmem:[#allocation11_spill] sm:$0xff] %v4482_v47  ;;  %6643 = vst [vmem:[#allocation190_spill] sm:$0xff] %v4484_v55  ;;  %v3461_v55 = vld [vmem:[%s3669_s26 + $0x60] sm:$0xff] }
 0x212   : > { %1709 = vperm.xlu1 %3200, %v6500_v53   ;;  %3203 = vset.pattern.permute.xlu0 %v3611_v50  ;;  %v3456_v53 = vld [vmem:[%s3669_s26] sm:$0xff] }
 0x213   : > { %1859 = vperm.xlu0 %3203, %v3683_v4   ;;  %v4500_v4 = vshrl.u32 %v571_v62, 7 }
 0x214   : > { %v4488_v54 = vpop.permute.xlu1 %1335 }
 0x215   : > { %6644 = vst [vmem:[#allocation191_spill] sm:$0xff] %v4488_v54  ;;  %v4490_v0 = vpop.permute.xlu0 %1477  ;;  %6648 = vst [vmem:[#allocation195_spill] sm:$0xff] %v4500_v4 }
 0x216   : > { %6645 = vst [vmem:[#allocation192_spill] sm:$0xff] %v4490_v0  ;;  %1717 = vperm.xlu1 %3200, %v6504_v58   ;;  %v573_v58 = vsub.s32 0, %v4500_v4 }
 0x217   : > { %1871 = vperm.xlu0 %3203, %v3691_v6   ;;  %v3457_v6 = vld [vmem:[%s3669_s26 + $0x10] sm:$0xff] }
 0x219   : > { %v4494_v2 = vpop.permute.xlu1 %1473  ;;  %v4496_v47 = vpop.permute.xlu0 %1489 }
 0x21a   : > { %6646 = vst [vmem:[#allocation193_spill] sm:$0xff] %v4494_v2  ;;  %6647 = vst [vmem:[#allocation194_spill] sm:$0xff] %v4496_v47  ;;  %3202 = vset.pattern.permute.xlu1 %v3611_v50  ;;  %v4512_v50 = vld [vmem:[%s6393_s1] sm:$0x1f]  ;;  %v962_v47 = vsub.s32 1, %v4500_v4  ;;  %v3460_v2 = vld [vmem:[%s3669_s26 + $0x28] sm:$0xff] }
 0x21b   : > { %1855 = vperm.xlu1 %3202, %v3456_v53   ;;  %1879 = vperm.xlu0 %3203, %v3699_v8   ;;  %v3458_v53 = vld [vmem:[%s3669_s26 + $0x18] sm:$0xff] }
 0x21d   : > { %v4502_v54 = vpop.permute.xlu1 %1481  ;;  %v4504_v0 = vpop.permute.xlu0 %1497 }
 0x21e   : > { %6649 = vst [vmem:[#allocation196_spill] sm:$0xff] %v4502_v54  ;;  %6650 = vst [vmem:[#allocation197_spill] sm:$0xff] %v4504_v0  ;;  %v3459_v0 = vld [vmem:[%s3669_s26 + $0x50] sm:$0xff] }
 0x21f   : > { %1863 = vperm.xlu1 %3202, %v3457_v6   ;;  %1887 = vperm.xlu0 %3203, %v3707_v10   ;;  %v4521_v6 = vrot.slane %v4512_v50, %v573_v58  ;;  %v4537_v58 = vld [vmem:[%s6394_s2] ss:$0 sm:$0xff] }
 0x221   : > { %v4514_v8 = vpop.permute.xlu1 %1485  ;;  %v4516_v62 = vpop.permute.xlu0 %1505  ;;  %v582_v45 = vmul.f32 %v4521_v6, %v6663_v41  ;;  %v581_v43 = vmul.f32 %v4521_v6, %v6664_v39  ;;  %v583_v39 = vmul.f32 %v4521_v6, %v6666_v37  ;;  %v595_v30 = vmul.f32 %v4521_v6, %v6682_v25  ;;  %v6684_v25 = vld [vmem:[#allocation41_spill] sm:$0xff] }
 0x222   : > { %6651 = vst [vmem:[#allocation198_spill] sm:$0xff] %v4514_v8  ;;  %6652 = vst [vmem:[#allocation199_spill] sm:$0xff] %v4516_v62  ;;  %v6655_v62 = vld [vmem:[#allocation18_spill] sm:$0xff]  ;;  %v6656_v8 = vld [vmem:[#allocation19_spill] sm:$0xff]  ;;  %v612_v9 = vmul.f32 %v4521_v6, %v6701_v16 }
 0x223   : > { %1867 = vperm.xlu1 %3202, %v3458_v53   ;;  %1895 = vperm.xlu0 %3203, %v3459_v0   ;;  %v577_v53 = vmul.f32 %v4521_v6, %v6655_v62  ;;  %v575_v0 = vmul.f32 %v4521_v6, %v6656_v8  ;;  %v580_v62 = vmul.f32 %v4521_v6, %v6661_v42  ;;  %v6703_v16 = vld [vmem:[#allocation56_spill] sm:$0xff] }
 0x224   : > { %v579_v8 = vmul.f32 %v4521_v6, %v6662_v48  ;;  %v6665_v48 = vld [vmem:[#allocation26_spill] sm:$0xff] }
 0x225   : > { %v4523_v54 = vpop.permute.xlu1 %1493  ;;  %v4525_v10 = vpop.permute.xlu0 %1513  ;;  %v4564_v42 = vadd.f32 %v4537_v58, %v575_v0  ;;  %v584_v41 = vmul.f32 %v4521_v6, %v6665_v48  ;;  %v585_v0 = vmul.f32 %v4521_v6, %v6668_v46  ;;  %v4585_v48 = vadd.f32 %v4537_v58, %v580_v62  ;;  %v6672_v46 = vld [vmem:[#allocation31_spill] sm:$0xff]  ;;  %v3464_v62 = vld [vmem:[%s3669_s26 + $0x48] sm:$0xff] }
 0x226   : > { %6653 = vst [vmem:[#allocation200_spill] sm:$0xff] %v4523_v54  ;;  %6654 = vst [vmem:[#allocation201_spill] sm:$0xff] %v4525_v10  ;;  %v6657_v10 = vld [vmem:[#allocation20_spill] sm:$0xff]  ;;  %v4588_v37 = vadd.f32 %v4537_v58, %v579_v8 }
 0x227   : > { %1875 = vperm.xlu1 %3202, %v3460_v2   ;;  %1903 = vperm.xlu0 %3203, %v3461_v55   ;;  %v578_v54 = vmul.f32 %v4521_v6, %v6657_v10  ;;  %v576_v2 = vmul.f32 %v4521_v6, %v6658_v52  ;;  %v4556_v10 = vrot.slane %v4512_v50, %v962_v47  ;;  %v3462_v52 = vld [vmem:[%s3669_s26 + $0x38] sm:$0xff] }
 0x228   : > { %v4605_v8 = vadd.f32 %v4537_v58, %v584_v41 }
 0x229   : > { %v4543_v44 = vpop.permute.xlu1 %1501  ;;  %v4545_v55 = vpop.permute.xlu0 %1521  ;;  %v4571_v47 = vadd.f32 %v4537_v58, %v578_v54  ;;  %v4591_v54 = vadd.f32 %v4537_v58, %v582_v45  ;;  %v4608_v45 = vadd.f32 %v4537_v58, %v583_v39  ;;  %v594_v39 = vmul.f32 %v4521_v6, %v6677_v29 }
 0x22a   : > { %6659 = vst [vmem:[#allocation18_spill] sm:$0xff] %v4543_v44  ;;  %6660 = vst [vmem:[#allocation19_spill] sm:$0xff] %v4545_v55  ;;  %v3463_v44 = vld [vmem:[%s3669_s26 + $0x70] sm:$0xff]  ;;  %v4561_v55 = vadd.f32 %v4537_v58, %v577_v53 }
 0x22b   : > { %1883 = vperm.xlu1 %3202, %v3462_v52   ;;  %1911 = vperm.xlu0 %3203, %v3463_v44   ;;  %v4574_v52 = vadd.f32 %v4537_v58, %v576_v2  ;;  %v6667_v44 = vld [vmem:[#allocation28_spill] sm:$0xff]  ;;  %v6671_v2 = vld [vmem:[#allocation30_spill] sm:$0xff] }
 0x22c   : > { %v586_v53 = vmul.f32 %v4521_v6, %v6667_v44  ;;  %v588_v33 = vmul.f32 %v4521_v6, %v6671_v2  ;;  %v4596_v44 = vadd.f32 %v4537_v58, %v581_v43  ;;  %v6674_v2 = vld [vmem:[#allocation33_spill] sm:$0xff] }
 0x22d   : > { %v4580_v35 = vpop.permute.xlu1 %1509  ;;  %v4582_v40 = vpop.permute.xlu0 %1529  ;;  %v589_v43 = vmul.f32 %v4521_v6, %v6674_v2 }
 0x22e   : > { %6669 = vst [vmem:[#allocation20_spill] sm:$0xff] %v4580_v35  ;;  %6670 = vst [vmem:[#allocation21_spill] sm:$0xff] %v4582_v40  ;;  %v587_v35 = vmul.f32 %v4521_v6, %v6672_v46  ;;  %v590_v40 = vmul.f32 %v4521_v6, %v6673_v38  ;;  %v592_v46 = vmul.f32 %v4521_v6, %v6675_v36  ;;  %v6680_v36 = vld [vmem:[#allocation37_spill] sm:$0xff] }
 0x22f   : > { %1891 = vperm.xlu1 %3202, %v3464_v62   ;;  %1919 = vperm.xlu0 %3203, %v3465_v31   ;;  %v4615_v38 = vadd.f32 %v4537_v58, %v586_v53  ;;  %v4618_v62 = vadd.f32 %v4537_v58, %v585_v0  ;;  %v6676_v31 = vld [vmem:[#allocation35_spill] sm:$0xff]  ;;  %v4629_v2 = vadd.f32 %v4537_v58, %v588_v33  ;;  %v3466_v33 = vld [vmem:[%s3669_s26 + $0x58] sm:$0xff] }
 0x230   : > { %v591_v41 = vmul.f32 %v4521_v6, %v6676_v31  ;;  %v593_v53 = vmul.f32 %v4521_v6, %v6680_v36  ;;  %v596_v0 = vmul.f32 %v4521_v6, %v6681_v32  ;;  %v4638_v31 = vadd.f32 %v4537_v58, %v587_v35 }
 0x231   : > { %v4624_v34 = vpop.permute.xlu1 %1517  ;;  %v4626_v27 = vpop.permute.xlu0 %1537  ;;  %v4641_v29 = vadd.f32 %v4537_v58, %v590_v40  ;;  %v4648_v36 = vadd.f32 %v4537_v58, %v589_v43  ;;  %v4651_v32 = vadd.f32 %v4537_v58, %v592_v46  ;;  %v597_v35 = vmul.f32 %v4521_v6, %v6684_v25 }
 0x232   : > { %6678 = vst [vmem:[#allocation22_spill] sm:$0xff] %v4624_v34  ;;  %6679 = vst [vmem:[#allocation23_spill] sm:$0xff] %v4626_v27  ;;  %v6683_v34 = vld [vmem:[#allocation40_spill] sm:$0xff]  ;;  %v600_v40 = vmul.f32 %v4521_v6, %v6685_v28  ;;  %v602_v46 = vmul.f32 %v4521_v6, %v6687_v21  ;;  %v4672_v25 = vadd.f32 %v4537_v58, %v593_v53  ;;  %v6691_v21 = vld [vmem:[#allocation46_spill] sm:$0xff] }
 0x233   : > { %v598_v27 = vmul.f32 %v4521_v6, %v6683_v34  ;;  %1899 = vperm.xlu1 %3202, %v3466_v33   ;;  %1927 = vperm.xlu0 %3203, %v3467_v23   ;;  %v4658_v34 = vadd.f32 %v4537_v58, %v591_v41  ;;  %v4661_v33 = vadd.f32 %v4537_v58, %v594_v39  ;;  %v6686_v23 = vld [vmem:[#allocation43_spill] sm:$0xff]  ;;  %v6690_v39 = vld [vmem:[#allocation45_spill] sm:$0xff]  ;;  %v3468_v53 = vld [vmem:[%s3669_s26 + $0x68] sm:$0xff] }
 0x234   : > { %v599_v43 = vmul.f32 %v4521_v6, %v6686_v23  ;;  %v4675_v28 = vadd.f32 %v4537_v58, %v596_v0  ;;  %v4678_v41 = vadd.f32 %v4537_v58, %v595_v30  ;;  %v601_v24 = vmul.f32 %v4521_v6, %v6690_v39  ;;  %v6693_v39 = vld [vmem:[#allocation48_spill] sm:$0xff] }
 0x235   : > { %v4667_v26 = vpop.permute.xlu1 %1525  ;;  %v4669_v19 = vpop.permute.xlu0 %1545  ;;  %v4683_v23 = vadd.f32 %v4537_v58, %v598_v27  ;;  %v4692_v0 = vadd.f32 %v4537_v58, %v597_v35  ;;  %v4695_v30 = vadd.f32 %v4537_v58, %v600_v40  ;;  %v606_v27 = vmul.f32 %v4521_v6, %v6693_v39 }
 0x236   : > { %6688 = vst [vmem:[#allocation24_spill] sm:$0xff] %v4667_v26  ;;  %6689 = vst [vmem:[#allocation25_spill] sm:$0xff] %v4669_v19  ;;  %v604_v26 = vmul.f32 %v4521_v6, %v6691_v21  ;;  %v603_v19 = vmul.f32 %v4521_v6, %v6692_v17  ;;  %v605_v21 = vmul.f32 %v4521_v6, %v6694_v15  ;;  %v6699_v15 = vld [vmem:[#allocation52_spill] sm:$0xff] }
 0x237   : > { %1907 = vperm.xlu1 %3202, %v3468_v53   ;;  %1935 = vperm.xlu0 %3203, %v3469_v22   ;;  %v4702_v17 = vadd.f32 %v4537_v58, %v599_v43  ;;  %v4705_v53 = vadd.f32 %v4537_v58, %v602_v46  ;;  %v6695_v22 = vld [vmem:[#allocation50_spill] sm:$0xff]  ;;  %v607_v40 = vmul.f32 %v4521_v6, %v6696_v20 }
 0x238   : > { %v608_v35 = vmul.f32 %v4521_v6, %v6695_v22  ;;  %v4716_v39 = vadd.f32 %v4537_v58, %v601_v24  ;;  %v610_v43 = vmul.f32 %v4521_v6, %v6699_v15  ;;  %v609_v46 = vmul.f32 %v4521_v6, %v6700_v11  ;;  %v3470_v24 = vld [vmem:[%s3669_s26 + $0x78] sm:$0xff] }
 0x239   : > { %v4711_v13 = vpop.permute.xlu1 %1533  ;;  %v4713_v18 = vpop.permute.xlu0 %1553  ;;  %v4725_v22 = vadd.f32 %v4537_v58, %v604_v26  ;;  %v4728_v20 = vadd.f32 %v4537_v58, %v603_v19  ;;  %v4735_v15 = vadd.f32 %v4537_v58, %v606_v27  ;;  %v4738_v11 = vadd.f32 %v4537_v58, %v605_v21 }
 0x23a   : > { %6697 = vst [vmem:[#allocation26_spill] sm:$0xff] %v4711_v13  ;;  %6698 = vst [vmem:[#allocation27_spill] sm:$0xff] %v4713_v18  ;;  %v6702_v13 = vld [vmem:[#allocation55_spill] sm:$0xff]  ;;  %v614_v26 = vmul.f32 %v4521_v6, %v6703_v16  ;;  %v613_v19 = vmul.f32 %v4521_v6, %v6704_v7  ;;  %v615_v21 = vmul.f32 %v4521_v6, %v6706_v12  ;;  %v6710_v12 = vld [vmem:[#allocation61_spill] sm:$0xff] }
 0x23b   : > { %v611_v18 = vmul.f32 %v4521_v6, %v6702_v13  ;;  %1915 = vperm.xlu1 %3202, %v3470_v24   ;;  %1943 = vperm.xlu0 %3203, %v3471_v14   ;;  %v4745_v13 = vadd.f32 %v4537_v58, %v608_v35  ;;  %v4748_v24 = vadd.f32 %v4537_v58, %v607_v40  ;;  %v6705_v14 = vld [vmem:[#allocation58_spill] sm:$0xff]  ;;  %v6709_v40 = vld [vmem:[#allocation60_spill] sm:$0xff] }
 0x23c   : > { %v616_v27 = vmul.f32 %v4521_v6, %v6705_v14  ;;  %v4759_v16 = vadd.f32 %v4537_v58, %v610_v43  ;;  %v4762_v7 = vadd.f32 %v4537_v58, %v609_v46  ;;  %v4765_v35 = vadd.f32 %v4537_v58, %v612_v9  ;;  %v3472_v43 = vld [vmem:[%s3669_s26 + $0x88] sm:$0xff] }
 0x23d   : > { %v4754_v5 = vpop.permute.xlu1 %1541  ;;  %v4756_v63 = vpop.permute.xlu0 %1561  ;;  %v618_v3 = vmul.f32 %v4521_v6, %v6709_v40  ;;  %v4770_v14 = vadd.f32 %v4537_v58, %v611_v18  ;;  %v4779_v46 = vadd.f32 %v4537_v58, %v614_v26  ;;  %v4782_v9 = vadd.f32 %v4537_v58, %v613_v19  ;;  %v6712_v40 = vld [vmem:[#allocation63_spill] sm:$0xff] }
 0x23e   : > { %6707 = vst [vmem:[#allocation28_spill] sm:$0xff] %v4754_v5  ;;  %6708 = vst [vmem:[#allocation29_spill] sm:$0xff] %v4756_v63  ;;  %v617_v5 = vmul.f32 %v4521_v6, %v6710_v12  ;;  %v620_v63 = vmul.f32 %v4521_v6, %v6711_v57  ;;  %v619_v18 = vmul.f32 %v4521_v6, %v6712_v40 }
 0x23f   : > { %1923 = vperm.xlu1 %3202, %v3472_v43   ;;  %1951 = vperm.xlu0 %3203, %v3473_v1   ;;  %v622_v12 = vmul.f32 %v4521_v6, %v6713_v49  ;;  %v4789_v57 = vadd.f32 %v4537_v58, %v616_v27  ;;  %v4792_v43 = vadd.f32 %v4537_v58, %v615_v21  ;;  %v6715_v1 = vld [vmem:[#allocation65_spill] sm:$0xff]  ;;  %v6720_v49 = vld [vmem:[#allocation67_spill] sm:$0xff] }
 0x240   : > { %v621_v26 = vmul.f32 %v4521_v6, %v6715_v1  ;;  %v624_v19 = vmul.f32 %v4521_v6, %v6716_v61  ;;  %v4803_v40 = vadd.f32 %v4537_v58, %v618_v3  ;;  %v623_v27 = vmul.f32 %v4521_v6, %v6720_v49  ;;  %v3474_v3 = vld [vmem:[%s3669_s26 + $0x98] sm:$0xff] }
 0x241   : > { %6714 = vst [vmem:[#allocation30_spill] sm:$0xff] %v4789_v57  ;;  %v4798_v59 = vpop.permute.xlu1 %1549  ;;  %v4800_v60 = vpop.permute.xlu0 %1569  ;;  %v626_v21 = vmul.f32 %v4521_v6, %v6721_v56  ;;  %v625_v57 = vmul.f32 %v4521_v6, %v6722_v51  ;;  %v4812_v1 = vadd.f32 %v4537_v58, %v617_v5  ;;  %v4815_v61 = vadd.f32 %v4537_v58, %v620_v63  ;;  %v6728_v51 = vld [vmem:[#allocation71_spill] sm:$0xff] }
 0x242   : > { %6717 = vst [vmem:[#allocation31_spill] sm:$0xff] %v4798_v59  ;;  %6718 = vst [vmem:[#allocation32_spill] sm:$0xff] %v4800_v60  ;;  %v6725_v59 = vld [vmem:[#allocation70_spill] sm:$0xff]  ;;  %v4822_v49 = vadd.f32 %v4537_v58, %v619_v18  ;;  %v4825_v56 = vadd.f32 %v4537_v58, %v622_v12  ;;  %v627_v5 = vmul.f32 %v4521_v6, %v6728_v51 }
 0x243   : > { %6719 = vst [vmem:[#allocation33_spill] sm:$0xff] %v4803_v40  ;;  %6723 = vst [vmem:[#allocation34_spill] sm:$0xff] %v4812_v1  ;;  %v628_v60 = vmul.f32 %v4521_v6, %v6725_v59  ;;  %1931 = vperm.xlu1 %3202, %v3474_v3   ;;  %v3475_v40 = vld [vmem:[%s3669_s26 + $0xd0] sm:$0xff]  ;;  %v6729_v1 = vld [vmem:[#allocation72_spill] sm:$0xff]  ;;  %v4832_v59 = vadd.f32 %v4537_v58, %v621_v26  ;;  %v4835_v3 = vadd.f32 %v4537_v58, %v624_v19 }
 0x244   : > { %6724 = vst [vmem:[#allocation35_spill] sm:$0xff] %v4815_v61  ;;  %1959 = vperm.xlu0 %3203, %v3475_v40   ;;  %6726 = vst [vmem:[#allocation36_spill] sm:$0xff] %v4822_v49  ;;  %v630_v63 = vmul.f32 %v4521_v6, %v6729_v1  ;;  %v6732_v40 = vld [vmem:[#allocation73_spill] sm:$0xff]  ;;  %v6733_v61 = vld [vmem:[#allocation74_spill] sm:$0xff]  ;;  %v4846_v51 = vadd.f32 %v4537_v58, %v623_v27  ;;  %v4849_v1 = vadd.f32 %v4537_v58, %v626_v21 }
 0x245   : > { %6727 = vst [vmem:[#allocation37_spill] sm:$0xff] %v4825_v56  ;;  %6730 = vst [vmem:[#allocation38_spill] sm:$0xff] %v4832_v59  ;;  %v629_v18 = vmul.f32 %v4521_v6, %v6732_v40  ;;  %v632_v12 = vmul.f32 %v4521_v6, %v6733_v61  ;;  %v4841_v56 = vpop.permute.xlu1 %1557  ;;  %v4843_v49 = vpop.permute.xlu0 %1577  ;;  %v4852_v26 = vadd.f32 %v4537_v58, %v625_v57  ;;  %v6738_v19 = vld [vmem:[#allocation75_spill] sm:$0xff]  ;;  %v6740_v61 = vld [vmem:[#allocation76_spill] sm:$0xff] }
 0x246   : > { %6731 = vst [vmem:[#allocation39_spill] sm:$0xff] %v4835_v3  ;;  %6734 = vst [vmem:[#allocation40_spill] sm:$0xff] %v4841_v56  ;;  %v631_v3 = vmul.f32 %v4521_v6, %v6738_v19  ;;  %v4857_v40 = vadd.f32 %v4537_v58, %v628_v60  ;;  %v634_v56 = vmul.f32 %v4521_v6, %v6740_v61  ;;  %v6741_v59 = vld [vmem:[#allocation77_spill] sm:$0xff]  ;;  %v3476_v27 = vld [vmem:[%s3669_s26 + $0xa8] sm:$0xff] }
 0x247   : > { %6735 = vst [vmem:[#allocation41_spill] sm:$0xff] %v4843_v49  ;;  %6736 = vst [vmem:[#allocation42_spill] sm:$0xff] %v4846_v51  ;;  %v633_v49 = vmul.f32 %v4521_v6, %v6741_v59  ;;  %1939 = vperm.xlu1 %3202, %v3476_v27   ;;  %v3477_v51 = vld [vmem:[%s3669_s26 + $0xe0] sm:$0xff]  ;;  %v4866_v21 = vadd.f32 %v4537_v58, %v627_v5  ;;  %v4869_v57 = vadd.f32 %v4537_v58, %v630_v63 }
 0x248   : > { %6737 = vst [vmem:[#allocation43_spill] sm:$0xff] %v4849_v1  ;;  %6739 = vst [vmem:[#allocation44_spill] sm:$0xff] %v4857_v40  ;;  %1967 = vperm.xlu0 %3203, %v3477_v51   ;;  %v6744_v19 = vld [vmem:[#allocation13_spill] sm:$0xff]  ;;  %v6745_v40 = vld [vmem:[#allocation16_spill] sm:$0xff]  ;;  %v4876_v59 = vadd.f32 %v4537_v58, %v629_v18  ;;  %v4879_v27 = vadd.f32 %v4537_v58, %v632_v12  ;;  %v1344_v63 = vsub.s32 2, %v4500_v4 }
 0x249   : > { %6742 = vst [vmem:[#allocation45_spill] sm:$0xff] %v4866_v21  ;;  %6743 = vst [vmem:[#allocation46_spill] sm:$0xff] %v4869_v57  ;;  %v636_v60 = vmul.f32 %v4521_v6, %v6744_v19  ;;  %v635_v61 = vmul.f32 %v4521_v6, %v6745_v40  ;;  %v6748_v51 = vld [vmem:[#allocation15_spill] sm:$0xff]  ;;  %v4884_v57 = vpop.permute.xlu1 %1565  ;;  %v4886_v21 = vpop.permute.xlu0 %1585  ;;  %v4889_v19 = vadd.f32 %v4537_v58, %v631_v3  ;;  %v6752_v40 = vld [vmem:[#allocation17_spill] sm:$0xff] }
 0x24a   : > { %6746 = vst [vmem:[#allocation47_spill] sm:$0xff] %v4876_v59  ;;  %6747 = vst [vmem:[#allocation48_spill] sm:$0xff] %v4879_v27  ;;  %v637_v5 = vmul.f32 %v4521_v6, %v6748_v51  ;;  %v964_v1 = vmul.f32 %v4556_v10, %v6752_v40  ;;  %v6753_v18 = vld [vmem:[#allocation3_spill] sm:$0xff]  ;;  %v6754_v12 = vld [vmem:[#allocation78_spill] sm:$0xff]  ;;  %v4898_v6 = vadd.f32 %v4537_v58, %v634_v56 }
 0x24b   : > { %6749 = vst [vmem:[#allocation49_spill] sm:$0xff] %v4884_v57  ;;  %6750 = vst [vmem:[#allocation50_spill] sm:$0xff] %v4886_v21  ;;  %v966_v59 = vmul.f32 %v4556_v10, %v6753_v18  ;;  %v965_v27 = vmul.f32 %v4556_v10, %v6754_v12  ;;  %v4901_v51 = vadd.f32 %v4537_v58, %v633_v49  ;;  %v6757_v57 = vld [vmem:[#allocation79_spill] sm:$0xff]  ;;  %v3478_v3 = vld [vmem:[%s3669_s26 + $0xb8] sm:$0xff] }
 0x24c   : > { %6751 = vst [vmem:[#allocation51_spill] sm:$0xff] %v4889_v19  ;;  %6755 = vst [vmem:[#allocation52_spill] sm:$0xff] %v4898_v6  ;;  %v967_v21 = vmul.f32 %v4556_v10, %v6757_v57  ;;  %1947 = vperm.xlu1 %3202, %v3478_v3   ;;  %v3479_v19 = vld [vmem:[%s3669_s26 + $0xf0] sm:$0xff]  ;;  %v4908_v40 = vadd.f32 %v4537_v58, %v636_v60  ;;  %v4911_v18 = vadd.f32 %v4537_v58, %v635_v61  ;;  %v6760_v12 = vld [vmem:[#allocation80_spill] sm:$0xff] }
 0x24d   : > { %6756 = vst [vmem:[#allocation53_spill] sm:$0xff] %v4901_v51  ;;  %1975 = vperm.xlu0 %3203, %v3479_v19   ;;  %v968_v56 = vmul.f32 %v4556_v10, %v6760_v12  ;;  %v6761_v6 = vld [vmem:[#allocation81_spill] sm:$0xff]  ;;  %v4918_v57 = vadd.f32 %v4537_v58, %v637_v5  ;;  %v6763_v3 = vld [vmem:[#allocation82_spill] sm:$0xff]  ;;  %v6764_v51 = vld [vmem:[#allocation83_spill] sm:$0xff]  ;;  %v4925_v61 = vrot.slane %v4512_v50, %v1344_v63 }
 0x24e   : > { %6758 = vst [vmem:[#allocation54_spill] sm:$0xff] %v4908_v40  ;;  %6759 = vst [vmem:[#allocation55_spill] sm:$0xff] %v4911_v18  ;;  %v969_v49 = vmul.f32 %v4556_v10, %v6761_v6  ;;  %v970_v19 = vmul.f32 %v4556_v10, %v6763_v3  ;;  %v971_v60 = vmul.f32 %v4556_v10, %v6764_v51  ;;  %v4927_v40 = vpop.permute.xlu1 %1573  ;;  %v4929_v18 = vpop.permute.xlu0 %1593  ;;  %v6768_v5 = vld [vmem:[#allocation84_spill] sm:$0xff]  ;;  %v6769_v63 = vld [vmem:[#allocation85_spill] sm:$0xff] }
 0x24f   : > { %6762 = vst [vmem:[#allocation56_spill] sm:$0xff] %v4918_v57  ;;  %6765 = vst [vmem:[#allocation57_spill] sm:$0xff] %v4925_v61  ;;  %v4932_v12 = vadd.f32 %v964_v1, %v4564_v42  ;;  %v4935_v6 = vadd.f32 %v966_v59, %v4561_v55  ;;  %v4938_v58 = vadd.f32 %v965_v27, %v4574_v52  ;;  %v6770_v57 = vld [vmem:[#allocation86_spill] sm:$0xff]  ;;  %v3481_v1 = vld [vmem:[%s3669_s26 + $0x100] sm:$0xff] }
 0x250   : > { %6766 = vst [vmem:[#allocation58_spill] sm:$0xff] %v4927_v40  ;;  %6767 = vst [vmem:[#allocation59_spill] sm:$0xff] %v4929_v18  ;;  %v972_v3 = vmul.f32 %v4556_v10, %v6768_v5  ;;  %v4943_v51 = vadd.f32 %v967_v21, %v4571_v47  ;;  %v973_v40 = vmul.f32 %v4556_v10, %v6769_v63  ;;  %v3480_v42 = vld [vmem:[%s3669_s26 + $0xc8] sm:$0xff]  ;;  %v6771_v59 = vld [vmem:[#allocation87_spill] sm:$0xff] }
 0x251   : > { %v974_v18 = vmul.f32 %v4556_v10, %v6770_v57  ;;  %1955 = vperm.xlu1 %3202, %v3480_v42   ;;  %1983 = vperm.xlu0 %3203, %v3481_v1   ;;  %v4952_v55 = vadd.f32 %v968_v56, %v4588_v37  ;;  %v4955_v52 = vadd.f32 %v969_v49, %v4585_v48  ;;  %v6772_v21 = vld [vmem:[#allocation88_spill] sm:$0xff]  ;;  %v6773_v63 = vld [vmem:[#allocation89_spill] sm:$0xff]  ;;  %v6774_v56 = vld [vmem:[#allocation90_spill] sm:$0xff] }
 0x252   : > { %v975_v47 = vmul.f32 %v4556_v10, %v6771_v59  ;;  %v976_v27 = vmul.f32 %v4556_v10, %v6772_v21  ;;  %v4962_v57 = vadd.f32 %v970_v19, %v4596_v44  ;;  %v4965_v5 = vadd.f32 %v971_v60, %v4591_v54  ;;  %v4971_v49 = vpop.permute.xlu1 %1581  ;;  %v4973_v42 = vpop.permute.xlu0 %1601  ;;  %v6777_v59 = vld [vmem:[#allocation91_spill] sm:$0xff]  ;;  %v6778_v19 = vld [vmem:[#allocation92_spill] sm:$0xff]  ;;  %v6779_v60 = vld [vmem:[#allocation93_spill] sm:$0xff] }
 0x253   : > { %v977_v37 = vmul.f32 %v4556_v10, %v6773_v63  ;;  %v978_v48 = vmul.f32 %v4556_v10, %v6774_v56  ;;  %6775 = vst [vmem:[#allocation60_spill] sm:$0xff] %v4971_v49  ;;  %6776 = vst [vmem:[#allocation61_spill] sm:$0xff] %v4973_v42  ;;  %v4976_v1 = vadd.f32 %v972_v3, %v4608_v45  ;;  %v6780_v49 = vld [vmem:[#allocation94_spill] sm:$0xff]  ;;  %v3482_v45 = vld [vmem:[%s3669_s26 + $0xd8] sm:$0xff] }
 0x254   : > { %v979_v44 = vmul.f32 %v4556_v10, %v6777_v59  ;;  %v980_v54 = vmul.f32 %v4556_v10, %v6778_v19  ;;  %v981_v21 = vmul.f32 %v4556_v10, %v6779_v60  ;;  %v4985_v63 = vadd.f32 %v973_v40, %v4605_v8  ;;  %v3483_v3 = vld [vmem:[%s3669_s26 + $0x110] sm:$0xff]  ;;  %v6782_v40 = vld [vmem:[#allocation96_spill] sm:$0xff] }
 0x255   : > { %v4988_v56 = vadd.f32 %v974_v18, %v4618_v62  ;;  %v982_v42 = vmul.f32 %v4556_v10, %v6780_v49  ;;  %1963 = vperm.xlu1 %3202, %v3482_v45   ;;  %1991 = vperm.xlu0 %3203, %v3483_v3   ;;  %v4995_v59 = vadd.f32 %v975_v47, %v4615_v38  ;;  %v6781_v60 = vld [vmem:[#allocation95_spill] sm:$0xff]  ;;  %v6783_v45 = vld [vmem:[#allocation97_spill] sm:$0xff]  ;;  %v6784_v47 = vld [vmem:[#allocation98_spill] sm:$0xff] }
 0x256   : > { %v4998_v19 = vadd.f32 %v976_v27, %v4638_v31  ;;  %v983_v8 = vmul.f32 %v4556_v10, %v6781_v60  ;;  %v984_v62 = vmul.f32 %v4556_v10, %v6782_v40  ;;  %v5005_v18 = vadd.f32 %v977_v37, %v4629_v2  ;;  %v5014_v27 = vpop.permute.xlu1 %1589  ;;  %v5016_v3 = vpop.permute.xlu0 %1609 }
 0x257   : > { %v5008_v49 = vadd.f32 %v978_v48, %v4648_v36  ;;  %v985_v38 = vmul.f32 %v4556_v10, %v6783_v45  ;;  %v986_v31 = vmul.f32 %v4556_v10, %v6784_v47  ;;  %6785 = vst [vmem:[#allocation62_spill] sm:$0xff] %v5014_v27  ;;  %6786 = vst [vmem:[#allocation63_spill] sm:$0xff] %v5016_v3  ;;  %v6787_v36 = vld [vmem:[#allocation99_spill] sm:$0xff]  ;;  %v6788_v45 = vld [vmem:[#allocation100_spill] sm:$0xff] }
 0x258   : > { %v5019_v60 = vadd.f32 %v979_v44, %v4641_v29  ;;  %v5022_v40 = vadd.f32 %v980_v54, %v4658_v34  ;;  %v5025_v2 = vadd.f32 %v981_v21, %v4651_v32  ;;  %v987_v37 = vmul.f32 %v4556_v10, %v6787_v36  ;;  %v6789_v27 = vld [vmem:[#allocation101_spill] sm:$0xff]  ;;  %v3484_v29 = vld [vmem:[%s3669_s26 + $0xe8] sm:$0xff] }
 0x259   : > { %v5030_v48 = vadd.f32 %v982_v42, %v4672_v25  ;;  %v988_v47 = vmul.f32 %v4556_v10, %v6788_v45  ;;  %v989_v3 = vmul.f32 %v4556_v10, %v6789_v27  ;;  %1971 = vperm.xlu1 %3202, %v3484_v29   ;;  %v3485_v44 = vld [vmem:[%s3669_s26 + $0x120] sm:$0xff]  ;;  %v5039_v34 = vadd.f32 %v983_v8, %v4661_v33  ;;  %v6790_v54 = vld [vmem:[#allocation102_spill] sm:$0xff]  ;;  %v6791_v42 = vld [vmem:[#allocation103_spill] sm:$0xff] }
 0x25a   : > { %1999 = vperm.xlu0 %3203, %v3485_v44   ;;  %v5042_v32 = vadd.f32 %v984_v62, %v4678_v41  ;;  %v990_v25 = vmul.f32 %v4556_v10, %v6790_v54  ;;  %v991_v21 = vmul.f32 %v4556_v10, %v6791_v42  ;;  %v5049_v27 = vadd.f32 %v985_v38, %v4675_v28  ;;  %v6792_v45 = vld [vmem:[#allocation104_spill] sm:$0xff]  ;;  %v6793_v8 = vld [vmem:[#allocation105_spill] sm:$0xff]  ;;  %v5058_v62 = vpop.permute.xlu1 %1597  ;;  %v5060_v29 = vpop.permute.xlu0 %1617  ;;  %v6796_v54 = vld [vmem:[#allocation106_spill] sm:$0xff] }
 0x25b   : > { %v5052_v36 = vadd.f32 %v986_v31, %v4692_v0  ;;  %v992_v33 = vmul.f32 %v4556_v10, %v6792_v45  ;;  %v993_v41 = vmul.f32 %v4556_v10, %v6793_v8  ;;  %6794 = vst [vmem:[#allocation64_spill] sm:$0xff] %v5058_v62  ;;  %6795 = vst [vmem:[#allocation65_spill] sm:$0xff] %v5060_v29  ;;  %v6797_v38 = vld [vmem:[#allocation107_spill] sm:$0xff]  ;;  %v6798_v31 = vld [vmem:[#allocation108_spill] sm:$0xff] }
 0x25c   : > { %v5063_v44 = vadd.f32 %v987_v37, %v4683_v23  ;;  %v994_v28 = vmul.f32 %v4556_v10, %v6796_v54  ;;  %v995_v0 = vmul.f32 %v4556_v10, %v6797_v38  ;;  %v996_v42 = vmul.f32 %v4556_v10, %v6798_v31  ;;  %v6799_v62 = vld [vmem:[#allocation109_spill] sm:$0xff]  ;;  %v3486_v23 = vld [vmem:[%s3669_s26 + $0xf8] sm:$0xff]  ;;  %v3487_v37 = vld [vmem:[%s3669_s26 + $0x130] sm:$0xff] }
 0x25d   : > { %v5072_v45 = vadd.f32 %v988_v47, %v4702_v17  ;;  %v5075_v8 = vadd.f32 %v989_v3, %v4695_v30  ;;  %v997_v29 = vmul.f32 %v4556_v10, %v6799_v62  ;;  %1979 = vperm.xlu1 %3202, %v3486_v23   ;;  %v5082_v54 = vadd.f32 %v990_v25, %v4716_v39  ;;  %v6800_v31 = vld [vmem:[#allocation110_spill] sm:$0xff]  ;;  %v6801_v47 = vld [vmem:[#allocation111_spill] sm:$0xff]  ;;  %v6802_v23 = vld [vmem:[#allocation112_spill] sm:$0xff] }
 0x25e   : > { %2007 = vperm.xlu0 %3203, %v3487_v37   ;;  %v5085_v38 = vadd.f32 %v991_v21, %v4705_v53  ;;  %v998_v17 = vmul.f32 %v4556_v10, %v6800_v31  ;;  %v999_v30 = vmul.f32 %v4556_v10, %v6801_v47  ;;  %v5092_v3 = vadd.f32 %v992_v33, %v4728_v20  ;;  %v6803_v25 = vld [vmem:[#allocation113_spill] sm:$0xff]  ;;  %v5101_v21 = vpop.permute.xlu1 %1605  ;;  %v5103_v37 = vpop.permute.xlu0 %1625 }
 0x25f   : > { %v5095_v62 = vadd.f32 %v993_v41, %v4725_v22  ;;  %v1000_v39 = vmul.f32 %v4556_v10, %v6802_v23  ;;  %v1001_v53 = vmul.f32 %v4556_v10, %v6803_v25  ;;  %6804 = vst [vmem:[#allocation66_spill] sm:$0xff] %v5101_v21  ;;  %6805 = vst [vmem:[#allocation67_spill] sm:$0xff] %v5103_v37  ;;  %v6806_v22 = vld [vmem:[#allocation114_spill] sm:$0xff]  ;;  %v6807_v23 = vld [vmem:[#allocation115_spill] sm:$0xff] }
 0x260   : > { %v5106_v31 = vadd.f32 %v994_v28, %v4738_v11  ;;  %v5109_v47 = vadd.f32 %v995_v0, %v4735_v15  ;;  %v5112_v20 = vadd.f32 %v996_v42, %v4748_v24  ;;  %v1002_v33 = vmul.f32 %v4556_v10, %v6806_v22  ;;  %v6808_v21 = vld [vmem:[#allocation116_spill] sm:$0xff]  ;;  %v3488_v11 = vld [vmem:[%s3669_s26 + $0x108] sm:$0xff]  ;;  %v3489_v28 = vld [vmem:[%s3669_s26 + $0x140] sm:$0xff] }
 0x261   : > { %v5117_v41 = vadd.f32 %v997_v29, %v4745_v13  ;;  %v1003_v25 = vmul.f32 %v4556_v10, %v6807_v23  ;;  %v1004_v37 = vmul.f32 %v4556_v10, %v6808_v21  ;;  %1987 = vperm.xlu1 %3202, %v3488_v11   ;;  %v5126_v15 = vadd.f32 %v998_v17, %v4762_v7  ;;  %v6809_v0 = vld [vmem:[#allocation117_spill] sm:$0xff]  ;;  %v6810_v29 = vld [vmem:[#allocation118_spill] sm:$0xff]  ;;  %v6812_v23 = vld [vmem:[#allocation119_spill] sm:$0xff] }
 0x262   : > { %2015 = vperm.xlu0 %3203, %v3489_v28   ;;  %v5129_v24 = vadd.f32 %v999_v30, %v4759_v16  ;;  %v1005_v13 = vmul.f32 %v4556_v10, %v6809_v0  ;;  %v1006_v42 = vmul.f32 %v4556_v10, %v6810_v29  ;;  %v5136_v21 = vadd.f32 %v1000_v39, %v4770_v14  ;;  %v6813_v17 = vld [vmem:[#allocation120_spill] sm:$0xff]  ;;  %v5145_v30 = vpop.permute.xlu1 %1613  ;;  %v5147_v11 = vpop.permute.xlu0 %1633  ;;  %v6817_v0 = vld [vmem:[#allocation121_spill] sm:$0xff]  ;;  %v6818_v39 = vld [vmem:[#allocation122_spill] sm:$0xff] }
 0x263   : > { %v5139_v22 = vadd.f32 %v1001_v53, %v4765_v35  ;;  %v1007_v7 = vmul.f32 %v4556_v10, %v6812_v23  ;;  %v1008_v16 = vmul.f32 %v4556_v10, %v6813_v17  ;;  %6814 = vst [vmem:[#allocation69_spill] sm:$0xff] %v5145_v30  ;;  %6815 = vst [vmem:[#allocation70_spill] sm:$0xff] %v5147_v11  ;;  %v6819_v53 = vld [vmem:[#allocation123_spill] sm:$0xff]  ;;  %v6822_v30 = vld [vmem:[#allocation124_spill] sm:$0xff] }
 0x264   : > { %v5150_v28 = vadd.f32 %v1002_v33, %v4782_v9  ;;  %v1009_v14 = vmul.f32 %v4556_v10, %v6817_v0  ;;  %v1010_v35 = vmul.f32 %v4556_v10, %v6818_v39  ;;  %v1011_v29 = vmul.f32 %v4556_v10, %v6819_v53  ;;  %v3490_v9 = vld [vmem:[%s3669_s26 + $0x118] sm:$0xff]  ;;  %v3491_v33 = vld [vmem:[%s3669_s26 + $0x150] sm:$0xff]  ;;  %v6823_v0 = vld [vmem:[#allocation30_spill] sm:$0xff] }
 0x265   : > { %6811 = vst [vmem:[#allocation68_spill] sm:$0xff] %v5139_v22  ;;  %v5159_v23 = vadd.f32 %v1003_v25, %v4779_v46  ;;  %v5162_v17 = vadd.f32 %v1004_v37, %v4792_v43  ;;  %v1012_v11 = vmul.f32 %v4556_v10, %v6822_v30  ;;  %1995 = vperm.xlu1 %3202, %v3490_v9   ;;  %v6825_v39 = vld [vmem:[#allocation34_spill] sm:$0xff]  ;;  %v6827_v53 = vld [vmem:[#allocation125_spill] sm:$0xff]  ;;  %v6831_v9 = vld [vmem:[#allocation36_spill] sm:$0xff] }
 0x266   : > { %6816 = vst [vmem:[#allocation71_spill] sm:$0xff] %v5150_v28  ;;  %2023 = vperm.xlu0 %3203, %v3491_v33   ;;  %v5169_v22 = vadd.f32 %v1005_v13, %v6823_v0  ;;  %v5172_v28 = vadd.f32 %v1006_v42, %v6825_v39  ;;  %v1013_v46 = vmul.f32 %v4556_v10, %v6827_v53  ;;  %v6828_v25 = vld [vmem:[#allocation126_spill] sm:$0xff]  ;;  %v6829_v37 = vld [vmem:[#allocation33_spill] sm:$0xff]  ;;  %v6833_v33 = vld [vmem:[#allocation127_spill] sm:$0xff]  ;;  %v5188_v39 = vpop.permute.xlu1 %1621 }
 0x267   : > { %6820 = vst [vmem:[#allocation72_spill] sm:$0xff] %v5159_v23  ;;  %6821 = vst [vmem:[#allocation73_spill] sm:$0xff] %v5162_v17  ;;  %v1014_v43 = vmul.f32 %v4556_v10, %v6828_v25  ;;  %v5179_v30 = vadd.f32 %v1007_v7, %v6829_v37  ;;  %v5182_v23 = vadd.f32 %v1008_v16, %v6831_v9  ;;  %v6834_v0 = vld [vmem:[#allocation128_spill] sm:$0xff]  ;;  %v6837_v53 = vld [vmem:[#allocation35_spill] sm:$0xff] }
 0x268   : > { %6824 = vst [vmem:[#allocation74_spill] sm:$0xff] %v5169_v22  ;;  %6826 = vst [vmem:[#allocation75_spill] sm:$0xff] %v5172_v28  ;;  %v1015_v13 = vmul.f32 %v4556_v10, %v6833_v33  ;;  %v1016_v42 = vmul.f32 %v4556_v10, %v6834_v0  ;;  %v5190_v22 = vpop.permute.xlu0 %1641  ;;  %v5193_v28 = vadd.f32 %v1009_v14, %v6837_v53  ;;  %v6838_v25 = vld [vmem:[#allocation38_spill] sm:$0xff]  ;;  %v6839_v7 = vld [vmem:[#allocation37_spill] sm:$0xff] }
 0x269   : > { %6830 = vst [vmem:[#allocation76_spill] sm:$0xff] %v5179_v30  ;;  %6832 = vst [vmem:[#allocation77_spill] sm:$0xff] %v5182_v23  ;;  %v5196_v17 = vadd.f32 %v1010_v35, %v6838_v25  ;;  %v5199_v37 = vadd.f32 %v1011_v29, %v6839_v7  ;;  %v6841_v16 = vld [vmem:[#allocation129_spill] sm:$0xff]  ;;  %v6842_v33 = vld [vmem:[#allocation42_spill] sm:$0xff]  ;;  %v5216_v29 = vadd.f32 %v1014_v43, %v4852_v26 }
 0x26a   : > { %6835 = vst [vmem:[#allocation13_spill] sm:$0xff] %v5188_v39  ;;  %6836 = vst [vmem:[#allocation16_spill] sm:$0xff] %v5190_v22  ;;  %v1017_v9 = vmul.f32 %v4556_v10, %v6841_v16  ;;  %v5204_v30 = vadd.f32 %v1012_v11, %v6842_v33  ;;  %v6844_v0 = vld [vmem:[#allocation130_spill] sm:$0xff]  ;;  %v6845_v23 = vld [vmem:[#allocation7_spill] sm:$0xff]  ;;  %v5232_v43 = vpop.permute.xlu1 %1629 }
 0x26b   : > { %6840 = vst [vmem:[#allocation15_spill] sm:$0xff] %v5199_v37  ;;  %v1018_v39 = vmul.f32 %v4556_v10, %v6844_v0  ;;  %v1019_v22 = vmul.f32 %v4556_v10, %v6845_v23  ;;  %v3492_v14 = vld [vmem:[%s3669_s26 + $0x128] sm:$0xff]  ;;  %v3493_v53 = vld [vmem:[%s3669_s26 + $0x160] sm:$0xff]  ;;  %v6846_v35 = vld [vmem:[#allocation39_spill] sm:$0xff] }
 0x26c   : > { %6843 = vst [vmem:[#allocation17_spill] sm:$0xff] %v5204_v30  ;;  %2003 = vperm.xlu1 %3202, %v3492_v14   ;;  %2031 = vperm.xlu0 %3203, %v3493_v53   ;;  %v5213_v25 = vadd.f32 %v1013_v46, %v6846_v35  ;;  %6848 = vst [vmem:[#allocation78_spill] sm:$0xff] %v5216_v29  ;;  %v6849_v7 = vld [vmem:[#allocation12_spill] sm:$0xff]  ;;  %v6850_v16 = vld [vmem:[#allocation9_spill] sm:$0xff] }
 0x26d   : > { %v1020_v11 = vmul.f32 %v4556_v10, %v6849_v7  ;;  %v1021_v33 = vmul.f32 %v4556_v10, %v6850_v16  ;;  %v6851_v0 = vld [vmem:[#allocation43_spill] sm:$0xff]  ;;  %v6853_v14 = vld [vmem:[#allocation45_spill] sm:$0xff]  ;;  %v6855_v53 = vld [vmem:[#allocation14_spill] sm:$0xff]  ;;  %6857 = vst [vmem:[#allocation81_spill] sm:$0xff] %v5232_v43 }
 0x26e   : > { %6847 = vst [vmem:[#allocation3_spill] sm:$0xff] %v5213_v25  ;;  %v5223_v23 = vadd.f32 %v1015_v13, %v6851_v0  ;;  %v5226_v37 = vadd.f32 %v1016_v42, %v6853_v14  ;;  %v1022_v46 = vmul.f32 %v4556_v10, %v6855_v53  ;;  %v6856_v35 = vld [vmem:[#allocation131_spill] sm:$0xff]  ;;  %v5234_v25 = vpop.permute.xlu0 %1649  ;;  %v6859_v7 = vld [vmem:[#allocation44_spill] sm:$0xff]  ;;  %v6862_v0 = vld [vmem:[#allocation133_spill] sm:$0xff]  ;;  %v1726_v14 = vsub.s32 3, %v4500_v4 }
 0x26f   : > { %v1023_v26 = vmul.f32 %v4556_v10, %v6856_v35  ;;  %6858 = vst [vmem:[#allocation82_spill] sm:$0xff] %v5234_v25  ;;  %v5237_v29 = vadd.f32 %v1017_v9, %v6859_v7  ;;  %v6861_v16 = vld [vmem:[#allocation132_spill] sm:$0xff]  ;;  %v1025_v42 = vmul.f32 %v4556_v10, %v6862_v0  ;;  %v6866_v43 = vld [vmem:[#allocation134_spill] sm:$0xff]  ;;  %v3495_v9 = vld [vmem:[%s3669_s26 + $0x170] sm:$0xff] }
 0x270   : > { %6852 = vst [vmem:[#allocation79_spill] sm:$0xff] %v5223_v23  ;;  %6854 = vst [vmem:[#allocation80_spill] sm:$0xff] %v5226_v37  ;;  %v1024_v13 = vmul.f32 %v4556_v10, %v6861_v16  ;;  %v6863_v23 = vld [vmem:[#allocation47_spill] sm:$0xff]  ;;  %v6864_v37 = vld [vmem:[#allocation46_spill] sm:$0xff]  ;;  %v1026_v25 = vmul.f32 %v4556_v10, %v6866_v43  ;;  %2039 = vperm.xlu0 %3203, %v3495_v9  }
 0x271   : > { %6860 = vst [vmem:[#allocation83_spill] sm:$0xff] %v5237_v29  ;;  %v5245_v53 = vadd.f32 %v1018_v39, %v6863_v23  ;;  %v5248_v35 = vadd.f32 %v1019_v22, %v6864_v37  ;;  %v3494_v30 = vld [vmem:[%s3669_s26 + $0x138] sm:$0xff]  ;;  %v6867_v7 = vld [vmem:[#allocation51_spill] sm:$0xff]  ;;  %v6873_v37 = vld [vmem:[#allocation53_spill] sm:$0xff] }
 0x272   : > { %2011 = vperm.xlu1 %3202, %v3494_v30   ;;  %v5255_v16 = vadd.f32 %v1020_v11, %v6867_v7  ;;  %v6869_v29 = vld [vmem:[#allocation48_spill] sm:$0xff]  ;;  %v6871_v4 = vld [vmem:[#allocation135_spill] sm:$0xff]  ;;  %v5265_v10 = vadd.f32 %v1022_v46, %v6873_v37  ;;  %v6876_v9 = vld [vmem:[#allocation137_spill] sm:$0xff]  ;;  %v5287_v37 = vrot.slane %v4512_v50, %v1726_v14 }
 0x273   : > { %6865 = vst [vmem:[#allocation84_spill] sm:$0xff] %v5248_v35  ;;  %v5258_v0 = vadd.f32 %v1021_v33, %v6869_v29  ;;  %v1346_v39 = vmul.f32 %v4925_v61, %v6871_v4  ;;  %v6872_v23 = vld [vmem:[#allocation136_spill] sm:$0xff]  ;;  %v1348_v11 = vmul.f32 %v4925_v61, %v6876_v9  ;;  %v6877_v7 = vld [vmem:[#allocation138_spill] sm:$0xff]  ;;  %v5274_v33 = vpop.permute.xlu1 %1637  ;;  %v6880_v4 = vld [vmem:[#allocation55_spill] sm:$0xff] }
 0x274   : > { %6868 = vst [vmem:[#allocation85_spill] sm:$0xff] %v5255_v16  ;;  %v1347_v22 = vmul.f32 %v4925_v61, %v6872_v23  ;;  %v6874_v30 = vld [vmem:[#allocation52_spill] sm:$0xff]  ;;  %v1350_v29 = vmul.f32 %v4925_v61, %v6877_v7  ;;  %6878 = vst [vmem:[#allocation88_spill] sm:$0xff] %v5274_v33  ;;  %v5279_v35 = vadd.f32 %v1024_v13, %v6880_v4  ;;  %v6881_v23 = vld [vmem:[#allocation54_spill] sm:$0xff] }
 0x275   : > { %6870 = vst [vmem:[#allocation86_spill] sm:$0xff] %v5258_v0  ;;  %v5268_v43 = vadd.f32 %v1023_v26, %v6874_v30  ;;  %v5276_v0 = vpop.permute.xlu0 %1657  ;;  %v5282_v16 = vadd.f32 %v1025_v42, %v6881_v23  ;;  %v6883_v46 = vld [vmem:[#allocation139_spill] sm:$0xff]  ;;  %v6884_v30 = vld [vmem:[#allocation56_spill] sm:$0xff]  ;;  %v6886_v33 = vld [vmem:[#allocation141_spill] sm:$0xff]  ;;  %v5299_v42 = vadd.f32 %v1346_v39, %v4932_v12 }
 0x276   : > { %6879 = vst [vmem:[#allocation89_spill] sm:$0xff] %v5276_v0  ;;  %v1349_v26 = vmul.f32 %v4925_v61, %v6883_v46  ;;  %v5290_v9 = vadd.f32 %v1026_v25, %v6884_v30  ;;  %v6885_v7 = vld [vmem:[#allocation140_spill] sm:$0xff]  ;;  %v1351_v0 = vmul.f32 %v4925_v61, %v6886_v33  ;;  %v3496_v13 = vld [vmem:[%s3669_s26 + $0x148] sm:$0xff]  ;;  %v3497_v4 = vld [vmem:[%s3669_s26 + $0x180] sm:$0xff]  ;;  %v5302_v23 = vadd.f32 %v1347_v22, %v4938_v58 }
 0x277   : > { %6875 = vst [vmem:[#allocation87_spill] sm:$0xff] %v5268_v43  ;;  %6882 = vst [vmem:[#allocation90_spill] sm:$0xff] %v5282_v16  ;;  %v1352_v43 = vmul.f32 %v4925_v61, %v6885_v7  ;;  %2019 = vperm.xlu1 %3202, %v3496_v13   ;;  %2047 = vperm.xlu0 %3203, %v3497_v4   ;;  %v6887_v14 = vld [vmem:[#allocation142_spill] sm:$0xff]  ;;  %v6888_v46 = vld [vmem:[#allocation143_spill] sm:$0xff]  ;;  %v5309_v33 = vadd.f32 %v1348_v11, %v4935_v6  ;;  %v5318_v22 = vpop.permute.xlu1 %1645 }
 0x278   : > { %v1354_v25 = vmul.f32 %v4925_v61, %v6887_v14  ;;  %v1353_v30 = vmul.f32 %v4925_v61, %v6888_v46  ;;  %v5312_v7 = vadd.f32 %v1350_v29, %v4952_v55  ;;  %v6889_v13 = vld [vmem:[#allocation144_spill] sm:$0xff]  ;;  %v6890_v39 = vld [vmem:[#allocation145_spill] sm:$0xff]  ;;  %6891 = vst [vmem:[#allocation91_spill] sm:$0xff] %v5318_v22  ;;  %v5323_v14 = vadd.f32 %v1349_v26, %v4943_v51  ;;  %v6893_v46 = vld [vmem:[#allocation146_spill] sm:$0xff] }
 0x279   : > { %v1356_v12 = vmul.f32 %v4925_v61, %v6889_v13  ;;  %v1355_v58 = vmul.f32 %v4925_v61, %v6890_v39  ;;  %v5320_v4 = vpop.permute.xlu0 %1665  ;;  %v1358_v6 = vmul.f32 %v4925_v61, %v6893_v46  ;;  %v6894_v11 = vld [vmem:[#allocation147_spill] sm:$0xff]  ;;  %v6895_v29 = vld [vmem:[#allocation148_spill] sm:$0xff]  ;;  %v5332_v13 = vadd.f32 %v1352_v43, %v4962_v57  ;;  %v6896_v22 = vld [vmem:[#allocation149_spill] sm:$0xff] }
 0x27a   : > { %6892 = vst [vmem:[#allocation92_spill] sm:$0xff] %v5320_v4  ;;  %v1357_v55 = vmul.f32 %v4925_v61, %v6894_v11  ;;  %v1360_v16 = vmul.f32 %v4925_v61, %v6895_v29  ;;  %v5335_v39 = vadd.f32 %v1351_v0, %v4955_v52  ;;  %v1359_v4 = vmul.f32 %v4925_v61, %v6896_v22  ;;  %v3498_v51 = vld [vmem:[%s3669_s26 + $0x158] sm:$0xff]  ;;  %v3499_v26 = vld [vmem:[%s3669_s26 + $0x190] sm:$0xff]  ;;  %v6897_v29 = vld [vmem:[#allocation150_spill] sm:$0xff] }
 0x27b   : > { %2027 = vperm.xlu1 %3202, %v3498_v51   ;;  %2055 = vperm.xlu0 %3203, %v3499_v26   ;;  %v5342_v46 = vadd.f32 %v1354_v25, %v4976_v1  ;;  %v5345_v11 = vadd.f32 %v1353_v30, %v4965_v5  ;;  %v1362_v57 = vmul.f32 %v4925_v61, %v6897_v29  ;;  %v6898_v43 = vld [vmem:[#allocation151_spill] sm:$0xff]  ;;  %v6899_v51 = vld [vmem:[#allocation152_spill] sm:$0xff]  ;;  %v6900_v25 = vld [vmem:[#allocation153_spill] sm:$0xff]  ;;  %v5361_v30 = vpop.permute.xlu1 %1653 }
 0x27c   : > { %v1361_v52 = vmul.f32 %v4925_v61, %v6898_v43  ;;  %v5352_v0 = vadd.f32 %v1356_v12, %v4988_v56  ;;  %v5355_v22 = vadd.f32 %v1355_v58, %v4985_v63  ;;  %v1364_v1 = vmul.f32 %v4925_v61, %v6899_v51  ;;  %6901 = vst [vmem:[#allocation93_spill] sm:$0xff] %v5361_v30  ;;  %v6903_v63 = vld [vmem:[#allocation154_spill] sm:$0xff]  ;;  %v6904_v51 = vld [vmem:[#allocation155_spill] sm:$0xff]  ;;  %v6905_v30 = vld [vmem:[#allocation156_spill] sm:$0xff] }
 0x27d   : > { %v1363_v5 = vmul.f32 %v4925_v61, %v6900_v25  ;;  %v5363_v26 = vpop.permute.xlu0 %1673  ;;  %v5366_v29 = vadd.f32 %v1358_v6, %v4998_v19  ;;  %v5369_v43 = vadd.f32 %v1357_v55, %v4995_v59  ;;  %v5372_v56 = vadd.f32 %v1360_v16, %v5008_v49  ;;  %v3500_v19 = vld [vmem:[%s3669_s26 + $0x168] sm:$0xff]  ;;  %v3501_v6 = vld [vmem:[%s3669_s26 + $0x1a0] sm:$0xff] }
 0x27e   : > { %6902 = vst [vmem:[#allocation94_spill] sm:$0xff] %v5363_v26  ;;  %v1366_v12 = vmul.f32 %v4925_v61, %v6903_v63  ;;  %v5377_v58 = vadd.f32 %v1359_v4, %v5005_v18  ;;  %v1365_v25 = vmul.f32 %v4925_v61, %v6904_v51  ;;  %v1368_v26 = vmul.f32 %v4925_v61, %v6905_v30  ;;  %v6906_v16 = vld [vmem:[#allocation157_spill] sm:$0xff]  ;;  %v6907_v4 = vld [vmem:[#allocation158_spill] sm:$0xff]  ;;  %v6908_v51 = vld [vmem:[#allocation159_spill] sm:$0xff] }
 0x27f   : > { %2035 = vperm.xlu1 %3202, %v3500_v19   ;;  %2063 = vperm.xlu0 %3203, %v3501_v6   ;;  %v5386_v59 = vadd.f32 %v1362_v57, %v5022_v40  ;;  %v5389_v49 = vadd.f32 %v1361_v52, %v5019_v60  ;;  %v1367_v18 = vmul.f32 %v4925_v61, %v6906_v16  ;;  %v6909_v57 = vld [vmem:[#allocation160_spill] sm:$0xff]  ;;  %v5405_v52 = vpop.permute.xlu1 %1661  ;;  %v6912_v16 = vld [vmem:[#allocation161_spill] sm:$0xff] }
 0x280   : > { %v1370_v55 = vmul.f32 %v4925_v61, %v6907_v4  ;;  %v5396_v30 = vadd.f32 %v1364_v1, %v5030_v48  ;;  %v5399_v63 = vadd.f32 %v1363_v5, %v5025_v2  ;;  %v1369_v40 = vmul.f32 %v4925_v61, %v6908_v51  ;;  %6910 = vst [vmem:[#allocation95_spill] sm:$0xff] %v5405_v52  ;;  %v6913_v1 = vld [vmem:[#allocation162_spill] sm:$0xff]  ;;  %v6914_v5 = vld [vmem:[#allocation163_spill] sm:$0xff]  ;;  %v6915_v52 = vld [vmem:[#allocation164_spill] sm:$0xff] }
 0x281   : > { %v1372_v60 = vmul.f32 %v4925_v61, %v6909_v57  ;;  %v5407_v19 = vpop.permute.xlu0 %1681  ;;  %v5410_v6 = vadd.f32 %v1366_v12, %v5042_v32  ;;  %v1371_v48 = vmul.f32 %v4925_v61, %v6912_v16  ;;  %v1374_v2 = vmul.f32 %v4925_v61, %v6913_v1  ;;  %v3502_v32 = vld [vmem:[%s3669_s26 + $0x178] sm:$0xff]  ;;  %v3503_v12 = vld [vmem:[%s3669_s26 + $0x1b0] sm:$0xff] }
 0x282   : > { %6911 = vst [vmem:[#allocation96_spill] sm:$0xff] %v5407_v19  ;;  %v1373_v4 = vmul.f32 %v4925_v61, %v6914_v5  ;;  %v5419_v51 = vadd.f32 %v1365_v25, %v5039_v34  ;;  %v5422_v57 = vadd.f32 %v1368_v26, %v5052_v36  ;;  %v1376_v19 = vmul.f32 %v4925_v61, %v6915_v52  ;;  %v6916_v5 = vld [vmem:[#allocation165_spill] sm:$0xff]  ;;  %v6917_v25 = vld [vmem:[#allocation166_spill] sm:$0xff] }
 0x283   : > { %2043 = vperm.xlu1 %3202, %v3502_v32   ;;  %2071 = vperm.xlu0 %3203, %v3503_v12   ;;  %v5429_v16 = vadd.f32 %v1367_v18, %v5049_v27  ;;  %v5432_v1 = vadd.f32 %v1370_v55, %v5072_v45  ;;  %v1375_v34 = vmul.f32 %v4925_v61, %v6916_v5  ;;  %v6918_v32 = vld [vmem:[#allocation167_spill] sm:$0xff]  ;;  %v6919_v18 = vld [vmem:[#allocation168_spill] sm:$0xff]  ;;  %v5448_v55 = vpop.permute.xlu1 %1669 }
 0x284   : > { %v1378_v36 = vmul.f32 %v4925_v61, %v6917_v25  ;;  %v5439_v26 = vadd.f32 %v1369_v40, %v5063_v44  ;;  %v5442_v52 = vadd.f32 %v1372_v60, %v5082_v54  ;;  %v1377_v27 = vmul.f32 %v4925_v61, %v6918_v32  ;;  %6920 = vst [vmem:[#allocation97_spill] sm:$0xff] %v5448_v55  ;;  %v6922_v54 = vld [vmem:[#allocation169_spill] sm:$0xff]  ;;  %v6923_v32 = vld [vmem:[#allocation170_spill] sm:$0xff]  ;;  %v6924_v55 = vld [vmem:[#allocation171_spill] sm:$0xff] }
 0x285   : > { %v1380_v45 = vmul.f32 %v4925_v61, %v6919_v18  ;;  %v5450_v12 = vpop.permute.xlu0 %1689  ;;  %v5453_v5 = vadd.f32 %v1371_v48, %v5075_v8  ;;  %v5456_v25 = vadd.f32 %v1374_v2, %v5092_v3  ;;  %v5459_v44 = vadd.f32 %v1373_v4, %v5085_v38  ;;  %v3504_v8 = vld [vmem:[%s3669_s26 + $0x188] sm:$0xff]  ;;  %v3505_v48 = vld [vmem:[%s3669_s26 + $0x1c0] sm:$0xff]  ;;  %v6925_v2 = vld [vmem:[#allocation172_spill] sm:$0xff] }
 0x286   : > { %6921 = vst [vmem:[#allocation98_spill] sm:$0xff] %v5450_v12  ;;  %v1379_v40 = vmul.f32 %v4925_v61, %v6922_v54  ;;  %v5464_v60 = vadd.f32 %v1376_v19, %v5106_v31  ;;  %v1382_v18 = vmul.f32 %v4925_v61, %v6923_v32  ;;  %v1381_v12 = vmul.f32 %v4925_v61, %v6924_v55  ;;  %v6926_v19 = vld [vmem:[#allocation173_spill] sm:$0xff]  ;;  %v6928_v32 = vld [vmem:[#allocation174_spill] sm:$0xff] }
 0x287   : > { %2051 = vperm.xlu1 %3202, %v3504_v8   ;;  %2079 = vperm.xlu0 %3203, %v3505_v48   ;;  %v5473_v3 = vadd.f32 %v1375_v34, %v5095_v62  ;;  %v5476_v38 = vadd.f32 %v1378_v36, %v5112_v20  ;;  %v1384_v31 = vmul.f32 %v4925_v61, %v6925_v2  ;;  %v6929_v34 = vld [vmem:[#allocation175_spill] sm:$0xff]  ;;  %v5492_v36 = vpop.permute.xlu1 %1677  ;;  %v6933_v2 = vld [vmem:[#allocation176_spill] sm:$0xff] }
 0x288   : > { %v1383_v4 = vmul.f32 %v4925_v61, %v6926_v19  ;;  %v5483_v55 = vadd.f32 %v1377_v27, %v5109_v47  ;;  %v5486_v54 = vadd.f32 %v1380_v45, %v5126_v15  ;;  %v1386_v62 = vmul.f32 %v4925_v61, %v6928_v32  ;;  %6930 = vst [vmem:[#allocation100_spill] sm:$0xff] %v5492_v36  ;;  %v6934_v27 = vld [vmem:[#allocation177_spill] sm:$0xff]  ;;  %v6935_v45 = vld [vmem:[#allocation178_spill] sm:$0xff]  ;;  %v6938_v36 = vld [vmem:[#allocation179_spill] sm:$0xff] }
 0x289   : > { %v1385_v20 = vmul.f32 %v4925_v61, %v6929_v34  ;;  %v5494_v8 = vpop.permute.xlu0 %1697  ;;  %v5497_v48 = vadd.f32 %v1379_v40, %v5117_v41  ;;  %v1388_v47 = vmul.f32 %v4925_v61, %v6933_v2  ;;  %v1387_v15 = vmul.f32 %v4925_v61, %v6934_v27  ;;  %v3506_v41 = vld [vmem:[%s3669_s26 + $0x198] sm:$0xff]  ;;  %v3507_v40 = vld [vmem:[%s3669_s26 + $0x1d0] sm:$0xff] }
 0x28a   : > { %6927 = vst [vmem:[#allocation99_spill] sm:$0xff] %v5483_v55  ;;  %6931 = vst [vmem:[#allocation101_spill] sm:$0xff] %v5494_v8  ;;  %v1390_v19 = vmul.f32 %v4925_v61, %v6935_v45  ;;  %v5506_v32 = vadd.f32 %v1382_v18, %v5136_v21  ;;  %v5509_v34 = vadd.f32 %v1381_v12, %v5129_v24  ;;  %v6939_v2 = vld [vmem:[#allocation71_spill] sm:$0xff]  ;;  %v6941_v27 = vld [vmem:[#allocation68_spill] sm:$0xff] }
 0x28b   : > { %6932 = vst [vmem:[#allocation102_spill] sm:$0xff] %v5497_v48  ;;  %v1389_v8 = vmul.f32 %v4925_v61, %v6938_v36  ;;  %2059 = vperm.xlu1 %3202, %v3506_v41   ;;  %2087 = vperm.xlu0 %3203, %v3507_v40   ;;  %v5516_v48 = vadd.f32 %v1384_v31, %v6939_v2  ;;  %v6943_v45 = vld [vmem:[#allocation180_spill] sm:$0xff]  ;;  %v6944_v18 = vld [vmem:[#allocation181_spill] sm:$0xff]  ;;  %v6949_v40 = vld [vmem:[#allocation182_spill] sm:$0xff] }
 0x28c   : > { %6936 = vst [vmem:[#allocation103_spill] sm:$0xff] %v5506_v32  ;;  %6937 = vst [vmem:[#allocation104_spill] sm:$0xff] %v5509_v34  ;;  %v5519_v55 = vadd.f32 %v1383_v4, %v6941_v27  ;;  %v1392_v21 = vmul.f32 %v4925_v61, %v6943_v45  ;;  %v1391_v24 = vmul.f32 %v4925_v61, %v6944_v18  ;;  %v6945_v12 = vld [vmem:[#allocation73_spill] sm:$0xff]  ;;  %v6947_v41 = vld [vmem:[#allocation72_spill] sm:$0xff]  ;;  %v5535_v27 = vpop.permute.xlu1 %1685 }
 0x28d   : > { %6940 = vst [vmem:[#allocation105_spill] sm:$0xff] %v5516_v48  ;;  %v5526_v36 = vadd.f32 %v1386_v62, %v6945_v12  ;;  %v5529_v34 = vadd.f32 %v1385_v20, %v6947_v41  ;;  %v1394_v31 = vmul.f32 %v4925_v61, %v6949_v40  ;;  %v6950_v2 = vld [vmem:[#allocation183_spill] sm:$0xff]  ;;  %6951 = vst [vmem:[#allocation109_spill] sm:$0xff] %v5535_v27  ;;  %v6954_v18 = vld [vmem:[#allocation74_spill] sm:$0xff] }
 0x28e   : > { %6942 = vst [vmem:[#allocation106_spill] sm:$0xff] %v5519_v55  ;;  %v1393_v4 = vmul.f32 %v4925_v61, %v6950_v2  ;;  %v5537_v55 = vpop.permute.xlu0 %1705  ;;  %v6953_v45 = vld [vmem:[#allocation75_spill] sm:$0xff]  ;;  %v5543_v32 = vadd.f32 %v1387_v15, %v6954_v18  ;;  %v6956_v62 = vld [vmem:[#allocation77_spill] sm:$0xff]  ;;  %v6957_v20 = vld [vmem:[#allocation184_spill] sm:$0xff]  ;;  %v5560_v15 = vadd.f32 %v1392_v21, %v5196_v17 }
 0x28f   : > { %6946 = vst [vmem:[#allocation107_spill] sm:$0xff] %v5526_v36  ;;  %6948 = vst [vmem:[#allocation108_spill] sm:$0xff] %v5529_v34  ;;  %v5540_v48 = vadd.f32 %v1388_v47, %v6953_v45  ;;  %v5546_v12 = vadd.f32 %v1390_v19, %v6956_v62  ;;  %v1396_v41 = vmul.f32 %v4925_v61, %v6957_v20  ;;  %v6958_v40 = vld [vmem:[#allocation76_spill] sm:$0xff]  ;;  %v3508_v47 = vld [vmem:[%s3669_s26 + $0x1a8] sm:$0xff] }
 0x290   : > { %6952 = vst [vmem:[#allocation110_spill] sm:$0xff] %v5537_v55  ;;  %6955 = vst [vmem:[#allocation111_spill] sm:$0xff] %v5543_v32  ;;  %v5551_v34 = vadd.f32 %v1389_v8, %v6958_v40  ;;  %v6960_v2 = vld [vmem:[#allocation4_spill] sm:$0xff]  ;;  %2067 = vperm.xlu1 %3202, %v3508_v47   ;;  %v3509_v45 = vld [vmem:[%s3669_s26 + $0x1e0] sm:$0xff]  ;;  %v5563_v19 = vadd.f32 %v1391_v24, %v5193_v28  ;;  %v5579_v24 = vpop.permute.xlu1 %1693 }
 0x291   : > { %v1395_v27 = vmul.f32 %v4925_v61, %v6960_v2  ;;  %v6961_v36 = vld [vmem:[#allocation8_spill] sm:$0xff]  ;;  %2095 = vperm.xlu0 %3203, %v3509_v45   ;;  %6962 = vst [vmem:[#allocation113_spill] sm:$0xff] %v5560_v15  ;;  %v6964_v18 = vld [vmem:[#allocation5_spill] sm:$0xff]  ;;  %v6965_v62 = vld [vmem:[#allocation10_spill] sm:$0xff] }
 0x292   : > { %6959 = vst [vmem:[#allocation112_spill] sm:$0xff] %v5551_v34  ;;  %v1398_v55 = vmul.f32 %v4925_v61, %v6961_v36  ;;  %6963 = vst [vmem:[#allocation114_spill] sm:$0xff] %v5563_v19  ;;  %v1397_v8 = vmul.f32 %v4925_v61, %v6964_v18  ;;  %v1400_v20 = vmul.f32 %v4925_v61, %v6965_v62  ;;  %v6966_v40 = vld [vmem:[#allocation17_spill] sm:$0xff]  ;;  %v6968_v2 = vld [vmem:[#allocation15_spill] sm:$0xff]  ;;  %v5581_v19 = vpop.permute.xlu0 %1713 }
 0x293   : > { %v5570_v36 = vadd.f32 %v1394_v31, %v6966_v40  ;;  %v5573_v47 = vadd.f32 %v1393_v4, %v6968_v2  ;;  %v6970_v45 = vld [vmem:[#allocation6_spill] sm:$0xff]  ;;  %v6971_v21 = vld [vmem:[#allocation185_spill] sm:$0xff]  ;;  %6972 = vst [vmem:[#allocation117_spill] sm:$0xff] %v5579_v24  ;;  %6973 = vst [vmem:[#allocation118_spill] sm:$0xff] %v5581_v19 }
 0x294   : > { %v1399_v17 = vmul.f32 %v4925_v61, %v6970_v45  ;;  %v1402_v28 = vmul.f32 %v4925_v61, %v6971_v21  ;;  %v6974_v18 = vld [vmem:[#allocation78_spill] sm:$0xff]  ;;  %v6977_v40 = vld [vmem:[#allocation187_spill] sm:$0xff]  ;;  %v6978_v2 = vld [vmem:[#allocation188_spill] sm:$0xff] }
 0x295   : > { %6967 = vst [vmem:[#allocation115_spill] sm:$0xff] %v5570_v36  ;;  %6969 = vst [vmem:[#allocation116_spill] sm:$0xff] %v5573_v47  ;;  %v5584_v34 = vadd.f32 %v1396_v41, %v6974_v18  ;;  %v6976_v62 = vld [vmem:[#allocation186_spill] sm:$0xff]  ;;  %v1404_v4 = vmul.f32 %v4925_v61, %v6977_v40  ;;  %v1403_v47 = vmul.f32 %v4925_v61, %v6978_v2  ;;  %v6979_v45 = vld [vmem:[#allocation3_spill] sm:$0xff] }
 0x296   : > { %v1401_v31 = vmul.f32 %v4925_v61, %v6976_v62  ;;  %v5593_v36 = vadd.f32 %v1395_v27, %v6979_v45  ;;  %v6981_v21 = vld [vmem:[#allocation80_spill] sm:$0xff]  ;;  %v6982_v24 = vld [vmem:[#allocation189_spill] sm:$0xff]  ;;  %v3511_v18 = vld [vmem:[%s3669_s26 + $0x1f0] sm:$0xff]  ;;  %v5607_v2 = vadd.f32 %v1400_v20, %v5245_v53  ;;  %v5623_v20 = vpop.permute.xlu1 %1701 }
 0x297   : > { %6975 = vst [vmem:[#allocation119_spill] sm:$0xff] %v5584_v34  ;;  %v5596_v15 = vadd.f32 %v1398_v55, %v6981_v21  ;;  %v1406_v19 = vmul.f32 %v4925_v61, %v6982_v24  ;;  %v3510_v41 = vld [vmem:[%s3669_s26 + $0x1b8] sm:$0xff]  ;;  %2103 = vperm.xlu0 %3203, %v3511_v18   ;;  %v6983_v62 = vld [vmem:[#allocation195_spill] sm:$0xff]  ;;  %v6987_v27 = vld [vmem:[#allocation190_spill] sm:$0xff] }
 0x298   : > { %6980 = vst [vmem:[#allocation120_spill] sm:$0xff] %v5593_v36  ;;  %2075 = vperm.xlu1 %3202, %v3510_v41   ;;  %v2108_v34 = vsub.s32 4, %v6983_v62  ;;  %v6984_v32 = vld [vmem:[#allocation79_spill] sm:$0xff]  ;;  %6986 = vst [vmem:[#allocation122_spill] sm:$0xff] %v5607_v2  ;;  %v1408_v55 = vmul.f32 %v4925_v61, %v6987_v27  ;;  %v6988_v45 = vld [vmem:[#allocation192_spill] sm:$0xff] }
 0x299   : > { %v5604_v40 = vadd.f32 %v1397_v8, %v6984_v32  ;;  %v1729_v21 = vmul.f32 %v5287_v37, %v6988_v45  ;;  %v6989_v24 = vld [vmem:[#allocation83_spill] sm:$0xff]  ;;  %v6990_v41 = vld [vmem:[#allocation85_spill] sm:$0xff]  ;;  %v6992_v8 = vld [vmem:[#allocation194_spill] sm:$0xff]  ;;  %6993 = vst [vmem:[#allocation123_spill] sm:$0xff] %v5623_v20  ;;  %v5631_v45 = vadd.f32 %v1404_v4, %v5265_v10 }
 0x29a   : > { %v5614_v36 = vadd.f32 %v1399_v17, %v6989_v24  ;;  %v5617_v18 = vadd.f32 %v1402_v28, %v6990_v41  ;;  %v6991_v62 = vld [vmem:[#allocation193_spill] sm:$0xff]  ;;  %v1732_v53 = vmul.f32 %v5287_v37, %v6992_v8  ;;  %v6995_v27 = vld [vmem:[#allocation84_spill] sm:$0xff]  ;;  %v6996_v17 = vld [vmem:[#allocation86_spill] sm:$0xff]  ;;  %v5649_v10 = vrot.slane %v4512_v50, %v2108_v34 }
 0x29b   : > { %6985 = vst [vmem:[#allocation121_spill] sm:$0xff] %v5604_v40  ;;  %v1728_v32 = vmul.f32 %v5287_v37, %v6991_v62  ;;  %v5625_v40 = vpop.permute.xlu0 %1721  ;;  %v5628_v2 = vadd.f32 %v1401_v31, %v6995_v27  ;;  %v5634_v24 = vadd.f32 %v1403_v47, %v6996_v17  ;;  %v6998_v28 = vld [vmem:[#allocation196_spill] sm:$0xff]  ;;  %v5639_v62 = vadd.f32 %v1406_v19, %v5279_v35  ;;  %v6999_v8 = vld [vmem:[#allocation11_spill] sm:$0xff]  ;;  %v3512_v27 = vld [vmem:[%s3669_s26 + $0x1c8] sm:$0xff] }
 0x29c   : > { %6994 = vst [vmem:[#allocation124_spill] sm:$0xff] %v5625_v40  ;;  %v1730_v41 = vmul.f32 %v5287_v37, %v6998_v28  ;;  %v5643_v20 = vmul.f32 %v4925_v61, %v6999_v8  ;;  %v7001_v40 = vld [vmem:[#allocation197_spill] sm:$0xff]  ;;  %2083 = vperm.xlu1 %3202, %v3512_v27   ;;  %v5652_v47 = vadd.f32 %v1408_v55, %v5290_v9  ;;  %v7002_v17 = vld [vmem:[#allocation198_spill] sm:$0xff]  ;;  %v7003_v19 = vld [vmem:[#allocation199_spill] sm:$0xff]  ;;  %v5665_v55 = vpop.permute.xlu1 %1709 }
 0x29d   : > { %6997 = vst [vmem:[#allocation30_spill] sm:$0xff] %v5634_v24  ;;  %v1734_v31 = vmul.f32 %v5287_v37, %v7001_v40  ;;  %v1792_v4 = vadd.f32 %v1729_v21, %v5302_v23  ;;  %v1731_v35 = vmul.f32 %v5287_v37, %v7002_v17  ;;  %v1736_v28 = vmul.f32 %v5287_v37, %v7003_v19  ;;  %v7004_v27 = vld [vmem:[#allocation200_spill] sm:$0xff]  ;;  %v7005_v34 = vld [vmem:[#allocation201_spill] sm:$0xff]  ;;  %v7007_v21 = vld [vmem:[#allocation18_spill] sm:$0xff] }
 0x29e   : > { %7000 = vst [vmem:[#allocation34_spill] sm:$0xff] %v5643_v20  ;;  %v1791_v8 = vadd.f32 %v1728_v32, %v5299_v42  ;;  %v1795_v40 = vadd.f32 %v1732_v53, %v5312_v7  ;;  %v1733_v50 = vmul.f32 %v5287_v37, %v7004_v27  ;;  %v1738_v9 = vmul.f32 %v5287_v37, %v7005_v34  ;;  %v7008_v61 = vld [vmem:[#allocation19_spill] sm:$0xff]  ;;  %v7009_v42 = vld [vmem:[#allocation20_spill] sm:$0xff]  ;;  %v7010_v27 = vld [vmem:[#allocation21_spill] sm:$0xff] }
 0x29f   : > { %7006 = vst [vmem:[#allocation125_spill] sm:$0xff] %v5665_v55  ;;  %v5668_v23 = vadd.f32 %v1730_v41, %v5309_v33  ;;  %v1735_v17 = vmul.f32 %v5287_v37, %v7007_v21  ;;  %v1740_v19 = vmul.f32 %v5287_v37, %v7008_v61  ;;  %v1737_v7 = vmul.f32 %v5287_v37, %v7009_v42  ;;  %v1860_v32 = vpop.permute.xlu0 %1859  ;;  %v7011_v24 = vld [vmem:[#allocation22_spill] sm:$0xff]  ;;  %v3513_v41 = vld [vmem:[%s3669_s26 + $0x1d8] sm:$0xff]  ;;  %v7012_v42 = vld [vmem:[#allocation23_spill] sm:$0xff] }
 0x2a0   : > { %v1797_v53 = vadd.f32 %v1734_v31, %v5332_v13  ;;  %v1742_v34 = vmul.f32 %v5287_v37, %v7010_v27  ;;  %v1739_v20 = vmul.f32 %v5287_v37, %v7011_v24  ;;  %v2111_v33 = vmul.f32 %v5649_v10, %v1860_v32  ;;  %2091 = vperm.xlu1 %3202, %v3513_v41   ;;  %v7013_v13 = vld [vmem:[#allocation24_spill] sm:$0xff]  ;;  %v7014_v32 = vld [vmem:[#allocation25_spill] sm:$0xff]  ;;  %v5701_v41 = vpop.permute.xlu1 %1717 }
 0x2a1   : > { %v5684_v21 = vadd.f32 %v1731_v35, %v5323_v14  ;;  %v5687_v61 = vadd.f32 %v1736_v28, %v5342_v46  ;;  %v1744_v55 = vmul.f32 %v5287_v37, %v7012_v42  ;;  %v1741_v31 = vmul.f32 %v5287_v37, %v7013_v13  ;;  %v7017_v13 = vld [vmem:[#allocation28_spill] sm:$0xff] }
 0x2a2   : > { %v5694_v27 = vadd.f32 %v1733_v50, %v5335_v39  ;;  %v5697_v24 = vadd.f32 %v1738_v9, %v5352_v0  ;;  %v1746_v14 = vmul.f32 %v5287_v37, %v7014_v32  ;;  %v2174_v35 = vadd.f32 %v2111_v33, %v1792_v4  ;;  %v7015_v39 = vld [vmem:[#allocation26_spill] sm:$0xff] }
 0x2a3   : > { %v5704_v46 = vadd.f32 %v1735_v17, %v5345_v11  ;;  %v5707_v28 = vadd.f32 %v1740_v19, %v5366_v29  ;;  %v5710_v42 = vadd.f32 %v1737_v7, %v5355_v22  ;;  %v1743_v50 = vmul.f32 %v5287_v37, %v7015_v39  ;;  %v1872_v0 = vpop.permute.xlu0 %1871  ;;  %v3514_v17 = vld [vmem:[%s3669_s26 + $0x1e8] sm:$0xff]  ;;  %v7016_v19 = vld [vmem:[#allocation27_spill] sm:$0xff] }
 0x2a4   : > { %v5715_v9 = vadd.f32 %v1742_v34, %v5372_v56  ;;  %v5718_v4 = vadd.f32 %v1739_v20, %v5369_v43  ;;  %v2237_v33 = vsub.f32 0.0, %v2174_v35  ;;  %v2114_v11 = vmul.f32 %v5649_v10, %v1872_v0  ;;  %2099 = vperm.xlu1 %3202, %v3514_v17   ;;  %v7018_v20 = vld [vmem:[#allocation29_spill] sm:$0xff]  ;;  %v7021_v0 = vld [vmem:[#allocation40_spill] sm:$0xff] }
 0x2a5   : > { %v5723_v29 = vadd.f32 %v1744_v55, %v5386_v59  ;;  %v5726_v22 = vadd.f32 %v1741_v31, %v5377_v58  ;;  %v1748_v7 = vmul.f32 %v5287_v37, %v7016_v19  ;;  %v1745_v56 = vmul.f32 %v5287_v37, %v7017_v13  ;;  %v7019_v55 = vld [vmem:[#allocation31_spill] sm:$0xff]  ;;  %v7020_v31 = vld [vmem:[#allocation32_spill] sm:$0xff]  ;;  %v1856_v19 = vpop.permute.xlu1 %1855 }
 0x2a6   : > { %v5733_v43 = vadd.f32 %v1746_v14, %v5396_v30  ;;  %v1750_v34 = vmul.f32 %v5287_v37, %v7018_v20  ;;  %v2301_v32 = vmul.f32 1.442695, %v2237_v33  ;;  %v2177_v35 = vadd.f32 %v2114_v11, %v1795_v40  ;;  %v7022_v33 = vld [vmem:[#allocation41_spill] sm:$0xff] }
 0x2a7   : > { %v5738_v59 = vadd.f32 %v1743_v50, %v5389_v49  ;;  %v1747_v58 = vmul.f32 %v5287_v37, %v7019_v55  ;;  %v1752_v39 = vmul.f32 %v5287_v37, %v7020_v31  ;;  %v1749_v17 = vmul.f32 %v5287_v37, %v7021_v0  ;;  %v1880_v30 = vpop.permute.xlu0 %1879  ;;  %v7023_v20 = vld [vmem:[#allocation49_spill] sm:$0xff] }
 0x2a8   : > { %3204 = vpow2.f32 %v2301_v32  ;;  %v2240_v14 = vsub.f32 0.0, %v2177_v35  ;;  %v2110_v13 = vmul.f32 %v5649_v10, %v1856_v19  ;;  %v2116_v40 = vmul.f32 %v5649_v10, %v1880_v30 }
 0x2a9   : > { %v5749_v49 = vadd.f32 %v1748_v7, %v5410_v6  ;;  %v5752_v50 = vadd.f32 %v1745_v56, %v5399_v63  ;;  %v1754_v11 = vmul.f32 %v5287_v37, %v7022_v33  ;;  %v1751_v55 = vmul.f32 %v5287_v37, %v7023_v20  ;;  %v7024_v7 = vld [vmem:[#allocation50_spill] sm:$0xff]  ;;  %v1864_v30 = vpop.permute.xlu1 %1863 }
 0x2aa   : > { %v5759_v31 = vadd.f32 %v1750_v34, %v5422_v57  ;;  %v2307_v32 = vmul.f32 1.442695, %v2240_v14  ;;  %v2173_v35 = vadd.f32 %v2110_v13, %v1791_v8  ;;  %v2179_v0 = vadd.f32 %v2116_v40, %v1797_v53 }
 0x2ab   : > { %v5762_v19 = vadd.f32 %v1747_v58, %v5419_v51  ;;  %v5765_v6 = vadd.f32 %v1752_v39, %v5432_v1  ;;  %v5768_v63 = vadd.f32 %v1749_v17, %v5429_v16  ;;  %v1756_v56 = vmul.f32 %v5287_v37, %v7024_v7  ;;  %v1888_v33 = vpop.permute.xlu0 %1887  ;;  %v7025_v1 = vld [vmem:[#allocation58_spill] sm:$0xff]  ;;  %v7026_v39 = vld [vmem:[#allocation59_spill] sm:$0xff] }
 0x2ac   : > { %3206 = vpow2.f32 %v2307_v32  ;;  %v2236_v57 = vsub.f32 0.0, %v2173_v35  ;;  %v2242_v34 = vsub.f32 0.0, %v2179_v0  ;;  %v2112_v8 = vmul.f32 %v5649_v10, %v1864_v30 }
 0x2ad   : > { %v5774_v53 = vadd.f32 %v1754_v11, %v5442_v52  ;;  %v5777_v51 = vadd.f32 %v1751_v55, %v5439_v26  ;;  %v1753_v16 = vmul.f32 %v5287_v37, %v7025_v1  ;;  %v2118_v58 = vmul.f32 %v5649_v10, %v1888_v33  ;;  %v7027_v52 = vld [vmem:[#allocation60_spill] sm:$0xff]  ;;  %v7028_v26 = vld [vmem:[#allocation61_spill] sm:$0xff]  ;;  %v1868_v35 = vpop.permute.xlu1 %1867 }
 0x2ae   : > { %v1758_v17 = vmul.f32 %v5287_v37, %v7026_v39  ;;  %v2299_v14 = vmul.f32 1.442695, %v2236_v57  ;;  %v2311_v13 = vmul.f32 1.442695, %v2242_v34  ;;  %v2175_v40 = vadd.f32 %v2112_v8, %v5668_v23 }
 0x2af   : > { %v5786_v20 = vadd.f32 %v1756_v56, %v5456_v25  ;;  %v1755_v11 = vmul.f32 %v5287_v37, %v7027_v52  ;;  %v1760_v55 = vmul.f32 %v5287_v37, %v7028_v26  ;;  %v2181_v32 = vadd.f32 %v2118_v58, %v5687_v61  ;;  %v1896_v0 = vpop.permute.xlu0 %1895  ;;  %v7029_v25 = vld [vmem:[#allocation62_spill] sm:$0xff] }
 0x2b0   : > { %3208 = vpow2.f32 %v2299_v14  ;;  %v2238_v7 = vsub.f32 0.0, %v2175_v40  ;;  %v2113_v30 = vmul.f32 %v5649_v10, %v1868_v35  ;;  %v2120_v33 = vmul.f32 %v5649_v10, %v1896_v0  ;;  %v7031_v35 = vld [vmem:[#allocation64_spill] sm:$0xff] }
 0x2b1   : > { %v5796_v23 = vadd.f32 %v1753_v16, %v5453_v5  ;;  %v1757_v56 = vmul.f32 %v5287_v37, %v7029_v25  ;;  %3210 = vpow2.f32 %v2311_v13  ;;  %v2244_v57 = vsub.f32 0.0, %v2181_v32  ;;  %v1876_v13 = vpop.permute.xlu1 %1875 }
 0x2b2   : > { %v3205_v34 = vpop.eup %3204  ;;  %v5801_v8 = vadd.f32 %v1758_v17, %v5464_v60  ;;  %v2303_v61 = vmul.f32 1.442695, %v2238_v7  ;;  %v2176_v1 = vadd.f32 %v2113_v30, %v5684_v21  ;;  %v2183_v58 = vadd.f32 %v2120_v33, %v5697_v24  ;;  %v7030_v24 = vld [vmem:[#allocation63_spill] sm:$0xff]  ;;  %v7032_v7 = vld [vmem:[#allocation65_spill] sm:$0xff] }
 0x2b3   : > { %v5806_v39 = vadd.f32 %v1755_v11, %v5459_v44  ;;  %v5809_v5 = vadd.f32 %v1760_v55, %v5476_v38  ;;  %v2426_v16 = vadd.f32 1.0, %v3205_v34  ;;  %v2315_v14 = vmul.f32 1.442695, %v2244_v57  ;;  %v1904_v40 = vpop.permute.xlu0 %1903 }
 0x2b4   : > { %3212 = vpow2.f32 %v2303_v61  ;;  %v2239_v52 = vsub.f32 0.0, %v2176_v1  ;;  %v2246_v60 = vsub.f32 0.0, %v2183_v58  ;;  %v2115_v17 = vmul.f32 %v5649_v10, %v1876_v13 }
 0x2b5   : > { %v5813_v21 = vadd.f32 %v1757_v56, %v5473_v3  ;;  %v1762_v44 = vmul.f32 %v5287_v37, %v7030_v24  ;;  %3214 = vrcp.f32 %v2426_v16  ;;  %v2122_v38 = vmul.f32 %v5649_v10, %v1904_v40  ;;  %v1884_v25 = vpop.permute.xlu1 %1883 }
 0x2b6   : > { %v3207_v11 = vpop.eup %3206  ;;  %3216 = vpow2.f32 %v2315_v14  ;;  %v2305_v26 = vmul.f32 1.442695, %v2239_v52  ;;  %v2319_v55 = vmul.f32 1.442695, %v2246_v60  ;;  %v2178_v32 = vadd.f32 %v2115_v17, %v5694_v27  ;;  %v7033_v27 = vld [vmem:[#allocation66_spill] sm:$0xff]  ;;  %v7034_v60 = vld [vmem:[#allocation99_spill] sm:$0xff] }
 0x2b7   : > { %v1759_v0 = vmul.f32 %v5287_v37, %v7031_v35  ;;  %v1764_v3 = vmul.f32 %v5287_v37, %v7032_v7  ;;  %v2429_v30 = vadd.f32 1.0, %v3207_v11  ;;  %v2185_v33 = vadd.f32 %v2122_v38, %v5707_v28  ;;  %v1912_v56 = vpop.permute.xlu0 %1911  ;;  %v7036_v7 = vld [vmem:[#allocation67_spill] sm:$0xff] }
 0x2b8   : > { %3218 = vpow2.f32 %v2305_v26  ;;  %v2241_v57 = vsub.f32 0.0, %v2178_v32  ;;  %v2117_v34 = vmul.f32 %v5649_v10, %v1884_v25  ;;  %v2124_v61 = vmul.f32 %v5649_v10, %v1912_v56 }
 0x2b9   : > { %v5828_v1 = vadd.f32 %v1762_v44, %v5486_v54  ;;  %v1761_v58 = vmul.f32 %v5287_v37, %v7033_v27  ;;  %3220 = vrcp.f32 %v2429_v30  ;;  %v2248_v16 = vsub.f32 0.0, %v2185_v33  ;;  %v7035_v54 = vld [vmem:[#allocation103_spill] sm:$0xff]  ;;  %v1892_v11 = vpop.permute.xlu1 %1891 }
 0x2ba   : > { %v3209_v14 = vpop.eup %3208  ;;  %3222 = vpow2.f32 %v2319_v55  ;;  %v2309_v28 = vmul.f32 1.442695, %v2241_v57  ;;  %v2180_v13 = vadd.f32 %v2117_v34, %v5704_v46  ;;  %v2187_v40 = vadd.f32 %v2124_v61, %v5715_v9 }
 0x2bb   : > { %v3211_v52 = vpop.eup %3210  ;;  %v5837_v17 = vadd.f32 %v1759_v0, %v7034_v60  ;;  %v5840_v24 = vadd.f32 %v1764_v3, %v7035_v54  ;;  %v2425_v44 = vadd.f32 1.0, %v3209_v14  ;;  %v2323_v38 = vmul.f32 1.442695, %v2248_v16  ;;  %v1920_v26 = vpop.permute.xlu0 %1919  ;;  %v7037_v3 = vld [vmem:[#allocation102_spill] sm:$0xff] }
 0x2bc   : > { %v2431_v32 = vadd.f32 1.0, %v3211_v52  ;;  %3224 = vpow2.f32 %v2309_v28  ;;  %v2243_v35 = vsub.f32 0.0, %v2180_v13  ;;  %v2250_v55 = vsub.f32 0.0, %v2187_v40  ;;  %v7038_v13 = vld [vmem:[#allocation69_spill] sm:$0xff] }
 0x2bd   : > { %v1766_v46 = vmul.f32 %v5287_v37, %v7036_v7  ;;  %3226 = vrcp.f32 %v2425_v44  ;;  %v2119_v9 = vmul.f32 %v5649_v10, %v1892_v11  ;;  %v2126_v0 = vmul.f32 %v5649_v10, %v1920_v26  ;;  %v1900_v16 = vpop.permute.xlu1 %1899  ;;  %v7039_v44 = vld [vmem:[#allocation70_spill] sm:$0xff] }
 0x2be   : > { %v3213_v30 = vpop.eup %3212  ;;  %v5847_v33 = vadd.f32 %v1761_v58, %v7037_v3  ;;  %3228 = vrcp.f32 %v2431_v32  ;;  %v2313_v25 = vmul.f32 1.442695, %v2243_v35  ;;  %v2327_v56 = vmul.f32 1.442695, %v2250_v55 }
 0x2bf   : > { %v3215_v57 = vpop.eup %3214  ;;  %v2427_v34 = vadd.f32 1.0, %v3213_v30  ;;  %3230 = vpow2.f32 %v2323_v38  ;;  %v2182_v61 = vadd.f32 %v2119_v9, %v5710_v42  ;;  %v2189_v27 = vadd.f32 %v2126_v0, %v5723_v29  ;;  %v1928_v14 = vpop.permute.xlu0 %1927 }
 0x2c0   : > { %v3217_v28 = vpop.eup %3216  ;;  %v1763_v40 = vmul.f32 %v5287_v37, %v7038_v13  ;;  %2553 = vst.msk [vmem:[%s5854_s6 + $0x8] sm:$0xff] %vm2551_vm0, %v3215_v57  ;;  %3232 = vpow2.f32 %v2313_v25  ;;  %v2121_v58 = vmul.f32 %v5649_v10, %v1900_v16  ;;  %v2128_v52 = vmul.f32 %v5649_v10, %v1928_v14  ;;  %v7042_v14 = vld [vmem:[#allocation107_spill] sm:$0xff] }
 0x2c1   : > { %3234 = vrcp.f32 %v2427_v34  ;;  %v2433_v42 = vadd.f32 1.0, %v3217_v28  ;;  %v2245_v29 = vsub.f32 0.0, %v2182_v61  ;;  %v2252_v60 = vsub.f32 0.0, %v2189_v27  ;;  %v1908_v9 = vpop.permute.xlu1 %1907  ;;  %v7040_v34 = vld [vmem:[#allocation105_spill] sm:$0xff] }
 0x2c2   : > { %v3219_v54 = vpop.eup %3218  ;;  %v1768_v38 = vmul.f32 %v5287_v37, %v7039_v44  ;;  %3236 = vpow2.f32 %v2327_v56  ;;  %v2184_v11 = vadd.f32 %v2121_v58, %v5718_v4  ;;  %v2191_v26 = vadd.f32 %v2128_v52, %v5733_v43  ;;  %v7041_v43 = vld [vmem:[#allocation104_spill] sm:$0xff] }
 0x2c3   : > { %v3221_v32 = vpop.eup %3220  ;;  %3238 = vrcp.f32 %v2433_v42  ;;  %v2428_v35 = vadd.f32 1.0, %v3219_v54  ;;  %v2317_v55 = vmul.f32 1.442695, %v2245_v29  ;;  %v2331_v7 = vmul.f32 1.442695, %v2252_v60  ;;  %v1936_v0 = vpop.permute.xlu0 %1935 }
 0x2c4   : > { %v3223_v30 = vpop.eup %3222  ;;  %2556 = vst.msk [vmem:[%s5854_s6 + $0x20] sm:$0xff] %vm2551_vm0, %v3221_v32  ;;  %v2247_v3 = vsub.f32 0.0, %v2184_v11  ;;  %v2254_v25 = vsub.f32 0.0, %v2191_v26  ;;  %v2123_v57 = vmul.f32 %v5649_v10, %v1908_v9  ;;  %v2130_v56 = vmul.f32 %v5649_v10, %v1936_v0 }
 0x2c5   : > { %v5869_v4 = vadd.f32 %v1766_v46, %v7040_v34  ;;  %v5872_v61 = vadd.f32 %v1763_v40, %v7041_v43  ;;  %3240 = vrcp.f32 %v2428_v35  ;;  %v2435_v27 = vadd.f32 1.0, %v3223_v30  ;;  %v1916_v40 = vpop.permute.xlu1 %1915  ;;  %v7044_v35 = vld [vmem:[#allocation16_spill] sm:$0xff] }
 0x2c6   : > { %v3225_v16 = vpop.eup %3224  ;;  %v5875_v28 = vadd.f32 %v1768_v38, %v7042_v14  ;;  %3242 = vpow2.f32 %v2317_v55  ;;  %v2321_v13 = vmul.f32 1.442695, %v2247_v3  ;;  %v2186_v58 = vadd.f32 %v2123_v57, %v5726_v22  ;;  %v7043_v22 = vld [vmem:[#allocation13_spill] sm:$0xff] }
 0x2c7   : > { %v3227_v52 = vpop.eup %3226  ;;  %3244 = vrcp.f32 %v2435_v27  ;;  %v2430_v42 = vadd.f32 1.0, %v3225_v16  ;;  %v2335_v46 = vmul.f32 1.442695, %v2254_v25  ;;  %v2193_v29 = vadd.f32 %v2130_v56, %v5749_v49  ;;  %v1944_v60 = vpop.permute.xlu0 %1943 }
 0x2c8   : > { %v3229_v54 = vpop.eup %3228  ;;  %2552 = vst.msk [vmem:[%s5854_s6] sm:$0xff] %vm2551_vm0, %v3227_v52  ;;  %3246 = vpow2.f32 %v2331_v7  ;;  %v2249_v44 = vsub.f32 0.0, %v2186_v58  ;;  %v2125_v38 = vmul.f32 %v5649_v10, %v1916_v40  ;;  %v2132_v11 = vmul.f32 %v5649_v10, %v1944_v60 }
 0x2c9   : > { %v3231_v26 = vpop.eup %3230  ;;  %v1765_v32 = vmul.f32 %v5287_v37, %v7043_v22  ;;  %v1770_v55 = vmul.f32 %v5287_v37, %v7044_v35  ;;  %2558 = vst.msk [vmem:[%s5854_s6 + $0x30] sm:$0xff] %vm2551_vm0, %v3229_v54  ;;  %3248 = vrcp.f32 %v2430_v42  ;;  %v2256_v49 = vsub.f32 0.0, %v2193_v29  ;;  %v1924_v34 = vpop.permute.xlu1 %1923 }
 0x2ca   : > { %v3233_v9 = vpop.eup %3232  ;;  %v2437_v0 = vadd.f32 1.0, %v3231_v26  ;;  %3250 = vpow2.f32 %v2321_v13  ;;  %v2325_v7 = vmul.f32 1.442695, %v2249_v44  ;;  %v2188_v30 = vadd.f32 %v2125_v38, %v5738_v59  ;;  %v7045_v59 = vld [vmem:[#allocation106_spill] sm:$0xff]  ;;  %v7046_v44 = vld [vmem:[#allocation81_spill] sm:$0xff] }
 0x2cb   : > { %v3235_v3 = vpop.eup %3234  ;;  %v2432_v25 = vadd.f32 1.0, %v3233_v9  ;;  %3252 = vpow2.f32 %v2335_v46  ;;  %v2339_v57 = vmul.f32 1.442695, %v2256_v49  ;;  %v2195_v56 = vadd.f32 %v2132_v11, %v5759_v31  ;;  %v1952_v43 = vpop.permute.xlu0 %1951  ;;  %v7047_v9 = vld [vmem:[#allocation82_spill] sm:$0xff] }
 0x2cc   : > { %v3237_v27 = vpop.eup %3236  ;;  %2554 = vst.msk [vmem:[%s5854_s6 + $0x10] sm:$0xff] %vm2551_vm0, %v3235_v3  ;;  %3254 = vrcp.f32 %v2437_v0  ;;  %v2251_v16 = vsub.f32 0.0, %v2188_v30  ;;  %v2127_v14 = vmul.f32 %v5649_v10, %v1924_v34  ;;  %v2134_v13 = vmul.f32 %v5649_v10, %v1952_v43 }
 0x2cd   : > { %v3239_v58 = vpop.eup %3238  ;;  %v5896_v52 = vadd.f32 %v1765_v32, %v7045_v59  ;;  %3256 = vrcp.f32 %v2432_v25  ;;  %v2439_v42 = vadd.f32 1.0, %v3237_v27  ;;  %v2258_v46 = vsub.f32 0.0, %v2195_v56  ;;  %v1932_v26 = vpop.permute.xlu1 %1931  ;;  %v7048_v56 = vld [vmem:[#allocation108_spill] sm:$0xff] }
 0x2ce   : > { %2560 = vst.msk [vmem:[%s5854_s6 + $0x40] sm:$0xff] %vm2551_vm0, %v3239_v58  ;;  %3258 = vpow2.f32 %v2325_v7  ;;  %v2329_v31 = vmul.f32 1.442695, %v2251_v16  ;;  %v2190_v29 = vadd.f32 %v2127_v14, %v5752_v50  ;;  %v2197_v40 = vadd.f32 %v2134_v13, %v5765_v6 }
 0x2cf   : > { %v3241_v60 = vpop.eup %3240  ;;  %v5903_v54 = vadd.f32 %v1770_v55, %v5540_v48  ;;  %v1767_v38 = vmul.f32 %v5287_v37, %v7046_v44  ;;  %3260 = vrcp.f32 %v2439_v42  ;;  %v2343_v11 = vmul.f32 1.442695, %v2258_v46  ;;  %v1960_v22 = vpop.permute.xlu0 %1959 }
 0x2d0   : > { %v3243_v32 = vpop.eup %3242  ;;  %2555 = vst.msk [vmem:[%s5854_s6 + $0x18] sm:$0xff] %vm2551_vm0, %v3241_v60  ;;  %3262 = vpow2.f32 %v2339_v57  ;;  %v2253_v35 = vsub.f32 0.0, %v2190_v29  ;;  %v2260_v50 = vsub.f32 0.0, %v2197_v40  ;;  %v2129_v6 = vmul.f32 %v5649_v10, %v1932_v26 }
 0x2d1   : > { %v3245_v49 = vpop.eup %3244  ;;  %v1772_v48 = vmul.f32 %v5287_v37, %v7047_v9  ;;  %v2434_v55 = vadd.f32 1.0, %v3243_v32  ;;  %3264 = vpow2.f32 %v2329_v31  ;;  %v2136_v0 = vmul.f32 %v5649_v10, %v1960_v22  ;;  %v1940_v16 = vpop.permute.xlu1 %1939 }
 0x2d2   : > { %v3247_v7 = vpop.eup %3246  ;;  %2562 = vst.msk [vmem:[%s5854_s6 + $0x50] sm:$0xff] %vm2551_vm0, %v3245_v49  ;;  %3266 = vpow2.f32 %v2343_v11  ;;  %v2333_v30 = vmul.f32 1.442695, %v2253_v35  ;;  %v2347_v3 = vmul.f32 1.442695, %v2260_v50  ;;  %v2192_v25 = vadd.f32 %v2129_v6, %v5762_v19  ;;  %v7049_v11 = vld [vmem:[#allocation88_spill] sm:$0xff] }
 0x2d3   : > { %v3249_v57 = vpop.eup %3248  ;;  %v5917_v34 = vadd.f32 %v1767_v38, %v7048_v56  ;;  %3268 = vrcp.f32 %v2434_v55  ;;  %v2441_v43 = vadd.f32 1.0, %v3247_v7  ;;  %v2199_v27 = vadd.f32 %v2136_v0, %v5774_v53  ;;  %v1968_v14 = vpop.permute.xlu0 %1967  ;;  %v7051_v56 = vld [vmem:[#allocation111_spill] sm:$0xff] }
 0x2d4   : > { %v3251_v13 = vpop.eup %3250  ;;  %2557 = vst.msk [vmem:[%s5854_s6 + $0x28] sm:$0xff] %vm2551_vm0, %v3249_v57  ;;  %3270 = vpow2.f32 %v2333_v30  ;;  %v2255_v58 = vsub.f32 0.0, %v2192_v25  ;;  %v2131_v59 = vmul.f32 %v5649_v10, %v1940_v16  ;;  %v2138_v19 = vmul.f32 %v5649_v10, %v1968_v14 }
 0x2d5   : > { %v3253_v42 = vpop.eup %3252  ;;  %v5925_v46 = vadd.f32 %v1772_v48, %v5546_v12  ;;  %3272 = vrcp.f32 %v2441_v43  ;;  %v2436_v31 = vadd.f32 1.0, %v3251_v13  ;;  %v2262_v53 = vsub.f32 0.0, %v2199_v27  ;;  %v1948_v32 = vpop.permute.xlu1 %1947  ;;  %v7050_v48 = vld [vmem:[#allocation89_spill] sm:$0xff] }
 0x2d6   : > { %v3255_v29 = vpop.eup %3254  ;;  %v2443_v40 = vadd.f32 1.0, %v3253_v42  ;;  %3274 = vpow2.f32 %v2347_v3  ;;  %v2337_v60 = vmul.f32 1.442695, %v2255_v58  ;;  %v2194_v44 = vadd.f32 %v2131_v59, %v5768_v63 }
 0x2d7   : > { %v3257_v38 = vpop.eup %3256  ;;  %v1769_v26 = vmul.f32 %v5287_v37, %v7049_v11  ;;  %2564 = vst.msk [vmem:[%s5854_s6 + $0x60] sm:$0xff] %vm2551_vm0, %v3255_v29  ;;  %3276 = vrcp.f32 %v2436_v31  ;;  %v2351_v22 = vmul.f32 1.442695, %v2262_v53  ;;  %v2201_v12 = vadd.f32 %v2138_v19, %v5786_v20  ;;  %v1976_v35 = vpop.permute.xlu0 %1975 }
 0x2d8   : > { %v3259_v50 = vpop.eup %3258  ;;  %2559 = vst.msk [vmem:[%s5854_s6 + $0x38] sm:$0xff] %vm2551_vm0, %v3257_v38  ;;  %3278 = vrcp.f32 %v2443_v40  ;;  %v2257_v6 = vsub.f32 0.0, %v2194_v44  ;;  %v2133_v63 = vmul.f32 %v5649_v10, %v1948_v32  ;;  %v2140_v49 = vmul.f32 %v5649_v10, %v1976_v35  ;;  %v7052_v40 = vld [vmem:[#allocation113_spill] sm:$0xff]  ;;  %v7053_v44 = vld [vmem:[#allocation91_spill] sm:$0xff] }
 0x2d9   : > { %v3261_v9 = vpop.eup %3260  ;;  %v1774_v55 = vmul.f32 %v5287_v37, %v7050_v48  ;;  %v2438_v0 = vadd.f32 1.0, %v3259_v50  ;;  %3280 = vpow2.f32 %v2337_v60  ;;  %v2264_v7 = vsub.f32 0.0, %v2201_v12  ;;  %v1956_v14 = vpop.permute.xlu1 %1955 }
 0x2da   : > { %v3263_v30 = vpop.eup %3262  ;;  %2566 = vst.msk [vmem:[%s5854_s6 + $0x70] sm:$0xff] %vm2551_vm0, %v3261_v9  ;;  %3282 = vpow2.f32 %v2351_v22  ;;  %v2341_v20 = vmul.f32 1.442695, %v2257_v6  ;;  %v2196_v3 = vadd.f32 %v2133_v63, %v5777_v51  ;;  %v2203_v25 = vadd.f32 %v2140_v49, %v5801_v8 }
 0x2db   : > { %v3265_v57 = vpop.eup %3264  ;;  %v5944_v43 = vadd.f32 %v1769_v26, %v7051_v56  ;;  %3284 = vrcp.f32 %v2438_v0  ;;  %v2445_v27 = vadd.f32 1.0, %v3263_v30  ;;  %v2355_v16 = vmul.f32 1.442695, %v2264_v7  ;;  %v1984_v13 = vpop.permute.xlu0 %1983 }
 0x2dc   : > { %v3267_v58 = vpop.eup %3266  ;;  %v2440_v59 = vadd.f32 1.0, %v3265_v57  ;;  %3286 = vpow2.f32 %v2341_v20  ;;  %v2259_v19 = vsub.f32 0.0, %v2196_v3  ;;  %v2266_v42 = vsub.f32 0.0, %v2203_v25  ;;  %v7055_v57 = vld [vmem:[#allocation112_spill] sm:$0xff] }
 0x2dd   : > { %v3269_v31 = vpop.eup %3268  ;;  %3288 = vrcp.f32 %v2445_v27  ;;  %v2447_v51 = vadd.f32 1.0, %v3267_v58  ;;  %v2135_v8 = vmul.f32 %v5649_v10, %v1956_v14  ;;  %v2142_v53 = vmul.f32 %v5649_v10, %v1984_v13  ;;  %v1964_v35 = vpop.permute.xlu1 %1963 }
 0x2de   : > { %v3271_v29 = vpop.eup %3270  ;;  %v5949_v60 = vadd.f32 %v1774_v55, %v7052_v40  ;;  %v1771_v38 = vmul.f32 %v5287_v37, %v7053_v44  ;;  %2561 = vst.msk [vmem:[%s5854_s6 + $0x48] sm:$0xff] %vm2551_vm0, %v3269_v31  ;;  %3290 = vrcp.f32 %v2440_v59  ;;  %v2345_v11 = vmul.f32 1.442695, %v2259_v19 }
 0x2df   : > { %v3273_v26 = vpop.eup %3272  ;;  %3292 = vrcp.f32 %v2447_v51  ;;  %v2442_v22 = vadd.f32 1.0, %v3271_v29  ;;  %v2198_v12 = vadd.f32 %v2135_v8, %v5796_v23  ;;  %v2205_v32 = vadd.f32 %v2142_v53, %v5809_v5  ;;  %v1992_v50 = vpop.permute.xlu0 %1991  ;;  %v7054_v5 = vld [vmem:[#allocation92_spill] sm:$0xff]  ;;  %v7056_v53 = vld [vmem:[#allocation93_spill] sm:$0xff] }
 0x2e0   : > { %v3275_v6 = vpop.eup %3274  ;;  %2568 = vst.msk [vmem:[%s5854_s6 + $0x80] sm:$0xff] %vm2551_vm0, %v3273_v26  ;;  %3294 = vpow2.f32 %v2355_v16  ;;  %v2359_v63 = vmul.f32 1.442695, %v2266_v42  ;;  %v2137_v49 = vmul.f32 %v5649_v10, %v1964_v35  ;;  %v2144_v9 = vmul.f32 %v5649_v10, %v1992_v50  ;;  %v7057_v50 = vld [vmem:[#allocation115_spill] sm:$0xff] }
 0x2e1   : > { %v3277_v48 = vpop.eup %3276  ;;  %3296 = vrcp.f32 %v2442_v22  ;;  %v2449_v55 = vadd.f32 1.0, %v3275_v6  ;;  %v2261_v0 = vsub.f32 0.0, %v2198_v12  ;;  %v2268_v23 = vsub.f32 0.0, %v2205_v32  ;;  %v1972_v14 = vpop.permute.xlu1 %1971 }
 0x2e2   : > { %v3279_v7 = vpop.eup %3278  ;;  %v1776_v30 = vmul.f32 %v5287_v37, %v7054_v5  ;;  %2563 = vst.msk [vmem:[%s5854_s6 + $0x58] sm:$0xff] %vm2551_vm0, %v3277_v48  ;;  %3298 = vpow2.f32 %v2345_v11  ;;  %v2200_v20 = vadd.f32 %v2137_v49, %v5806_v39  ;;  %v2207_v3 = vadd.f32 %v2144_v9, %v5828_v1  ;;  %v7058_v48 = vld [vmem:[#allocation94_spill] sm:$0xff] }
 0x2e3   : > { %v3281_v25 = vpop.eup %3280  ;;  %v5968_v56 = vadd.f32 %v1771_v38, %v7055_v57  ;;  %2570 = vst.msk [vmem:[%s5854_s6 + $0x90] sm:$0xff] %vm2551_vm0, %v3279_v7  ;;  %3300 = vrcp.f32 %v2449_v55  ;;  %v2349_v27 = vmul.f32 1.442695, %v2261_v0  ;;  %v2363_v16 = vmul.f32 1.442695, %v2268_v23  ;;  %v2000_v13 = vpop.permute.xlu0 %1999  ;;  %v7059_v23 = vld [vmem:[#allocation114_spill] sm:$0xff] }
 0x2e4   : > { %v3283_v58 = vpop.eup %3282  ;;  %v2444_v59 = vadd.f32 1.0, %v3281_v25  ;;  %3302 = vpow2.f32 %v2359_v63  ;;  %v2263_v19 = vsub.f32 0.0, %v2200_v20  ;;  %v2270_v42 = vsub.f32 0.0, %v2207_v3 }
 0x2e5   : > { %v3285_v39 = vpop.eup %3284  ;;  %v2451_v31 = vadd.f32 1.0, %v3283_v58  ;;  %3304 = vpow2.f32 %v2349_v27  ;;  %v2139_v1 = vmul.f32 %v5649_v10, %v1972_v14  ;;  %v2146_v51 = vmul.f32 %v5649_v10, %v2000_v13  ;;  %v1980_v12 = vpop.permute.xlu1 %1979 }
 0x2e6   : > { %v3287_v8 = vpop.eup %3286  ;;  %v1773_v29 = vmul.f32 %v5287_v37, %v7056_v53  ;;  %2565 = vst.msk [vmem:[%s5854_s6 + $0x68] sm:$0xff] %vm2551_vm0, %v3285_v39  ;;  %3306 = vrcp.f32 %v2444_v59  ;;  %v2353_v40 = vmul.f32 1.442695, %v2263_v19  ;;  %v2367_v44 = vmul.f32 1.442695, %v2270_v42  ;;  %v7060_v42 = vld [vmem:[#allocation119_spill] sm:$0xff] }
 0x2e7   : > { %v3289_v38 = vpop.eup %3288  ;;  %3308 = vrcp.f32 %v2451_v31  ;;  %v2446_v11 = vadd.f32 1.0, %v3287_v8  ;;  %v2202_v26 = vadd.f32 %v2139_v1, %v5813_v21  ;;  %v2209_v22 = vadd.f32 %v2146_v51, %v5840_v24  ;;  %v2008_v32 = vpop.permute.xlu0 %2007  ;;  %v7061_v39 = vld [vmem:[#allocation95_spill] sm:$0xff]  ;;  %v7062_v8 = vld [vmem:[#allocation96_spill] sm:$0xff] }
 0x2e8   : > { %v3291_v35 = vpop.eup %3290  ;;  %v5981_v6 = vadd.f32 %v1776_v30, %v7057_v50  ;;  %2572 = vst.msk [vmem:[%s5854_s6 + $0xa0] sm:$0xff] %vm2551_vm0, %v3289_v38  ;;  %3310 = vpow2.f32 %v2363_v16  ;;  %v2141_v63 = vmul.f32 %v5649_v10, %v1980_v12  ;;  %v2148_v49 = vmul.f32 %v5649_v10, %v2008_v32 }
 0x2e9   : > { %v3293_v9 = vpop.eup %3292  ;;  %v1778_v21 = vmul.f32 %v5287_v37, %v7058_v48  ;;  %2567 = vst.msk [vmem:[%s5854_s6 + $0x78] sm:$0xff] %vm2551_vm0, %v3291_v35  ;;  %3312 = vrcp.f32 %v2446_v11  ;;  %v2265_v24 = vsub.f32 0.0, %v2202_v26  ;;  %v2272_v55 = vsub.f32 0.0, %v2209_v22  ;;  %v1988_v27 = vpop.permute.xlu1 %1987 }
 0x2ea   : > { %v3295_v0 = vpop.eup %3294  ;;  %v5992_v7 = vadd.f32 %v1773_v29, %v7059_v23  ;;  %2574 = vst.msk [vmem:[%s5854_s6 + $0xb0] sm:$0xff] %vm2551_vm0, %v3293_v9  ;;  %3314 = vpow2.f32 %v2353_v40  ;;  %v2204_v5 = vadd.f32 %v2141_v63, %v5837_v17  ;;  %v2211_v30 = vadd.f32 %v2148_v49, %v5869_v4  ;;  %v7063_v9 = vld [vmem:[#allocation116_spill] sm:$0xff] }
 0x2eb   : > { %v3297_v20 = vpop.eup %3296  ;;  %v2453_v3 = vadd.f32 1.0, %v3295_v0  ;;  %3316 = vpow2.f32 %v2367_v44  ;;  %v2357_v25 = vmul.f32 1.442695, %v2265_v24  ;;  %v2371_v57 = vmul.f32 1.442695, %v2272_v55  ;;  %v2016_v16 = vpop.permute.xlu0 %2015 }
 0x2ec   : > { %v3299_v14 = vpop.eup %3298  ;;  %2569 = vst.msk [vmem:[%s5854_s6 + $0x88] sm:$0xff] %vm2551_vm0, %v3297_v20  ;;  %v2267_v13 = vsub.f32 0.0, %v2204_v5  ;;  %v2274_v58 = vsub.f32 0.0, %v2211_v30  ;;  %v2143_v59 = vmul.f32 %v5649_v10, %v1988_v27  ;;  %v2150_v19 = vmul.f32 %v5649_v10, %v2016_v16  ;;  %v7064_v5 = vld [vmem:[#allocation97_spill] sm:$0xff] }
 0x2ed   : > { %v3301_v17 = vpop.eup %3300  ;;  %v6003_v4 = vadd.f32 %v1778_v21, %v7060_v42  ;;  %v1775_v31 = vmul.f32 %v5287_v37, %v7061_v39  ;;  %3318 = vrcp.f32 %v2453_v3  ;;  %v2448_v1 = vadd.f32 1.0, %v3299_v14  ;;  %v1996_v22 = vpop.permute.xlu1 %1995  ;;  %v7065_v39 = vld [vmem:[#allocation98_spill] sm:$0xff] }
 0x2ee   : > { %v3303_v51 = vpop.eup %3302  ;;  %v1780_v53 = vmul.f32 %v5287_v37, %v7062_v8  ;;  %2576 = vst.msk [vmem:[%s5854_s6 + $0xc0] sm:$0xff] %vm2551_vm0, %v3301_v17  ;;  %3320 = vpow2.f32 %v2357_v25  ;;  %v2361_v29 = vmul.f32 1.442695, %v2267_v13  ;;  %v2206_v40 = vadd.f32 %v2143_v59, %v5847_v33 }
 0x2ef   : > { %v3305_v44 = vpop.eup %3304  ;;  %3322 = vrcp.f32 %v2448_v1  ;;  %v2455_v38 = vadd.f32 1.0, %v3303_v51  ;;  %v2375_v11 = vmul.f32 1.442695, %v2274_v58  ;;  %v2213_v26 = vadd.f32 %v2150_v19, %v5875_v28  ;;  %v2024_v12 = vpop.permute.xlu0 %2023 }
 0x2f0   : > { %v3307_v32 = vpop.eup %3306  ;;  %v2450_v35 = vadd.f32 1.0, %v3305_v44  ;;  %3324 = vpow2.f32 %v2371_v57  ;;  %v2269_v50 = vsub.f32 0.0, %v2206_v40  ;;  %v2145_v63 = vmul.f32 %v5649_v10, %v1996_v22 }
 0x2f1   : > { %v3309_v49 = vpop.eup %3308  ;;  %v6015_v48 = vadd.f32 %v1775_v31, %v7063_v9  ;;  %2571 = vst.msk [vmem:[%s5854_s6 + $0x98] sm:$0xff] %vm2551_vm0, %v3307_v32  ;;  %3326 = vrcp.f32 %v2455_v38  ;;  %v2276_v33 = vsub.f32 0.0, %v2213_v26  ;;  %v2152_v28 = vmul.f32 %v5649_v10, %v2024_v12  ;;  %v2004_v25 = vpop.permute.xlu1 %2003 }
 0x2f2   : > { %v3311_v21 = vpop.eup %3310  ;;  %v6021_v24 = vadd.f32 %v1780_v53, %v5596_v15  ;;  %2578 = vst.msk [vmem:[%s5854_s6 + $0xd0] sm:$0xff] %vm2551_vm0, %v3309_v49  ;;  %3328 = vrcp.f32 %v2450_v35  ;;  %v2365_v55 = vmul.f32 1.442695, %v2269_v50  ;;  %v2208_v0 = vadd.f32 %v2145_v63, %v5872_v61  ;;  %v7067_v49 = vld [vmem:[#allocation120_spill] sm:$0xff] }
 0x2f3   : > { %v3313_v23 = vpop.eup %3312  ;;  %v1777_v30 = vmul.f32 %v5287_v37, %v7064_v5  ;;  %v2457_v20 = vadd.f32 1.0, %v3311_v21  ;;  %3330 = vpow2.f32 %v2361_v29  ;;  %v2215_v3 = vadd.f32 %v2152_v28, %v5903_v54  ;;  %v2032_v57 = vpop.permute.xlu0 %2031 }
 0x2f4   : > { %v3315_v27 = vpop.eup %3314  ;;  %2573 = vst.msk [vmem:[%s5854_s6 + $0xa8] sm:$0xff] %vm2551_vm0, %v3313_v23  ;;  %3332 = vpow2.f32 %v2375_v11  ;;  %v2271_v15 = vsub.f32 0.0, %v2208_v0  ;;  %v2147_v16 = vmul.f32 %v5649_v10, %v2004_v25  ;;  %v2154_v14 = vmul.f32 %v5649_v10, %v2032_v57  ;;  %v7066_v11 = vld [vmem:[#allocation100_spill] sm:$0xff]  ;;  %v7069_v25 = vld [vmem:[#allocation101_spill] sm:$0xff] }
 0x2f5   : > { %v3317_v61 = vpop.eup %3316  ;;  %3334 = vrcp.f32 %v2457_v20  ;;  %v2452_v13 = vadd.f32 1.0, %v3315_v27  ;;  %v2379_v58 = vmul.f32 1.442695, %v2276_v33  ;;  %v2278_v59 = vsub.f32 0.0, %v2215_v3  ;;  %v2012_v8 = vpop.permute.xlu1 %2011 }
 0x2f6   : > { %v2459_v19 = vadd.f32 1.0, %v3317_v61  ;;  %3336 = vpow2.f32 %v2365_v55  ;;  %v2369_v54 = vmul.f32 1.442695, %v2271_v15  ;;  %v2210_v17 = vadd.f32 %v2147_v16, %v5896_v52  ;;  %v7070_v15 = vld [vmem:[#allocation121_spill] sm:$0xff] }
 0x2f7   : > { %v3319_v42 = vpop.eup %3318  ;;  %v1782_v31 = vmul.f32 %v5287_v37, %v7065_v39  ;;  %3338 = vrcp.f32 %v2452_v13  ;;  %v2383_v1 = vmul.f32 1.442695, %v2278_v59  ;;  %v2217_v51 = vadd.f32 %v2154_v14, %v5925_v46  ;;  %v2040_v53 = vpop.permute.xlu0 %2039 }
 0x2f8   : > { %v3321_v29 = vpop.eup %3320  ;;  %2580 = vst.msk [vmem:[%s5854_s6 + $0xe0] sm:$0xff] %vm2551_vm0, %v3319_v42  ;;  %3340 = vrcp.f32 %v2459_v19  ;;  %v2273_v40 = vsub.f32 0.0, %v2210_v17  ;;  %v2149_v44 = vmul.f32 %v5649_v10, %v2012_v8  ;;  %v2156_v52 = vmul.f32 %v5649_v10, %v2040_v53 }
 0x2f9   : > { %v3323_v38 = vpop.eup %3322  ;;  %v1779_v26 = vmul.f32 %v5287_v37, %v7066_v11  ;;  %v2454_v22 = vadd.f32 1.0, %v3321_v29  ;;  %3342 = vpow2.f32 %v2379_v58  ;;  %v2280_v12 = vsub.f32 0.0, %v2217_v51  ;;  %v2020_v21 = vpop.permute.xlu1 %2019 }
 0x2fa   : > { %v3325_v46 = vpop.eup %3324  ;;  %2575 = vst.msk [vmem:[%s5854_s6 + $0xb8] sm:$0xff] %vm2551_vm0, %v3323_v38  ;;  %3344 = vpow2.f32 %v2369_v54  ;;  %v2373_v32 = vmul.f32 1.442695, %v2273_v40  ;;  %v2212_v35 = vadd.f32 %v2149_v44, %v5917_v34  ;;  %v2219_v50 = vadd.f32 %v2156_v52, %v5949_v60  ;;  %v7068_v60 = vld [vmem:[#allocation122_spill] sm:$0xff] }
 0x2fb   : > { %v3327_v63 = vpop.eup %3326  ;;  %v6048_v9 = vadd.f32 %v1777_v30, %v7067_v49  ;;  %3346 = vrcp.f32 %v2454_v22  ;;  %v2461_v33 = vadd.f32 1.0, %v3325_v46  ;;  %v2387_v28 = vmul.f32 1.442695, %v2280_v12  ;;  %v2048_v55 = vpop.permute.xlu0 %2047 }
 0x2fc   : > { %v3329_v0 = vpop.eup %3328  ;;  %2582 = vst.msk [vmem:[%s5854_s6 + $0xf0] sm:$0xff] %vm2551_vm0, %v3327_v63  ;;  %3348 = vpow2.f32 %v2383_v1  ;;  %v2275_v23 = vsub.f32 0.0, %v2212_v35  ;;  %v2282_v5 = vsub.f32 0.0, %v2219_v50  ;;  %v2151_v34 = vmul.f32 %v5649_v10, %v2020_v21  ;;  %v7072_v21 = vld [vmem:[#allocation110_spill] sm:$0xff] }
 0x2fd   : > { %v3331_v20 = vpop.eup %3330  ;;  %v6054_v3 = vadd.f32 %v1782_v31, %v7068_v60  ;;  %v1784_v30 = vmul.f32 %v5287_v37, %v7069_v25  ;;  %2577 = vst.msk [vmem:[%s5854_s6 + $0xc8] sm:$0xff] %vm2551_vm0, %v3329_v0  ;;  %3350 = vrcp.f32 %v2461_v33  ;;  %v2158_v57 = vmul.f32 %v5649_v10, %v2048_v55  ;;  %v2028_v54 = vpop.permute.xlu1 %2027 }
 0x2fe   : > { %v3333_v27 = vpop.eup %3332  ;;  %v6062_v16 = vadd.f32 %v1779_v26, %v7070_v15  ;;  %v2456_v14 = vadd.f32 1.0, %v3331_v20  ;;  %3352 = vpow2.f32 %v2373_v32  ;;  %v2377_v61 = vmul.f32 1.442695, %v2275_v23 }
 0x2ff   : > { %v3335_v13 = vpop.eup %3334  ;;  %v2463_v58 = vadd.f32 1.0, %v3333_v27  ;;  %3354 = vpow2.f32 %v2387_v28  ;;  %v2214_v59 = vadd.f32 %v2151_v34, %v5944_v43  ;;  %v2221_v19 = vadd.f32 %v2158_v57, %v5981_v6  ;;  %v2056_v17 = vpop.permute.xlu0 %2055  ;;  %v7071_v6 = vld [vmem:[#allocation109_spill] sm:$0xff] }
 0x300   : > { %v3337_v42 = vpop.eup %3336  ;;  %2584 = vst.msk [vmem:[%s5854_s6 + $0x100] sm:$0xff] %vm2551_vm0, %v3335_v13  ;;  %3356 = vrcp.f32 %v2456_v14  ;;  %v2391_v39 = vmul.f32 1.442695, %v2282_v5  ;;  %v2153_v31 = vmul.f32 %v5649_v10, %v2028_v54  ;;  %v2160_v1 = vmul.f32 %v5649_v10, %v2056_v17 }
 0x301   : > { %v3339_v51 = vpop.eup %3338  ;;  %3358 = vrcp.f32 %v2463_v58  ;;  %v2458_v8 = vadd.f32 1.0, %v3337_v42  ;;  %v2277_v53 = vsub.f32 0.0, %v2214_v59  ;;  %v2284_v43 = vsub.f32 0.0, %v2221_v19  ;;  %v2036_v12 = vpop.permute.xlu1 %2035 }
 0x302   : > { %v3341_v29 = vpop.eup %3340  ;;  %v1781_v40 = vmul.f32 %v5287_v37, %v7071_v6  ;;  %2579 = vst.msk [vmem:[%s5854_s6 + $0xd8] sm:$0xff] %vm2551_vm0, %v3339_v51  ;;  %3360 = vpow2.f32 %v2377_v61  ;;  %v2216_v44 = vadd.f32 %v2153_v31, %v5968_v56  ;;  %v2223_v52 = vadd.f32 %v2160_v1, %v6003_v4 }
 0x303   : > { %v3343_v38 = vpop.eup %3342  ;;  %v6077_v11 = vadd.f32 %v1784_v30, %v5617_v18  ;;  %2586 = vst.msk [vmem:[%s5854_s6 + $0x110] sm:$0xff] %vm2551_vm0, %v3341_v29  ;;  %3362 = vrcp.f32 %v2458_v8  ;;  %v2381_v26 = vmul.f32 1.442695, %v2277_v53  ;;  %v2395_v22 = vmul.f32 1.442695, %v2284_v43  ;;  %v2064_v46 = vpop.permute.xlu0 %2063  ;;  %v7073_v53 = vld [vmem:[#allocation118_spill] sm:$0xff] }
 0x304   : > { %v3345_v32 = vpop.eup %3344  ;;  %v2465_v35 = vadd.f32 1.0, %v3343_v38  ;;  %3364 = vpow2.f32 %v2391_v39  ;;  %v2279_v50 = vsub.f32 0.0, %v2216_v44  ;;  %v2286_v63 = vsub.f32 0.0, %v2223_v52 }
 0x305   : > { %v3347_v56 = vpop.eup %3346  ;;  %v2460_v49 = vadd.f32 1.0, %v3345_v32  ;;  %3366 = vpow2.f32 %v2381_v26  ;;  %v2155_v4 = vmul.f32 %v5649_v10, %v2036_v12  ;;  %v2162_v18 = vmul.f32 %v5649_v10, %v2064_v46  ;;  %v2044_v60 = vpop.permute.xlu1 %2043 }
 0x306   : > { %v3349_v33 = vpop.eup %3348  ;;  %v6084_v28 = vadd.f32 %v1781_v40, %v5614_v36  ;;  %v1786_v55 = vmul.f32 %v5287_v37, %v7072_v21  ;;  %2581 = vst.msk [vmem:[%s5854_s6 + $0xe8] sm:$0xff] %vm2551_vm0, %v3347_v56  ;;  %3368 = vrcp.f32 %v2465_v35  ;;  %v2385_v0 = vmul.f32 1.442695, %v2279_v50  ;;  %v7074_v40 = vld [vmem:[#allocation117_spill] sm:$0xff]  ;;  %v7075_v21 = vld [vmem:[#allocation124_spill] sm:$0xff] }
 0x307   : > { %v3351_v23 = vpop.eup %3350  ;;  %3370 = vrcp.f32 %v2460_v49  ;;  %v2467_v5 = vadd.f32 1.0, %v3349_v33  ;;  %v2218_v34 = vadd.f32 %v2155_v4, %v5992_v7  ;;  %v2225_v20 = vadd.f32 %v2162_v18, %v6021_v24  ;;  %v2072_v25 = vpop.permute.xlu0 %2071 }
 0x308   : > { %v3353_v30 = vpop.eup %3352  ;;  %2588 = vst.msk [vmem:[%s5854_s6 + $0x120] sm:$0xff] %vm2551_vm0, %v3351_v23  ;;  %3372 = vpow2.f32 %v2395_v22  ;;  %v2399_v36 = vmul.f32 1.442695, %v2286_v63  ;;  %v2157_v57 = vmul.f32 %v5649_v10, %v2044_v60  ;;  %v2164_v27 = vmul.f32 %v5649_v10, %v2072_v25 }
 0x309   : > { %v3355_v15 = vpop.eup %3354  ;;  %3374 = vrcp.f32 %v2467_v5  ;;  %v2462_v14 = vadd.f32 1.0, %v3353_v30  ;;  %v2281_v61 = vsub.f32 0.0, %v2218_v34  ;;  %v2288_v7 = vsub.f32 0.0, %v2225_v20  ;;  %v2052_v39 = vpop.permute.xlu1 %2051 }
 0x30a   : > { %v3357_v13 = vpop.eup %3356  ;;  %v2469_v24 = vadd.f32 1.0, %v3355_v15  ;;  %3376 = vpow2.f32 %v2385_v0  ;;  %v2220_v58 = vadd.f32 %v2157_v57, %v6015_v48  ;;  %v2227_v59 = vadd.f32 %v2164_v27, %v6054_v3 }
 0x30b   : > { %v3359_v19 = vpop.eup %3358  ;;  %v1849_v54 = vadd.f32 %v1786_v55, %v5631_v45  ;;  %2583 = vst.msk [vmem:[%s5854_s6 + $0xf8] sm:$0xff] %vm2551_vm0, %v3357_v13  ;;  %3378 = vrcp.f32 %v2462_v14  ;;  %v2389_v17 = vmul.f32 1.442695, %v2281_v61  ;;  %v2403_v42 = vmul.f32 1.442695, %v2288_v7  ;;  %v2080_v31 = vpop.permute.xlu0 %2079 }
 0x30c   : > { %v3361_v1 = vpop.eup %3360  ;;  %2590 = vst.msk [vmem:[%s5854_s6 + $0x130] sm:$0xff] %vm2551_vm0, %v3359_v19  ;;  %3380 = vrcp.f32 %v2469_v24  ;;  %v2283_v51 = vsub.f32 0.0, %v2220_v58  ;;  %v2290_v8 = vsub.f32 0.0, %v2227_v59  ;;  %v2159_v48 = vmul.f32 %v5649_v10, %v2052_v39  ;;  %v7076_v19 = vld [vmem:[#allocation123_spill] sm:$0xff] }
 0x30d   : > { %v3363_v3 = vpop.eup %3362  ;;  %v1788_v45 = vmul.f32 %v5287_v37, %v7073_v53  ;;  %v2464_v43 = vadd.f32 1.0, %v3361_v1  ;;  %3382 = vpow2.f32 %v2399_v36  ;;  %v2166_v29 = vmul.f32 %v5649_v10, %v2080_v31  ;;  %v2060_v32 = vpop.permute.xlu1 %2059 }
 0x30e   : > { %v3365_v6 = vpop.eup %3364  ;;  %v1783_v44 = vmul.f32 %v5287_v37, %v7074_v40  ;;  %2585 = vst.msk [vmem:[%s5854_s6 + $0x108] sm:$0xff] %vm2551_vm0, %v3363_v3  ;;  %3384 = vpow2.f32 %v2389_v17  ;;  %v2393_v52 = vmul.f32 1.442695, %v2283_v51  ;;  %v2222_v38 = vadd.f32 %v2159_v48, %v6048_v9 }
 0x30f   : > { %v3367_v26 = vpop.eup %3366  ;;  %3386 = vrcp.f32 %v2464_v43  ;;  %v2471_v22 = vadd.f32 1.0, %v3365_v6  ;;  %v2407_v12 = vmul.f32 1.442695, %v2290_v8  ;;  %v2229_v46 = vadd.f32 %v2166_v29, %v6077_v11  ;;  %v2088_v35 = vpop.permute.xlu0 %2087 }
 0x310   : > { %v3369_v50 = vpop.eup %3368  ;;  %v2466_v63 = vadd.f32 1.0, %v3367_v26  ;;  %3388 = vpow2.f32 %v2403_v42  ;;  %v2285_v56 = vsub.f32 0.0, %v2222_v38  ;;  %v2161_v49 = vmul.f32 %v5649_v10, %v2060_v32 }
 0x311   : > { %v3371_v4 = vpop.eup %3370  ;;  %v1851_v18 = vadd.f32 %v1788_v45, %v5639_v62  ;;  %2592 = vst.msk [vmem:[%s5854_s6 + $0x140] sm:$0xff] %vm2551_vm0, %v3369_v50  ;;  %3390 = vrcp.f32 %v2471_v22  ;;  %v2292_v9 = vsub.f32 0.0, %v2229_v46  ;;  %v2168_v33 = vmul.f32 %v5649_v10, %v2088_v35  ;;  %v2068_v60 = vpop.permute.xlu1 %2067  ;;  %v7077_v45 = vld [vmem:[#allocation125_spill] sm:$0xff]  ;;  %v7079_v46 = vld [vmem:[#allocation34_spill] sm:$0xff] }
 0x312   : > { %v3373_v11 = vpop.eup %3372  ;;  %v1790_v55 = vmul.f32 %v5287_v37, %v7075_v21  ;;  %2587 = vst.msk [vmem:[%s5854_s6 + $0x118] sm:$0xff] %vm2551_vm0, %v3371_v4  ;;  %3392 = vrcp.f32 %v2466_v63  ;;  %v2397_v0 = vmul.f32 1.442695, %v2285_v56  ;;  %v2224_v23 = vadd.f32 %v2161_v49, %v6062_v16  ;;  %v7080_v35 = vld [vmem:[#allocation30_spill] sm:$0xff]  ;;  %v7081_v49 = vld [vmem:[#allocation191_spill] sm:$0xff]  ;;  %v7082_v4 = vld [vmem:[#allocation57_spill] sm:$0xff] }
 0x313   : > { %v3375_v5 = vpop.eup %3374  ;;  %v2473_v34 = vadd.f32 1.0, %v3373_v11  ;;  %3394 = vpow2.f32 %v2393_v52  ;;  %v2411_v62 = vmul.f32 1.442695, %v2292_v9  ;;  %v2231_v20 = vadd.f32 %v2168_v33, %v1849_v54  ;;  %v2096_v25 = vpop.permute.xlu0 %2095 }
 0x314   : > { %v3377_v30 = vpop.eup %3376  ;;  %2594 = vst.msk [vmem:[%s5854_s6 + $0x150] sm:$0xff] %vm2551_vm0, %v3375_v5  ;;  %3396 = vpow2.f32 %v2407_v12  ;;  %v2287_v36 = vsub.f32 0.0, %v2224_v23  ;;  %v2163_v57 = vmul.f32 %v5649_v10, %v2068_v60  ;;  %v2170_v27 = vmul.f32 %v5649_v10, %v2096_v25  ;;  %v7078_v12 = vld [vmem:[#allocation87_spill] sm:$0xff] }
 0x315   : > { %v3379_v15 = vpop.eup %3378  ;;  %v1846_v16 = vadd.f32 %v1783_v44, %v5628_v2  ;;  %3398 = vrcp.f32 %v2473_v34  ;;  %v2468_v14 = vadd.f32 1.0, %v3377_v30  ;;  %v2294_v61 = vsub.f32 0.0, %v2231_v20 }
 0x316   : > { %v3381_v7 = vpop.eup %3380  ;;  %2589 = vst.msk [vmem:[%s5854_s6 + $0x128] sm:$0xff] %vm2551_vm0, %v3379_v15  ;;  %3400 = vpow2.f32 %v2397_v0  ;;  %v2401_v13 = vmul.f32 1.442695, %v2287_v36  ;;  %v2226_v24 = vadd.f32 %v2163_v57, %v6084_v28  ;;  %v2233_v58 = vadd.f32 %v2170_v27, %v1851_v18  ;;  %v7083_v27 = vld [vmem:[#allocation90_spill] sm:$0xff] }
 0x317   : > { %v3383_v59 = vpop.eup %3382  ;;  %v1785_v54 = vmul.f32 %v5287_v37, %v7076_v19  ;;  %v1853_v17 = vadd.f32 %v1790_v55, %v5652_v47  ;;  %2596 = vst.msk [vmem:[%s5854_s6 + $0x160] sm:$0xff] %vm2551_vm0, %v3381_v7  ;;  %3402 = vrcp.f32 %v2468_v14  ;;  %v2415_v2 = vmul.f32 1.442695, %v2294_v61  ;;  %v2076_v42 = vpop.permute.xlu1 %2075 }
 0x318   : > { %v2104_v39 = vpop.permute.xlu0 %2103  ;;  %v3385_v31 = vpop.eup %3384  ;;  %v2475_v1 = vadd.f32 1.0, %v3383_v59  ;;  %3404 = vpow2.f32 %v2411_v62  ;;  %v2289_v51 = vsub.f32 0.0, %v2226_v24  ;;  %v2296_v8 = vsub.f32 0.0, %v2233_v58 }
 0x319   : > { %v3387_v28 = vpop.eup %3386  ;;  %v2470_v48 = vadd.f32 1.0, %v3385_v31  ;;  %3406 = vpow2.f32 %v2401_v13  ;;  %v2165_v3 = vmul.f32 %v5649_v10, %v2076_v42  ;;  %v2172_v53 = vmul.f32 %v5649_v10, %v2104_v39 }
 0x31a   : > { %v3389_v47 = vpop.eup %3388  ;;  %v1787_v43 = vmul.f32 %v5287_v37, %v7077_v45  ;;  %2591 = vst.msk [vmem:[%s5854_s6 + $0x138] sm:$0xff] %vm2551_vm0, %v3387_v28  ;;  %3408 = vrcp.f32 %v2475_v1  ;;  %v2405_v29 = vmul.f32 1.442695, %v2289_v51  ;;  %v2419_v6 = vmul.f32 1.442695, %v2296_v8 }
 0x31b   : > { %v3391_v40 = vpop.eup %3390  ;;  %3410 = vrcp.f32 %v2470_v48  ;;  %v2477_v44 = vadd.f32 1.0, %v3389_v47  ;;  %v2228_v52 = vadd.f32 %v2165_v3, %v1846_v16  ;;  %v2235_v38 = vadd.f32 %v2172_v53, %v1853_v17  ;;  %v2084_v26 = vpop.permute.xlu1 %2083 }
 0x31c   : > { %v3393_v22 = vpop.eup %3392  ;;  %v1468_v32 = vadd.f32 %v7079_v46, %v7078_v12  ;;  %v1848_v50 = vadd.f32 %v1785_v54, %v7080_v35  ;;  %2598 = vst.msk [vmem:[%s5854_s6 + $0x170] sm:$0xff] %vm2551_vm0, %v3391_v40  ;;  %3412 = vpow2.f32 %v2415_v2  ;;  %v2167_v63 = vmul.f32 %v5649_v10, %v2084_v26 }
 0x31d   : > { %v3395_v56 = vpop.eup %3394  ;;  %v1407_v18 = vmul.f32 %v7082_v4, %v7081_v49  ;;  %2593 = vst.msk [vmem:[%s5854_s6 + $0x148] sm:$0xff] %vm2551_vm0, %v3393_v22  ;;  %3414 = vrcp.f32 %v2477_v44  ;;  %v2291_v9 = vsub.f32 0.0, %v2228_v52  ;;  %v2298_v33 = vsub.f32 0.0, %v2235_v38 }
 0x31e   : > { %v3397_v11 = vpop.eup %3396  ;;  %v1850_v21 = vadd.f32 %v1787_v43, %v1468_v32  ;;  %v2472_v55 = vadd.f32 1.0, %v3395_v56  ;;  %3416 = vpow2.f32 %v2405_v29  ;;  %v2230_v0 = vadd.f32 %v2167_v63, %v1848_v50 }
 0x31f   : > { %v3399_v23 = vpop.eup %3398  ;;  %v1789_v5 = vmul.f32 %v5287_v37, %v5701_v41  ;;  %v2479_v34 = vadd.f32 1.0, %v3397_v11  ;;  %3418 = vpow2.f32 %v2419_v6  ;;  %v2409_v62 = vmul.f32 1.442695, %v2291_v9  ;;  %v2092_v20 = vpop.permute.xlu1 %2091 }
 0x320   : > { %v3401_v60 = vpop.eup %3400  ;;  %2600 = vst.msk [vmem:[%s5854_s6 + $0x180] sm:$0xff] %vm2551_vm0, %v3399_v23  ;;  %3420 = vrcp.f32 %v2472_v55  ;;  %v2423_v25 = vmul.f32 1.442695, %v2298_v33  ;;  %v2293_v30 = vsub.f32 0.0, %v2230_v0  ;;  %v2169_v36 = vmul.f32 %v5649_v10, %v2092_v20 }
 0x321   : > { %v3403_v57 = vpop.eup %3402  ;;  %v1470_v15 = vadd.f32 %v1407_v18, %v7083_v27  ;;  %3422 = vrcp.f32 %v2479_v34  ;;  %v2474_v16 = vadd.f32 1.0, %v3401_v60 }
 0x322   : > { %v3405_v14 = vpop.eup %3404  ;;  %2595 = vst.msk [vmem:[%s5854_s6 + $0x158] sm:$0xff] %vm2551_vm0, %v3403_v57  ;;  %3424 = vpow2.f32 %v2409_v62  ;;  %v2232_v37 = vadd.f32 %v2169_v36, %v1850_v21  ;;  %v2413_v13 = vmul.f32 1.442695, %v2293_v30 }
 0x323   : > { %v3407_v41 = vpop.eup %3406  ;;  %v1852_v61 = vadd.f32 %v1789_v5, %v1470_v15  ;;  %3426 = vrcp.f32 %v2474_v16  ;;  %v2481_v7 = vadd.f32 1.0, %v3405_v14  ;;  %v2100_v24 = vpop.permute.xlu1 %2099 }
 0x324   : > { %v3409_v58 = vpop.eup %3408  ;;  %v2476_v59 = vadd.f32 1.0, %v3407_v41  ;;  %3428 = vpow2.f32 %v2423_v25  ;;  %v2295_v19 = vsub.f32 0.0, %v2232_v37  ;;  %v2171_v54 = vmul.f32 %v5649_v10, %v2100_v24 }
 0x325   : > { %v3411_v17 = vpop.eup %3410  ;;  %2602 = vst.msk [vmem:[%s5854_s6 + $0x190] sm:$0xff] %vm2551_vm0, %v3409_v58  ;;  %3430 = vrcp.f32 %v2481_v7 }
 0x326   : > { %v3413_v2 = vpop.eup %3412  ;;  %2597 = vst.msk [vmem:[%s5854_s6 + $0x168] sm:$0xff] %vm2551_vm0, %v3411_v17  ;;  %3432 = vrcp.f32 %v2476_v59  ;;  %v2417_v42 = vmul.f32 1.442695, %v2295_v19  ;;  %v2234_v39 = vadd.f32 %v2171_v54, %v1852_v61 }
 0x327   : > { %v3415_v31 = vpop.eup %3414  ;;  %v2483_v1 = vadd.f32 1.0, %v3413_v2  ;;  %3434 = vpow2.f32 %v2413_v13 }
 0x328   : > { %v3417_v51 = vpop.eup %3416  ;;  %2604 = vst.msk [vmem:[%s5854_s6 + $0x1a0] sm:$0xff] %vm2551_vm0, %v3415_v31  ;;  %3436 = vpow2.f32 %v2417_v42  ;;  %v2297_v10 = vsub.f32 0.0, %v2234_v39 }
 0x329   : > { %v3419_v8 = vpop.eup %3418  ;;  %3438 = vrcp.f32 %v2483_v1  ;;  %v2478_v28 = vadd.f32 1.0, %v3417_v51 }
 0x32a   : > { %v3421_v48 = vpop.eup %3420  ;;  %v2485_v3 = vadd.f32 1.0, %v3419_v8  ;;  %v2421_v53 = vmul.f32 1.442695, %v2297_v10 }
 0x32b   : > { %v3423_v47 = vpop.eup %3422  ;;  %2599 = vst.msk [vmem:[%s5854_s6 + $0x178] sm:$0xff] %vm2551_vm0, %v3421_v48  ;;  %3440 = vrcp.f32 %v2478_v28 }
 0x32c   : > { %v3425_v45 = vpop.eup %3424  ;;  %2606 = vst.msk [vmem:[%s5854_s6 + $0x1b0] sm:$0xff] %vm2551_vm0, %v3423_v47  ;;  %3442 = vrcp.f32 %v2485_v3 }
 0x32d   : > { %v3427_v43 = vpop.eup %3426  ;;  %v2480_v29 = vadd.f32 1.0, %v3425_v45  ;;  %3444 = vpow2.f32 %v2421_v53 }
 0x32e   : > { %v3429_v6 = vpop.eup %3428  ;;  %2601 = vst.msk [vmem:[%s5854_s6 + $0x188] sm:$0xff] %vm2551_vm0, %v3427_v43 }
 0x32f   : > { %v3431_v40 = vpop.eup %3430  ;;  %3446 = vrcp.f32 %v2480_v29  ;;  %v2487_v44 = vadd.f32 1.0, %v3429_v6 }
 0x330   : > { %v3433_v52 = vpop.eup %3432  ;;  %2608 = vst.msk [vmem:[%s5854_s6 + $0x1c0] sm:$0xff] %vm2551_vm0, %v3431_v40 }
 0x331   : > { %v3435_v38 = vpop.eup %3434  ;;  %2603 = vst.msk [vmem:[%s5854_s6 + $0x198] sm:$0xff] %vm2551_vm0, %v3433_v52  ;;  %3448 = vrcp.f32 %v2487_v44 }
 0x332   : > { %v3437_v26 = vpop.eup %3436  ;;  %v2482_v22 = vadd.f32 1.0, %v3435_v38 }
 0x333   : > { %v3439_v12 = vpop.eup %3438  ;;  %v2484_v46 = vadd.f32 1.0, %v3437_v26 }
 0x334   : > { %2610 = vst.msk [vmem:[%s5854_s6 + $0x1d0] sm:$0xff] %vm2551_vm0, %v3439_v12  ;;  %3450 = vrcp.f32 %v2482_v22 }
 0x335   : > { %v3441_v32 = vpop.eup %3440  ;;  %3452 = vrcp.f32 %v2484_v46 }
 0x336   : > { %v3443_v35 = vpop.eup %3442  ;;  %2605 = vst.msk [vmem:[%s5854_s6 + $0x1a8] sm:$0xff] %vm2551_vm0, %v3441_v32 }
 0x337   : > { %v3445_v50 = vpop.eup %3444  ;;  %2612 = vst.msk [vmem:[%s5854_s6 + $0x1e0] sm:$0xff] %vm2551_vm0, %v3443_v35 }
 0x338   : > { %v2486_v63 = vadd.f32 1.0, %v3445_v50 }
 0x339   : > { %v3447_v56 = vpop.eup %3446 }
 0x33a   : > { %2607 = vst.msk [vmem:[%s5854_s6 + $0x1b8] sm:$0xff] %vm2551_vm0, %v3447_v56  ;;  %3454 = vrcp.f32 %v2486_v63 }
 0x33b   : > { %v3449_v49 = vpop.eup %3448 }
 0x33c   : > { %2614 = vst.msk [vmem:[%s5854_s6 + $0x1f0] sm:$0xff] %vm2551_vm0, %v3449_v49 }
 0x33e   : > { %v3451_v4 = vpop.eup %3450 }
 0x33f   : > { %v3453_v18 = vpop.eup %3452  ;;  %2609 = vst.msk [vmem:[%s5854_s6 + $0x1c8] sm:$0xff] %vm2551_vm0, %v3451_v4  ;;  %2621 = sbr.rel (!%p3657_p4) target bundleno = 922 (0x39a), region = 36 }
 0x340   : > { %2611 = vst.msk [vmem:[%s5854_s6 + $0x1d8] sm:$0xff] %vm2551_vm0, %v3453_v18 }
 0x344   : > { %v3455_v9 = vpop.eup %3454 }
 0x345   : > { %2613 = vst.msk [vmem:[%s5854_s6 + $0x1e8] sm:$0xff] %vm2551_vm0, %v3455_v9 }
 0x346   : > { %s7093_s7 = smov (!%p2624_p8, %s2623_s7), 63 }
 0x347   : > { %s3086_s12 = sshll.u32 %s7093_s7, 7 }
 0x348   : > { %p3089_p9 = scmp.eq.s32.totalorder %s3086_s12, 0 }
 0x349   : > { %3515 = sdivrem.u32 (!%p3089_p9), %s7093_s7, 63 }
 0x34a   : > { %2632 = sbr.rel (%p3089_p9) target bundleno = 922 (0x39a), region = 40 }
 0x352   : > { %s6206_s14 = spop.drf %3515 }
 0x353   : > { %p3090_p10 = scmp.le.s32.totalorder %s6206_s14, 0 }
 0x354   : > { %s7084_s15 = smov (!%p3090_p10), %s6200_s11  ;;  %s7085_s17 = smov (!%p3090_p10), %s5854_s6 }
 0x355   : > { %3036 = sbr.rel (%p3090_p10) target bundleno = 893 (0x37d), region = 116  ;;  %s6215_s18 = smov (!%p3090_p10), 0  }
 0x356   : > { %s6217_s20 = smov (!%p3090_p10), 0  }
 0x35c LB: >> { %v2820_v33 = vld [vmem:[%s3581_s17] sm:$0xff]  ;;  %v2822_v11 = vld [vmem:[%s3581_s17 + $0x8] sm:$0xff]  ;;  %v2824_v21 = vld [vmem:[%s3581_s17 + $0x10] sm:$0xff]  ;;  %s2946_s21 = sadd.s32 1, %s3585_s18  ;;  %s2814_s20 = sadd.s32 1, %s3589_s20   ;;  %s3589_s20 = sphi %s6217_s20, %s2814_s20   ;;  %s3585_s18 = sphi %s6215_s18, %s7088_s18   ;;  %s3581_s17 = sphi %s7085_s17, %s7087_s17   ;;  %s3577_s15 = sphi %s7084_s15, %s7086_s15  }
 0x35d   : >> { %2821 = vst [vmem:[%s3577_s15] sm:$0xff] %v2820_v33  ;;  %2823 = vst [vmem:[%s3577_s15 + $0x8] sm:$0xff] %v2822_v11  ;;  %v2826_v55 = vld [vmem:[%s3581_s17 + $0x18] sm:$0xff]  ;;  %v2828_v0 = vld [vmem:[%s3581_s17 + $0x20] sm:$0xff]  ;;  %p2947_p11 = scmp.ge.s32.totalorder %s2946_s21, %s6206_s14  ;;  %p2813_p12 = scmp.ge.s32.totalorder %s2814_s20, %s6206_s14 }
 0x35e   : >> { %2825 = vst [vmem:[%s3577_s15 + $0x10] sm:$0xff] %v2824_v21  ;;  %v2830_v23 = vld [vmem:[%s3581_s17 + $0x28] sm:$0xff]  ;;  %2827 = vst [vmem:[%s3577_s15 + $0x18] sm:$0xff] %v2826_v55  ;;  %v2832_v5 = vld [vmem:[%s3581_s17 + $0x30] sm:$0xff] }
 0x35f   : >> { %2829 = vst [vmem:[%s3577_s15 + $0x20] sm:$0xff] %v2828_v0  ;;  %2831 = vst [vmem:[%s3577_s15 + $0x28] sm:$0xff] %v2830_v23  ;;  %v2834_v34 = vld [vmem:[%s3581_s17 + $0x38] sm:$0xff]  ;;  %v2836_v62 = vld [vmem:[%s3581_s17 + $0x40] sm:$0xff]  ;;  %s7095_s21 = smov (%p2947_p11, %s2946_s21), 0 }
 0x360   : >> { %2833 = vst [vmem:[%s3577_s15 + $0x30] sm:$0xff] %v2832_v5  ;;  %2835 = vst [vmem:[%s3577_s15 + $0x38] sm:$0xff] %v2834_v34  ;;  %v2838_v20 = vld [vmem:[%s3581_s17 + $0x48] sm:$0xff]  ;;  %v2840_v60 = vld [vmem:[%s3581_s17 + $0x50] sm:$0xff]  ;;  %s2949_s22 = smul.u32 504, %s7095_s21  ;;  %s7088_s18 = smov %s7095_s21 }
 0x361   : >> { %2837 = vst [vmem:[%s3577_s15 + $0x40] sm:$0xff] %v2836_v62  ;;  %v2842_v25 = vld [vmem:[%s3581_s17 + $0x58] sm:$0xff]  ;;  %2839 = vst [vmem:[%s3577_s15 + $0x48] sm:$0xff] %v2838_v20  ;;  %v2844_v30 = vld [vmem:[%s3581_s17 + $0x60] sm:$0xff] }
 0x362   : >> { %2841 = vst [vmem:[%s3577_s15 + $0x50] sm:$0xff] %v2840_v60  ;;  %2843 = vst [vmem:[%s3577_s15 + $0x58] sm:$0xff] %v2842_v25  ;;  %v2846_v36 = vld [vmem:[%s3581_s17 + $0x68] sm:$0xff]  ;;  %v2848_v57 = vld [vmem:[%s3581_s17 + $0x70] sm:$0xff]  ;;  %s6279_s23 = scalar_lea.vmem %s5854_s6, %s2949_s22 [#allocation2]   ;;  %s6282_s24 = scalar_lea.vmem %s6200_s11, %s2949_s22  }
 0x363   : >> { %2845 = vst [vmem:[%s3577_s15 + $0x60] sm:$0xff] %v2844_v30  ;;  %2847 = vst [vmem:[%s3577_s15 + $0x68] sm:$0xff] %v2846_v36  ;;  %v2850_v27 = vld [vmem:[%s3581_s17 + $0x78] sm:$0xff]  ;;  %v2852_v15 = vld [vmem:[%s3581_s17 + $0x80] sm:$0xff] }
 0x364   : >> { %2849 = vst [vmem:[%s3577_s15 + $0x70] sm:$0xff] %v2848_v57  ;;  %v2854_v16 = vld [vmem:[%s3581_s17 + $0x88] sm:$0xff]  ;;  %2851 = vst [vmem:[%s3577_s15 + $0x78] sm:$0xff] %v2850_v27  ;;  %v2856_v14 = vld [vmem:[%s3581_s17 + $0x90] sm:$0xff] }
 0x365   : >> { %2853 = vst [vmem:[%s3577_s15 + $0x80] sm:$0xff] %v2852_v15  ;;  %2855 = vst [vmem:[%s3577_s15 + $0x88] sm:$0xff] %v2854_v16  ;;  %v2858_v37 = vld [vmem:[%s3581_s17 + $0x98] sm:$0xff]  ;;  %v2860_v41 = vld [vmem:[%s3581_s17 + $0xa0] sm:$0xff] }
 0x366   : >> { %2857 = vst [vmem:[%s3577_s15 + $0x90] sm:$0xff] %v2856_v14  ;;  %2859 = vst [vmem:[%s3577_s15 + $0x98] sm:$0xff] %v2858_v37  ;;  %v2862_v61 = vld [vmem:[%s3581_s17 + $0xa8] sm:$0xff]  ;;  %v2864_v7 = vld [vmem:[%s3581_s17 + $0xb0] sm:$0xff] }
 0x367   : >> { %2861 = vst [vmem:[%s3577_s15 + $0xa0] sm:$0xff] %v2860_v41  ;;  %v2866_v13 = vld [vmem:[%s3581_s17 + $0xb8] sm:$0xff]  ;;  %2863 = vst [vmem:[%s3577_s15 + $0xa8] sm:$0xff] %v2862_v61  ;;  %v2868_v24 = vld [vmem:[%s3581_s17 + $0xc0] sm:$0xff] }
 0x368   : >> { %2865 = vst [vmem:[%s3577_s15 + $0xb0] sm:$0xff] %v2864_v7  ;;  %2867 = vst [vmem:[%s3577_s15 + $0xb8] sm:$0xff] %v2866_v13  ;;  %v2870_v58 = vld [vmem:[%s3581_s17 + $0xc8] sm:$0xff]  ;;  %v2872_v59 = vld [vmem:[%s3581_s17 + $0xd0] sm:$0xff] }
 0x369   : >> { %2869 = vst [vmem:[%s3577_s15 + $0xc0] sm:$0xff] %v2868_v24  ;;  %2871 = vst [vmem:[%s3577_s15 + $0xc8] sm:$0xff] %v2870_v58  ;;  %v2874_v19 = vld [vmem:[%s3581_s17 + $0xd8] sm:$0xff]  ;;  %v2876_v54 = vld [vmem:[%s3581_s17 + $0xe0] sm:$0xff] }
 0x36a   : >> { %2873 = vst [vmem:[%s3577_s15 + $0xd0] sm:$0xff] %v2872_v59  ;;  %v2878_v17 = vld [vmem:[%s3581_s17 + $0xe8] sm:$0xff]  ;;  %2875 = vst [vmem:[%s3577_s15 + $0xd8] sm:$0xff] %v2874_v19  ;;  %v2880_v2 = vld [vmem:[%s3581_s17 + $0xf0] sm:$0xff] }
 0x36b   : >> { %2877 = vst [vmem:[%s3577_s15 + $0xe0] sm:$0xff] %v2876_v54  ;;  %2879 = vst [vmem:[%s3577_s15 + $0xe8] sm:$0xff] %v2878_v17  ;;  %v2882_v42 = vld [vmem:[%s3581_s17 + $0xf8] sm:$0xff]  ;;  %v2884_v39 = vld [vmem:[%s3581_s17 + $0x100] sm:$0xff] }
 0x36c   : >> { %2881 = vst [vmem:[%s3577_s15 + $0xf0] sm:$0xff] %v2880_v2  ;;  %2883 = vst [vmem:[%s3577_s15 + $0xf8] sm:$0xff] %v2882_v42  ;;  %v2886_v31 = vld [vmem:[%s3581_s17 + $0x108] sm:$0xff]  ;;  %v2888_v1 = vld [vmem:[%s3581_s17 + $0x110] sm:$0xff] }
 0x36d   : >> { %2885 = vst [vmem:[%s3577_s15 + $0x100] sm:$0xff] %v2884_v39  ;;  %v2890_v51 = vld [vmem:[%s3581_s17 + $0x118] sm:$0xff]  ;;  %2887 = vst [vmem:[%s3577_s15 + $0x108] sm:$0xff] %v2886_v31  ;;  %v2892_v10 = vld [vmem:[%s3581_s17 + $0x120] sm:$0xff] }
 0x36e   : >> { %2889 = vst [vmem:[%s3577_s15 + $0x110] sm:$0xff] %v2888_v1  ;;  %2891 = vst [vmem:[%s3577_s15 + $0x118] sm:$0xff] %v2890_v51  ;;  %v2894_v8 = vld [vmem:[%s3581_s17 + $0x128] sm:$0xff]  ;;  %v2896_v28 = vld [vmem:[%s3581_s17 + $0x130] sm:$0xff] }
 0x36f   : >> { %2893 = vst [vmem:[%s3577_s15 + $0x120] sm:$0xff] %v2892_v10  ;;  %2895 = vst [vmem:[%s3577_s15 + $0x128] sm:$0xff] %v2894_v8  ;;  %v2898_v48 = vld [vmem:[%s3581_s17 + $0x138] sm:$0xff]  ;;  %v2900_v3 = vld [vmem:[%s3581_s17 + $0x140] sm:$0xff] }
 0x370   : >> { %2897 = vst [vmem:[%s3577_s15 + $0x130] sm:$0xff] %v2896_v28  ;;  %v2902_v53 = vld [vmem:[%s3581_s17 + $0x148] sm:$0xff]  ;;  %2899 = vst [vmem:[%s3577_s15 + $0x138] sm:$0xff] %v2898_v48  ;;  %v2904_v47 = vld [vmem:[%s3581_s17 + $0x150] sm:$0xff] }
 0x371   : >> { %2901 = vst [vmem:[%s3577_s15 + $0x140] sm:$0xff] %v2900_v3  ;;  %2903 = vst [vmem:[%s3577_s15 + $0x148] sm:$0xff] %v2902_v53  ;;  %v2906_v45 = vld [vmem:[%s3581_s17 + $0x158] sm:$0xff]  ;;  %v2908_v43 = vld [vmem:[%s3581_s17 + $0x160] sm:$0xff] }
 0x372   : >> { %2905 = vst [vmem:[%s3577_s15 + $0x150] sm:$0xff] %v2904_v47  ;;  %2907 = vst [vmem:[%s3577_s15 + $0x158] sm:$0xff] %v2906_v45  ;;  %v2910_v29 = vld [vmem:[%s3581_s17 + $0x168] sm:$0xff]  ;;  %v2912_v6 = vld [vmem:[%s3581_s17 + $0x170] sm:$0xff] }
 0x373   : >> { %2909 = vst [vmem:[%s3577_s15 + $0x160] sm:$0xff] %v2908_v43  ;;  %v2914_v40 = vld [vmem:[%s3581_s17 + $0x178] sm:$0xff]  ;;  %2911 = vst [vmem:[%s3577_s15 + $0x168] sm:$0xff] %v2910_v29  ;;  %v2916_v44 = vld [vmem:[%s3581_s17 + $0x180] sm:$0xff] }
 0x374   : >> { %2913 = vst [vmem:[%s3577_s15 + $0x170] sm:$0xff] %v2912_v6  ;;  %2915 = vst [vmem:[%s3577_s15 + $0x178] sm:$0xff] %v2914_v40  ;;  %v2918_v52 = vld [vmem:[%s3581_s17 + $0x188] sm:$0xff]  ;;  %v2920_v38 = vld [vmem:[%s3581_s17 + $0x190] sm:$0xff] }
 0x375   : >> { %2917 = vst [vmem:[%s3577_s15 + $0x180] sm:$0xff] %v2916_v44  ;;  %2919 = vst [vmem:[%s3577_s15 + $0x188] sm:$0xff] %v2918_v52  ;;  %v2922_v26 = vld [vmem:[%s3581_s17 + $0x198] sm:$0xff]  ;;  %v2924_v22 = vld [vmem:[%s3581_s17 + $0x1a0] sm:$0xff] }
 0x376   : >> { %2921 = vst [vmem:[%s3577_s15 + $0x190] sm:$0xff] %v2920_v38  ;;  %v2926_v12 = vld [vmem:[%s3581_s17 + $0x1a8] sm:$0xff]  ;;  %2923 = vst [vmem:[%s3577_s15 + $0x198] sm:$0xff] %v2922_v26  ;;  %v2928_v46 = vld [vmem:[%s3581_s17 + $0x1b0] sm:$0xff]  ;;  %2816 = sbr.rel (!%p2813_p12) target bundleno = 860 (0x35c), region = 122 }
 0x377   : >> { %2925 = vst [vmem:[%s3577_s15 + $0x1a0] sm:$0xff] %v2924_v22  ;;  %2927 = vst [vmem:[%s3577_s15 + $0x1a8] sm:$0xff] %v2926_v12  ;;  %v2930_v32 = vld [vmem:[%s3581_s17 + $0x1b8] sm:$0xff]  ;;  %v2932_v35 = vld [vmem:[%s3581_s17 + $0x1c0] sm:$0xff] }
 0x378   : >> { %2929 = vst [vmem:[%s3577_s15 + $0x1b0] sm:$0xff] %v2928_v46  ;;  %2931 = vst [vmem:[%s3577_s15 + $0x1b8] sm:$0xff] %v2930_v32  ;;  %v2934_v50 = vld [vmem:[%s3581_s17 + $0x1c8] sm:$0xff]  ;;  %v2936_v63 = vld [vmem:[%s3581_s17 + $0x1d0] sm:$0xff] }
 0x379   : >> { %2933 = vst [vmem:[%s3577_s15 + $0x1c0] sm:$0xff] %v2932_v35  ;;  %v2938_v56 = vld [vmem:[%s3581_s17 + $0x1d8] sm:$0xff]  ;;  %2935 = vst [vmem:[%s3577_s15 + $0x1c8] sm:$0xff] %v2934_v50  ;;  %v2940_v49 = vld [vmem:[%s3581_s17 + $0x1e0] sm:$0xff] }
 0x37a   : >> { %2937 = vst [vmem:[%s3577_s15 + $0x1d0] sm:$0xff] %v2936_v63  ;;  %2939 = vst [vmem:[%s3577_s15 + $0x1d8] sm:$0xff] %v2938_v56  ;;  %v2942_v4 = vld [vmem:[%s3581_s17 + $0x1e8] sm:$0xff]  ;;  %v2944_v18 = vld [vmem:[%s3581_s17 + $0x1f0] sm:$0xff]  ;;  %s7087_s17 = smov %s6279_s23 }
 0x37b   : >> { %2941 = vst [vmem:[%s3577_s15 + $0x1e0] sm:$0xff] %v2940_v49  ;;  %2943 = vst [vmem:[%s3577_s15 + $0x1e8] sm:$0xff] %v2942_v4 }
 0x37c   : >> { %2945 = vst [vmem:[%s3577_s15 + $0x1f0] sm:$0xff] %v2944_v18  ;;  %s7086_s15 = smov %s6282_s24 }
 0x37d PF: > { %3517 = sdivrem.u32 %s7093_s7, 63 }
 0x37e   : > { %s3091_s25 = smul.u32 504, %s6206_s14 }
 0x380   : > { %s2957_s26 = scalar_lea.vmem %s5854_s6, %s3091_s25 [#allocation2]   ;;  %s2959_s27 = scalar_lea.vmem %s6200_s11, %s3091_s25  }
 0x386   : > { %s3518_s28 = spop.drf %3517 }
 0x387   : > { %p3093_p13 = scmp.le.s32.totalorder %s3518_s28, 0 }
 0x388   : > { %s3591_s29 = smov (!%p3093_p13), %s2959_s27   ;;  %s3595_s30 = smov (!%p3093_p13), %s2957_s26  }
 0x389   : > { %3050 = sbr.rel (%p3093_p13) target bundleno = 922 (0x39a), region = 127  ;;  %s3599_s4 = smov (!%p3093_p13), 0  }
 0x38a   : > { %s3603_s5 = smov (!%p3093_p13), 0  }
 0x390 LB: >> { %v2969_v9 = vld [vmem:[%s3597_s30] sm:$0xff]  ;;  %s2971_s8 = sadd.s32 1, %s3601_s4  ;;  %s2963_s5 = sadd.s32 1, %s3605_s5   ;;  %s3605_s5 = sphi %s3603_s5, %s2963_s5   ;;  %s3601_s4 = sphi %s3599_s4, %s3600_s4   ;;  %s3597_s30 = sphi %s3595_s30, %s2976_s30   ;;  %s3593_s29 = sphi %s3591_s29, %s2977_s29  }
 0x391   : >> { %2970 = vst [vmem:[%s3593_s29] sm:$0xff] %v2969_v9  ;;  %p2972_p0 = scmp.ge.s32.totalorder %s2971_s8, %s3518_s28  ;;  %p2962_p1 = scmp.ge.s32.totalorder %s2963_s5, %s3518_s28 }
 0x393   : >> { %s7097_s8 = smov (%p2972_p0, %s2971_s8), 0  ;;  %2965 = sbr.rel (!%p2962_p1) target bundleno = 912 (0x390), region = 133 }
 0x394   : >> { %s3094_s6 = sshll.u32 %s7097_s8, 3  ;;  %s3600_s4 = smov %s7097_s8  }
 0x395   : >> { %s2976_s30 = scalar_lea.vmem %s2957_s26, %s3094_s6 [#allocation2]   ;;  %s2977_s29 = scalar_lea.vmem %s2959_s27, %s3094_s6  }
 0x39a PF: > { %p10_p2 = scmp.ge.s32.totalorder %s3647_s16, 4   ;;  %s7089_s12 = smov %s3569_s13 }
 0x39b   : > { %s7090_s13 = smov %s3655_s19  ;;  %s7091_s14 = smov %s3647_s16 }
 0x39c   :  { %12 = sbr.rel (!%p10_p2) target bundleno = 2 (0x2), region = 144 }

</bundles_post_ra>
